<compile_context>
chip_gen: v7x
topology: tpu7x:2x2x1
jax: 0.10.0
libtpu: 0.0.40
codegen_flags: <defaults>
</compile_context>

<pallas_src>
import functools

import jax
import jax.numpy as jnp
import numpy as np
from jax import lax
from jax.experimental import pallas as pl
from jax.experimental.pallas import tpu as pltpu


def _vmem_capacity_bytes():
    try:
        return int(pltpu.get_tpu_info().vmem_capacity_bytes)
    except Exception:
        return 64 * 1024 * 1024            # conservative (v7x per-core size)


def _se_res2_kernel(s, cs, T, bt, out2_dtype,
                    x_ref, w1_ref, sh1_ref, w2_ref, sh2_ref,
                    w3_ref, sh3_ref, f1wt_ref, f1b_ref, f2w_ref, f2b_ref,
                    o_ref,
                    h1c_ref, out2c_ref, stk_ref):
    N = bt * T                                             # lanes in this block

    # ---- conv1 (1x1, BN scale + bias folded into weights/shift) + relu ------
    x_bf = x_ref[...].astype(jnp.bfloat16)                 # [C, N]
    h1 = jnp.dot(w1_ref[...], x_bf, preferred_element_type=jnp.float32) + sh1_ref[...]
    h1 = jnp.maximum(h1, 0.0)

    # Stash chunks 1..s-1 for dynamic access inside the fori_loop; chunk 0 is
    # the pass-through split written LAST (PyTorch: cat(sp_1..sp_{s-1}, spx[0])).
    for j in range(1, s):
        h1c_ref[j - 1] = h1[j * cs:(j + 1) * cs, :]
    out2c_ref[s - 1] = h1[0:cs, :].astype(out2_dtype)

    # Per-item boundary-lane masks used to repair the 2 reflect-padded lanes.
    lane = lax.broadcasted_iota(jnp.int32, (cs, N), 1)

    def _any_eq(offsets):
        m = lane == offsets[0]
        for o in offsets[1:]:
            m = m | (lane == o)
        return m

    is0 = _any_eq([b * T for b in range(bt)])
    is1 = _any_eq([b * T + 1 for b in range(bt)])
    isL = _any_eq([b * T + T - 1 for b in range(bt)])
    isL1 = _any_eq([b * T + T - 2 for b in range(bt)])

    # ---- Res2 branch: chunks 1..s-1 get accumulate + dilated conv (k=3, d=2,
    # reflect pad 2) + folded BN + relu.  pltpu.roll == jnp.roll semantics:
    # roll(x, k)[t] = x[t - k].  Cross-item roll wrap only touches the masked
    # boundary lanes, so the global roll over [C, bt*T] is safe.
    def res2_body(i, sp_prev):
        chunk = h1c_ref[i - 1]                             # [cs, N] f32
        spv = sp_prev + chunk                              # i == 1: sp_prev == 0
        r_p2 = pltpu.roll(spv, 2, axis=1)                  # t -> spv[t-2]
        r_m2 = pltpu.roll(spv, N - 2, axis=1)              # t -> spv[t+2]
        # tap a: x[t-2] with left reflect  (a[0]=x[2], a[1]=x[1])
        left = jnp.where(is0, r_m2, jnp.where(is1, spv, r_p2))
        # tap c: x[t+2] with right reflect (c[T-2]=x[T-2], c[T-1]=x[T-3])
        right = jnp.where(isL, r_p2, jnp.where(isL1, spv, r_m2))
        # Reused [3cs, N] bf16 scratch for the stacked taps; one fused matmul
        # W2_i = [w2a|w2b|w2c] of shape [cs, 3cs].
        stk_ref[0:cs, :] = left.astype(jnp.bfloat16)
        stk_ref[cs:2 * cs, :] = spv.astype(jnp.bfloat16)
        stk_ref[2 * cs:3 * cs, :] = right.astype(jnp.bfloat16)
        c = jnp.dot(w2_ref[i], stk_ref[...],
                    preferred_element_type=jnp.float32) + sh2_ref[i]
        sp_new = jnp.maximum(c, 0.0)
        out2c_ref[i - 1] = sp_new.astype(out2_dtype)
        return sp_new

    lax.fori_loop(1, s, res2_body, jnp.zeros((cs, N), jnp.float32))

    # ---- conv3 (1x1, folded) + relu, consuming the bf16 out2 chunks ----------
    out2 = jnp.concatenate(
        [out2c_ref[j].astype(jnp.bfloat16) for j in range(s)], axis=0)  # [C, N]
    h3 = jnp.dot(w3_ref[...], out2, preferred_element_type=jnp.float32) + sh3_ref[...]
    h3 = jnp.maximum(h3, 0.0)

    # ---- SE per item: time-mean -> fc1 -> relu -> fc2 -> sigmoid -> scale.
    # Done on VPU/XLU (broadcast-mult + reduces) instead of two N=1 MXU passes;
    # sigmoid via EUP exp + approx reciprocal.  Residual added per item.
    for b in range(bt):
        sl = slice(b * T, (b + 1) * T)
        h3_b = h3[:, sl]                                   # [C, T]
        m = jnp.mean(h3_b, axis=1, keepdims=True)          # [C, 1]
        hid = jnp.sum(f1wt_ref[...] * m, axis=0, keepdims=True) + f1b_ref[...]
        hid = jnp.maximum(hid, 0.0)                        # [1, bneck]
        z = jnp.sum(f2w_ref[...] * hid, axis=1, keepdims=True) + f2b_ref[...]
        sv = pl.reciprocal(1.0 + jnp.exp(-z), approx=True)  # sigmoid, [C, 1]
        o_ref[:, sl] = (h3_b * sv + x_ref[:, sl]).astype(o_ref.dtype)


_PARAM_ORDER = ("w1", "sh1", "w2", "sh2", "w3", "sh3", "f1wt", "f1b", "f2w", "f2b")


def se_res2_block(x, kp, *, s, batch_tile=None):
    B, C, T = x.shape
    assert C % s == 0 and T >= 5
    cs = C // s

    if batch_tile is None:
        batch_tile = 2 if B % 2 == 0 else 1
    bt = batch_tile
    assert B % bt == 0
    if (bt * T) % 128 != 0 and bt != B:
        bt = B                              # fall back to one lane-full block
    N = bt * T
    grid = (B // bt,)

    # bf16 out2 chunks when the chunk height is bf16-tile aligned (16 rows);
    # f32 fallback keeps tiny-cs configs tile-aligned.
    out2_dtype = jnp.bfloat16 if cs % 16 == 0 else jnp.float32

    plist = [kp[k] for k in _PARAM_ORDER]

    # Lane-dense layout: [B, C, T] -> [C, B*T] (one wrapper transpose each way).
    xt = jnp.transpose(x, (1, 0, 2)).reshape(C, B * T)

    def full_spec(shape):
        nd = len(shape)
        return pl.BlockSpec(shape, lambda g, _nd=nd: (0,) * _nd)

    in_specs = [pl.BlockSpec((C, N), lambda g: (0, g))]
    in_specs += [full_spec(p.shape) for p in plist]
    out_spec = pl.BlockSpec((C, N), lambda g: (0, g))

    # VMEM budget: double-buffered I/O blocks + (double-buffered) params + scratch,
    # clamped below the physical per-core VMEM (64 MiB on v7x) with headroom.
    io_block = C * N * x.dtype.itemsize
    param_bytes = sum(int(np.prod(p.shape)) * p.dtype.itemsize for p in plist)
    scratch_bytes = ((s - 1) * cs * N * 4
                     + s * cs * N * np.dtype(out2_dtype).itemsize
                     + 3 * cs * N * 2)
    est = 4 * io_block + 2 * param_bytes + scratch_bytes
    cap = _vmem_capacity_bytes() * 3 // 4
    vmem_limit = int(min(cap, max(2 * est, 32 * 1024 * 1024)))

    bneck = kp["f1wt"].shape[1]
    flops = (2 * 2 * C * C * (B * T)                 # conv1 + conv3
             + (s - 1) * 2 * cs * (3 * cs) * (B * T)  # res2 dilated convs
             + B * 4 * C * bneck)                     # SE (VPU)
    cost = pl.CostEstimate(flops=int(flops), transcendentals=int(B * C),
                           bytes_accessed=int(2 * B * C * T * x.dtype.itemsize
                                              + param_bytes))

    kernel = functools.partial(_se_res2_kernel, s, cs, T, bt, out2_dtype)
    out_flat = pl.pallas_call(
        kernel,
        out_shape=jax.ShapeDtypeStruct((C, B * T), x.dtype),
        grid=grid,
        in_specs=in_specs,
        out_specs=out_spec,
        scratch_shapes=[
            pltpu.VMEM((s - 1, cs, N), jnp.float32),   # h1 chunks 1..s-1
            pltpu.VMEM((s, cs, N), out2_dtype),        # res2 output chunks
            pltpu.VMEM((3 * cs, N), jnp.bfloat16),     # stacked conv taps (reused)
        ],
        compiler_params=pltpu.CompilerParams(
            dimension_semantics=("parallel",),
            vmem_limit_bytes=vmem_limit,
        ),
        cost_estimate=cost,
    )(xt, *plist)

    return out_flat.reshape(C, B, T).transpose(1, 0, 2)


def init_params(key, C, s, bottleneck, eps=1e-5):
    """Raw PyTorch-style parameters (eval-mode BN stats folded to scale/shift)."""
    cs = C // s
    ks = jax.random.split(key, 21)

    def bn_fold(kg, kb, km, kv, shape):
        gamma = 1.0 + 0.1 * jax.random.normal(kg, shape, dtype=jnp.float32)
        beta = 0.05 * jax.random.normal(kb, shape, dtype=jnp.float32)
        mean = 0.05 * jax.random.normal(km, shape, dtype=jnp.float32)
        var = 0.9 + 0.2 * jax.random.uniform(kv, shape, dtype=jnp.float32)
        scale = gamma / jnp.sqrt(var + eps)
        shift = beta - mean * scale
        return scale, shift

    w1 = 0.05 * jax.random.normal(ks[0], (C, C), dtype=jnp.float32)
    b1 = 0.05 * jax.random.normal(ks[1], (C, 1), dtype=jnp.float32)
    sc1, sh1 = bn_fold(ks[2], ks[3], ks[4], ks[5], (C, 1))
    w2 = 0.1 * jax.random.normal(ks[6], (s, cs, cs, 3), dtype=jnp.float32)
    sc2, sh2 = bn_fold(ks[7], ks[8], ks[9], ks[10], (s, cs, 1))
    w3 = 0.05 * jax.random.normal(ks[11], (C, C), dtype=jnp.float32)
    b3 = 0.05 * jax.random.normal(ks[12], (C, 1), dtype=jnp.float32)
    sc3, sh3 = bn_fold(ks[13], ks[14], ks[15], ks[16], (C, 1))
    f1w = 0.1 * jax.random.normal(ks[17], (bottleneck, C), dtype=jnp.float32)
    f1b = 0.05 * jax.random.normal(ks[18], (bottleneck, 1), dtype=jnp.float32)
    f2w = 0.1 * jax.random.normal(ks[19], (C, bottleneck), dtype=jnp.float32)
    f2b = 0.05 * jax.random.normal(ks[20], (C, 1), dtype=jnp.float32)
    return dict(w1=w1, b1=b1, bn1_sc=sc1, bn1_sh=sh1,
                w2=w2, bn2_sc=sc2, bn2_sh=sh2,
                w3=w3, b3=b3, bn3_sc=sc3, bn3_sh=sh3,
                f1w=f1w, f1b=f1b, f2w=f2w, f2b=f2b)


def prepare_kernel_params(p):
    """Host-side folding: BN scale + conv bias into weights, conv weights -> bf16,
    SE weights re-oriented for the in-kernel VPU formulation."""
    w1f = (p["bn1_sc"] * p["w1"]).astype(jnp.bfloat16)
    sh1f = p["bn1_sc"] * p["b1"] + p["bn1_sh"]
    # Fuse the three dilated-conv taps: W2_i = [w2a_i | w2b_i | w2c_i]  [cs, 3cs].
    w2f = jnp.concatenate([p["w2"][..., 0], p["w2"][..., 1], p["w2"][..., 2]], axis=-1)
    w2f = (p["bn2_sc"] * w2f).astype(jnp.bfloat16)         # row scale, no conv bias
    sh2f = p["bn2_sh"]
    w3f = (p["bn3_sc"] * p["w3"]).astype(jnp.bfloat16)
    sh3f = p["bn3_sc"] * p["b3"] + p["bn3_sh"]
    return dict(w1=w1f, sh1=sh1f, w2=w2f, sh2=sh2f, w3=w3f, sh3=sh3f,
                f1wt=jnp.transpose(p["f1w"]),              # [C, bneck]
                f1b=jnp.transpose(p["f1b"]),               # [1, bneck]
                f2w=p["f2w"], f2b=p["f2b"])


def reference_forward(x, kp, *, s):
    """Pure-JAX reference mirroring the PyTorch forward (same folded bf16 weights,
    but reflect padding via concat + shifted slices and per-tap matmuls)."""
    B, C, T = x.shape
    cs = C // s
    bf = jnp.bfloat16

    def single(xb):
        h1 = jnp.maximum(
            jnp.dot(kp["w1"], xb.astype(bf), preferred_element_type=jnp.float32)
            + kp["sh1"], 0.0)
        chunks = []
        sp = None
        for i in range(1, s):
            chunk = h1[i * cs:(i + 1) * cs]
            sp = chunk if i == 1 else sp + chunk
            pad = jnp.concatenate(
                [sp[:, 2:3], sp[:, 1:2], sp, sp[:, T - 2:T - 1], sp[:, T - 3:T - 2]],
                axis=1)
            w2i = kp["w2"][i]
            c = (jnp.dot(w2i[:, 0:cs], pad[:, 0:T].astype(bf),
                         preferred_element_type=jnp.float32)
                 + jnp.dot(w2i[:, cs:2 * cs], pad[:, 2:T + 2].astype(bf),
                           preferred_element_type=jnp.float32)
                 + jnp.dot(w2i[:, 2 * cs:3 * cs], pad[:, 4:T + 4].astype(bf),
                           preferred_element_type=jnp.float32))
            sp = jnp.maximum(c + kp["sh2"][i], 0.0)
            chunks.append(sp)
        chunks.append(h1[0:cs])
        out2 = jnp.concatenate(chunks, axis=0).astype(bf)
        h3 = jnp.maximum(
            jnp.dot(kp["w3"], out2, preferred_element_type=jnp.float32) + kp["sh3"], 0.0)
        m = jnp.mean(h3, axis=1, keepdims=True)                     # [C, 1]
        hid = jnp.maximum(jnp.sum(kp["f1wt"] * m, axis=0, keepdims=True)
                          + kp["f1b"], 0.0)                         # [1, bneck]
        z = jnp.sum(kp["f2w"] * hid, axis=1, keepdims=True) + kp["f2b"]
        s_v = 1.0 / (1.0 + jnp.exp(-z))
        return h3 * s_v + xb

    return jax.vmap(single)(x)


if __name__ == "__main__":
    # Small shapes consistent with the module: C divisible by s=8, cs a multiple
    # of 16 (bf16 sublane tile), T lane-dense, B=4 -> 2 grid steps (batch_tile=2).
    B, C, T = 4, 128, 128
    s, bottleneck = 8, 32          # k=3, d=2 are the module defaults (hard-coded)

    key = jax.random.PRNGKey(0)
    kx, kp = jax.random.split(key)
    x = jax.random.normal(kx, (B, C, T), dtype=jnp.float32)
    raw = init_params(kp, C, s, bottleneck)
    kparams = prepare_kernel_params(raw)

    out = se_res2_block(x, kparams, s=s)
    out = jax.block_until_ready(out)

    ref = reference_forward(x, kparams, s=s)
    assert out.shape == (B, C, T)
    np.testing.assert_allclose(np.asarray(out), np.asarray(ref), rtol=1e-2, atol=1e-2)

    print("KERNEL_OK")
</pallas_src>

<mosaic_0001>
module attributes {stable_mosaic.version = 11 : i64} {
  func.func @_se_res2_kernel(%arg0: i32, %arg1: memref<128x256xf32, #tpu.memory_space<vmem>>, %arg2: memref<128x128xbf16, #tpu.memory_space<vmem>>, %arg3: memref<128x1xf32, #tpu.memory_space<vmem>>, %arg4: memref<8x16x48xbf16, #tpu.memory_space<vmem>>, %arg5: memref<8x16x1xf32, #tpu.memory_space<vmem>>, %arg6: memref<128x128xbf16, #tpu.memory_space<vmem>>, %arg7: memref<128x1xf32, #tpu.memory_space<vmem>>, %arg8: memref<128x32xf32, #tpu.memory_space<vmem>>, %arg9: memref<1x32xf32, #tpu.memory_space<vmem>>, %arg10: memref<128x32xf32, #tpu.memory_space<vmem>>, %arg11: memref<128x1xf32, #tpu.memory_space<vmem>>, %arg12: memref<128x256xf32, #tpu.memory_space<vmem>>, %arg13: memref<7x16x256xf32, #tpu.memory_space<vmem>>, %arg14: memref<8x16x256xbf16, #tpu.memory_space<vmem>>, %arg15: memref<48x256xbf16, #tpu.memory_space<vmem>>) attributes {dimension_semantics = [#tpu.dimension_semantics<parallel>], iteration_bounds = array<i64: 2>, scalar_prefetch = 0 : i64, scratch_operands = 3 : i64, tpu.core_type = #tpu.core_type<tc>, window_params = [{transform_indices = @transform_0, window_bounds = array<i64: 128, 256>}, {pipeline_mode = #tpu.pipeline_mode<synchronous>, transform_indices = @transform_1, window_bounds = array<i64: 128, 128>}, {pipeline_mode = #tpu.pipeline_mode<synchronous>, transform_indices = @transform_2, window_bounds = array<i64: 128, 1>}, {pipeline_mode = #tpu.pipeline_mode<synchronous>, transform_indices = @transform_3, window_bounds = array<i64: 8, 16, 48>}, {pipeline_mode = #tpu.pipeline_mode<synchronous>, transform_indices = @transform_4, window_bounds = array<i64: 8, 16, 1>}, {pipeline_mode = #tpu.pipeline_mode<synchronous>, transform_indices = @transform_5, window_bounds = array<i64: 128, 128>}, {pipeline_mode = #tpu.pipeline_mode<synchronous>, transform_indices = @transform_6, window_bounds = array<i64: 128, 1>}, {pipeline_mode = #tpu.pipeline_mode<synchronous>, transform_indices = @transform_7, window_bounds = array<i64: 128, 32>}, {pipeline_mode = #tpu.pipeline_mode<synchronous>, transform_indices = @transform_8, window_bounds = array<i64: 1, 32>}, {pipeline_mode = #tpu.pipeline_mode<synchronous>, transform_indices = @transform_9, window_bounds = array<i64: 128, 32>}, {pipeline_mode = #tpu.pipeline_mode<synchronous>, transform_indices = @transform_10, window_bounds = array<i64: 128, 1>}, {transform_indices = @transform_11, window_bounds = array<i64: 128, 256>}]} {
    %c0 = arith.constant 0 : index
    %c0_0 = arith.constant 0 : index
    %0 = vector.load %arg1[%c0, %c0_0] : memref<128x256xf32, #tpu.memory_space<vmem>>, vector<128x256xf32>
    %1 = arith.truncf %0 : vector<128x256xf32> to vector<128x256xbf16>
    %c0_1 = arith.constant 0 : index
    %c0_2 = arith.constant 0 : index
    %2 = vector.load %arg2[%c0_1, %c0_2] : memref<128x128xbf16, #tpu.memory_space<vmem>>, vector<128x128xbf16>
    %cst = arith.constant dense<0.000000e+00> : vector<128x256xf32>
    %3 = tpu.matmul %2, %1, %cst {dimension_numbers = #tpu.dot_dimension_numbers<[1], [0], [0], [1], [0, 0, 1, 1], [], []>} : vector<128x128xbf16>, vector<128x256xbf16>, vector<128x256xf32> -> vector<128x256xf32>
    %c0_3 = arith.constant 0 : index
    %c0_4 = arith.constant 0 : index
    %4 = vector.load %arg3[%c0_3, %c0_4] : memref<128x1xf32, #tpu.memory_space<vmem>>, vector<128x1xf32>
    %5 = vector.broadcast %4 : vector<128x1xf32> to vector<128x256xf32>
    %6 = arith.addf %3, %5 : vector<128x256xf32>
    %cst_5 = arith.constant 0.000000e+00 : f32
    %7 = vector.broadcast %cst_5 : f32 to vector<128x256xf32>
    %8 = arith.maximumf %6, %7 : vector<128x256xf32>
    %9 = vector.extract_strided_slice %8 {offsets = [16, 0], sizes = [16, 256], strides = [1, 1]} : vector<128x256xf32> to vector<16x256xf32>
    %c0_6 = arith.constant 0 : index
    %c0_7 = arith.constant 0 : index
    %c0_8 = arith.constant 0 : index
    %10 = vector.load %arg13[%c0_6, %c0_7, %c0_8] : memref<7x16x256xf32, #tpu.memory_space<vmem>>, vector<1x16x256xf32>
    %11 = vector.shape_cast %10 : vector<1x16x256xf32> to vector<16x256xf32>
    %12 = vector.shape_cast %9 : vector<16x256xf32> to vector<1x16x256xf32>
    tpu.vector_store %arg13[%c0_6, %c0_7, %c0_8], %12 {strides = array<i32>} : memref<7x16x256xf32, #tpu.memory_space<vmem>>, vector<1x16x256xf32>,
    %13 = vector.extract_strided_slice %8 {offsets = [32, 0], sizes = [16, 256], strides = [1, 1]} : vector<128x256xf32> to vector<16x256xf32>
    %c1 = arith.constant 1 : index
    %c0_9 = arith.constant 0 : index
    %c0_10 = arith.constant 0 : index
    %14 = vector.load %arg13[%c1, %c0_9, %c0_10] : memref<7x16x256xf32, #tpu.memory_space<vmem>>, vector<1x16x256xf32>
    %15 = vector.shape_cast %14 : vector<1x16x256xf32> to vector<16x256xf32>
    %16 = vector.shape_cast %13 : vector<16x256xf32> to vector<1x16x256xf32>
    tpu.vector_store %arg13[%c1, %c0_9, %c0_10], %16 {strides = array<i32>} : memref<7x16x256xf32, #tpu.memory_space<vmem>>, vector<1x16x256xf32>,
    %17 = vector.extract_strided_slice %8 {offsets = [48, 0], sizes = [16, 256], strides = [1, 1]} : vector<128x256xf32> to vector<16x256xf32>
    %c2 = arith.constant 2 : index
    %c0_11 = arith.constant 0 : index
    %c0_12 = arith.constant 0 : index
    %18 = vector.load %arg13[%c2, %c0_11, %c0_12] : memref<7x16x256xf32, #tpu.memory_space<vmem>>, vector<1x16x256xf32>
    %19 = vector.shape_cast %18 : vector<1x16x256xf32> to vector<16x256xf32>
    %20 = vector.shape_cast %17 : vector<16x256xf32> to vector<1x16x256xf32>
    tpu.vector_store %arg13[%c2, %c0_11, %c0_12], %20 {strides = array<i32>} : memref<7x16x256xf32, #tpu.memory_space<vmem>>, vector<1x16x256xf32>,
    %21 = vector.extract_strided_slice %8 {offsets = [64, 0], sizes = [16, 256], strides = [1, 1]} : vector<128x256xf32> to vector<16x256xf32>
    %c3 = arith.constant 3 : index
    %c0_13 = arith.constant 0 : index
    %c0_14 = arith.constant 0 : index
    %22 = vector.load %arg13[%c3, %c0_13, %c0_14] : memref<7x16x256xf32, #tpu.memory_space<vmem>>, vector<1x16x256xf32>
    %23 = vector.shape_cast %22 : vector<1x16x256xf32> to vector<16x256xf32>
    %24 = vector.shape_cast %21 : vector<16x256xf32> to vector<1x16x256xf32>
    tpu.vector_store %arg13[%c3, %c0_13, %c0_14], %24 {strides = array<i32>} : memref<7x16x256xf32, #tpu.memory_space<vmem>>, vector<1x16x256xf32>,
    %25 = vector.extract_strided_slice %8 {offsets = [80, 0], sizes = [16, 256], strides = [1, 1]} : vector<128x256xf32> to vector<16x256xf32>
    %c4 = arith.constant 4 : index
    %c0_15 = arith.constant 0 : index
    %c0_16 = arith.constant 0 : index
    %26 = vector.load %arg13[%c4, %c0_15, %c0_16] : memref<7x16x256xf32, #tpu.memory_space<vmem>>, vector<1x16x256xf32>
    %27 = vector.shape_cast %26 : vector<1x16x256xf32> to vector<16x256xf32>
    %28 = vector.shape_cast %25 : vector<16x256xf32> to vector<1x16x256xf32>
    tpu.vector_store %arg13[%c4, %c0_15, %c0_16], %28 {strides = array<i32>} : memref<7x16x256xf32, #tpu.memory_space<vmem>>, vector<1x16x256xf32>,
    %29 = vector.extract_strided_slice %8 {offsets = [96, 0], sizes = [16, 256], strides = [1, 1]} : vector<128x256xf32> to vector<16x256xf32>
    %c5 = arith.constant 5 : index
    %c0_17 = arith.constant 0 : index
    %c0_18 = arith.constant 0 : index
    %30 = vector.load %arg13[%c5, %c0_17, %c0_18] : memref<7x16x256xf32, #tpu.memory_space<vmem>>, vector<1x16x256xf32>
    %31 = vector.shape_cast %30 : vector<1x16x256xf32> to vector<16x256xf32>
    %32 = vector.shape_cast %29 : vector<16x256xf32> to vector<1x16x256xf32>
    tpu.vector_store %arg13[%c5, %c0_17, %c0_18], %32 {strides = array<i32>} : memref<7x16x256xf32, #tpu.memory_space<vmem>>, vector<1x16x256xf32>,
    %33 = vector.extract_strided_slice %8 {offsets = [112, 0], sizes = [16, 256], strides = [1, 1]} : vector<128x256xf32> to vector<16x256xf32>
    %c6 = arith.constant 6 : index
    %c0_19 = arith.constant 0 : index
    %c0_20 = arith.constant 0 : index
    %34 = vector.load %arg13[%c6, %c0_19, %c0_20] : memref<7x16x256xf32, #tpu.memory_space<vmem>>, vector<1x16x256xf32>
    %35 = vector.shape_cast %34 : vector<1x16x256xf32> to vector<16x256xf32>
    %36 = vector.shape_cast %33 : vector<16x256xf32> to vector<1x16x256xf32>
    tpu.vector_store %arg13[%c6, %c0_19, %c0_20], %36 {strides = array<i32>} : memref<7x16x256xf32, #tpu.memory_space<vmem>>, vector<1x16x256xf32>,
    %37 = vector.extract_strided_slice %8 {offsets = [0, 0], sizes = [16, 256], strides = [1, 1]} : vector<128x256xf32> to vector<16x256xf32>
    %38 = arith.truncf %37 : vector<16x256xf32> to vector<16x256xbf16>
    %c7 = arith.constant 7 : index
    %c0_21 = arith.constant 0 : index
    %c0_22 = arith.constant 0 : index
    %39 = vector.load %arg14[%c7, %c0_21, %c0_22] : memref<8x16x256xbf16, #tpu.memory_space<vmem>>, vector<1x16x256xbf16>
    %40 = vector.shape_cast %39 : vector<1x16x256xbf16> to vector<16x256xbf16>
    %41 = vector.shape_cast %38 : vector<16x256xbf16> to vector<1x16x256xbf16>
    tpu.vector_store %arg14[%c7, %c0_21, %c0_22], %41 {strides = array<i32>} : memref<8x16x256xbf16, #tpu.memory_space<vmem>>, vector<1x16x256xbf16>,
    %42 = tpu.iota {dimensions = array<i32: 1>} : vector<16x256xi32>
    %c0_i32 = arith.constant 0 : i32
    %43 = vector.broadcast %c0_i32 : i32 to vector<16x256xi32>
    %44 = arith.cmpi eq, %42, %43 : vector<16x256xi32>
    %c128_i32 = arith.constant 128 : i32
    %45 = vector.broadcast %c128_i32 : i32 to vector<16x256xi32>
    %46 = arith.cmpi eq, %42, %45 : vector<16x256xi32>
    %47 = arith.ori %44, %46 : vector<16x256xi1>
    %c1_i32 = arith.constant 1 : i32
    %48 = vector.broadcast %c1_i32 : i32 to vector<16x256xi32>
    %49 = arith.cmpi eq, %42, %48 : vector<16x256xi32>
    %c129_i32 = arith.constant 129 : i32
    %50 = vector.broadcast %c129_i32 : i32 to vector<16x256xi32>
    %51 = arith.cmpi eq, %42, %50 : vector<16x256xi32>
    %52 = arith.ori %49, %51 : vector<16x256xi1>
    %c127_i32 = arith.constant 127 : i32
    %53 = vector.broadcast %c127_i32 : i32 to vector<16x256xi32>
    %54 = arith.cmpi eq, %42, %53 : vector<16x256xi32>
    %c255_i32 = arith.constant 255 : i32
    %55 = vector.broadcast %c255_i32 : i32 to vector<16x256xi32>
    %56 = arith.cmpi eq, %42, %55 : vector<16x256xi32>
    %57 = arith.ori %54, %56 : vector<16x256xi1>
    %c126_i32 = arith.constant 126 : i32
    %58 = vector.broadcast %c126_i32 : i32 to vector<16x256xi32>
    %59 = arith.cmpi eq, %42, %58 : vector<16x256xi32>
    %c254_i32 = arith.constant 254 : i32
    %60 = vector.broadcast %c254_i32 : i32 to vector<16x256xi32>
    %61 = arith.cmpi eq, %42, %60 : vector<16x256xi32>
    %62 = arith.ori %59, %61 : vector<16x256xi1>
    %cst_23 = arith.constant 0.000000e+00 : f32
    %63 = vector.broadcast %cst_23 : f32 to vector<16x256xf32>
    %c1_i32_24 = arith.constant 1 : i32
    %c7_i32 = arith.constant 7 : i32
    %64 = arith.addi %c1_i32_24, %c7_i32 : i32
    %c1_i32_25 = arith.constant 1 : i32
    %65 = scf.for %arg16 = %c1_i32_24 to %64 step %c1_i32_25 iter_args(%arg17 = %63) -> (vector<16x256xf32>)  : i32 {
      %c1_i32_94 = arith.constant 1 : i32
      %154 = arith.subi %arg16, %c1_i32_94 : i32
      %155 = arith.index_cast %154 : i32 to index
      %c0_95 = arith.constant 0 : index
      %c0_96 = arith.constant 0 : index
      %156 = vector.load %arg13[%155, %c0_95, %c0_96] : memref<7x16x256xf32, #tpu.memory_space<vmem>>, vector<1x16x256xf32>
      %157 = vector.shape_cast %156 : vector<1x16x256xf32> to vector<16x256xf32>
      %158 = arith.addf %arg17, %157 : vector<16x256xf32>
      %c2_i32 = arith.constant 2 : i32
      %159 = tpu.dynamic_rotate %158 by %c2_i32 dim 1 : vector<16x256xf32>, i32 -> vector<16x256xf32>
      %c254_i32_97 = arith.constant 254 : i32
      %160 = tpu.dynamic_rotate %158 by %c254_i32_97 dim 1 : vector<16x256xf32>, i32 -> vector<16x256xf32>
      %161 = arith.select %52, %158, %159 : vector<16x256xi1>, vector<16x256xf32>
      %162 = arith.select %47, %160, %161 : vector<16x256xi1>, vector<16x256xf32>
      %163 = arith.select %62, %158, %160 : vector<16x256xi1>, vector<16x256xf32>
      %164 = arith.select %57, %159, %163 : vector<16x256xi1>, vector<16x256xf32>
      %165 = arith.truncf %162 : vector<16x256xf32> to vector<16x256xbf16>
      %c0_98 = arith.constant 0 : index
      %c0_99 = arith.constant 0 : index
      %166 = vector.load %arg15[%c0_98, %c0_99] : memref<48x256xbf16, #tpu.memory_space<vmem>>, vector<16x256xbf16>
      tpu.vector_store %arg15[%c0_98, %c0_99], %165 {strides = array<i32>} : memref<48x256xbf16, #tpu.memory_space<vmem>>, vector<16x256xbf16>,
      %167 = arith.truncf %158 : vector<16x256xf32> to vector<16x256xbf16>
      %c16 = arith.constant 16 : index
      %c0_100 = arith.constant 0 : index
      %168 = vector.load %arg15[%c16, %c0_100] : memref<48x256xbf16, #tpu.memory_space<vmem>>, vector<16x256xbf16>
      tpu.vector_store %arg15[%c16, %c0_100], %167 {strides = array<i32>} : memref<48x256xbf16, #tpu.memory_space<vmem>>, vector<16x256xbf16>,
      %169 = arith.truncf %164 : vector<16x256xf32> to vector<16x256xbf16>
      %c32 = arith.constant 32 : index
      %c0_101 = arith.constant 0 : index
      %170 = vector.load %arg15[%c32, %c0_101] : memref<48x256xbf16, #tpu.memory_space<vmem>>, vector<16x256xbf16>
      tpu.vector_store %arg15[%c32, %c0_101], %169 {strides = array<i32>} : memref<48x256xbf16, #tpu.memory_space<vmem>>, vector<16x256xbf16>,
      %171 = arith.index_cast %arg16 : i32 to index
      %c0_102 = arith.constant 0 : index
      %c0_103 = arith.constant 0 : index
      %172 = vector.load %arg4[%171, %c0_102, %c0_103] : memref<8x16x48xbf16, #tpu.memory_space<vmem>>, vector<1x16x48xbf16>
      %173 = vector.shape_cast %172 : vector<1x16x48xbf16> to vector<16x48xbf16>
      %c0_104 = arith.constant 0 : index
      %c0_105 = arith.constant 0 : index
      %174 = vector.load %arg15[%c0_104, %c0_105] : memref<48x256xbf16, #tpu.memory_space<vmem>>, vector<48x256xbf16>
      %cst_106 = arith.constant dense<0.000000e+00> : vector<16x256xf32>
      %175 = tpu.matmul %173, %174, %cst_106 {dimension_numbers = #tpu.dot_dimension_numbers<[1], [0], [0], [1], [0, 0, 1, 1], [], []>} : vector<16x48xbf16>, vector<48x256xbf16>, vector<16x256xf32> -> vector<16x256xf32>
      %176 = arith.index_cast %arg16 : i32 to index
      %c0_107 = arith.constant 0 : index
      %c0_108 = arith.constant 0 : index
      %177 = vector.load %arg5[%176, %c0_107, %c0_108] : memref<8x16x1xf32, #tpu.memory_space<vmem>>, vector<1x16x1xf32>
      %178 = vector.shape_cast %177 : vector<1x16x1xf32> to vector<16x1xf32>
      %179 = vector.broadcast %178 : vector<16x1xf32> to vector<16x256xf32>
      %180 = arith.addf %175, %179 : vector<16x256xf32>
      %cst_109 = arith.constant 0.000000e+00 : f32
      %181 = vector.broadcast %cst_109 : f32 to vector<16x256xf32>
      %182 = arith.maximumf %180, %181 : vector<16x256xf32>
      %183 = arith.truncf %182 : vector<16x256xf32> to vector<16x256xbf16>
      %c1_i32_110 = arith.constant 1 : i32
      %184 = arith.subi %arg16, %c1_i32_110 : i32
      %185 = arith.index_cast %184 : i32 to index
      %c0_111 = arith.constant 0 : index
      %c0_112 = arith.constant 0 : index
      %186 = vector.load %arg14[%185, %c0_111, %c0_112] : memref<8x16x256xbf16, #tpu.memory_space<vmem>>, vector<1x16x256xbf16>
      %187 = vector.shape_cast %186 : vector<1x16x256xbf16> to vector<16x256xbf16>
      %188 = vector.shape_cast %183 : vector<16x256xbf16> to vector<1x16x256xbf16>
      tpu.vector_store %arg14[%185, %c0_111, %c0_112], %188 {strides = array<i32>} : memref<8x16x256xbf16, #tpu.memory_space<vmem>>, vector<1x16x256xbf16>,
      scf.yield %182 : vector<16x256xf32>
    }
    %c7_i32_26 = arith.constant 7 : i32
    %c0_27 = arith.constant 0 : index
    %c0_28 = arith.constant 0 : index
    %c0_29 = arith.constant 0 : index
    %66 = vector.load %arg14[%c0_27, %c0_28, %c0_29] : memref<8x16x256xbf16, #tpu.memory_space<vmem>>, vector<1x16x256xbf16>
    %67 = vector.shape_cast %66 : vector<1x16x256xbf16> to vector<16x256xbf16>
    %c1_30 = arith.constant 1 : index
    %c0_31 = arith.constant 0 : index
    %c0_32 = arith.constant 0 : index
    %68 = vector.load %arg14[%c1_30, %c0_31, %c0_32] : memref<8x16x256xbf16, #tpu.memory_space<vmem>>, vector<1x16x256xbf16>
    %69 = vector.shape_cast %68 : vector<1x16x256xbf16> to vector<16x256xbf16>
    %c2_33 = arith.constant 2 : index
    %c0_34 = arith.constant 0 : index
    %c0_35 = arith.constant 0 : index
    %70 = vector.load %arg14[%c2_33, %c0_34, %c0_35] : memref<8x16x256xbf16, #tpu.memory_space<vmem>>, vector<1x16x256xbf16>
    %71 = vector.shape_cast %70 : vector<1x16x256xbf16> to vector<16x256xbf16>
    %c3_36 = arith.constant 3 : index
    %c0_37 = arith.constant 0 : index
    %c0_38 = arith.constant 0 : index
    %72 = vector.load %arg14[%c3_36, %c0_37, %c0_38] : memref<8x16x256xbf16, #tpu.memory_space<vmem>>, vector<1x16x256xbf16>
    %73 = vector.shape_cast %72 : vector<1x16x256xbf16> to vector<16x256xbf16>
    %c4_39 = arith.constant 4 : index
    %c0_40 = arith.constant 0 : index
    %c0_41 = arith.constant 0 : index
    %74 = vector.load %arg14[%c4_39, %c0_40, %c0_41] : memref<8x16x256xbf16, #tpu.memory_space<vmem>>, vector<1x16x256xbf16>
    %75 = vector.shape_cast %74 : vector<1x16x256xbf16> to vector<16x256xbf16>
    %c5_42 = arith.constant 5 : index
    %c0_43 = arith.constant 0 : index
    %c0_44 = arith.constant 0 : index
    %76 = vector.load %arg14[%c5_42, %c0_43, %c0_44] : memref<8x16x256xbf16, #tpu.memory_space<vmem>>, vector<1x16x256xbf16>
    %77 = vector.shape_cast %76 : vector<1x16x256xbf16> to vector<16x256xbf16>
    %c6_45 = arith.constant 6 : index
    %c0_46 = arith.constant 0 : index
    %c0_47 = arith.constant 0 : index
    %78 = vector.load %arg14[%c6_45, %c0_46, %c0_47] : memref<8x16x256xbf16, #tpu.memory_space<vmem>>, vector<1x16x256xbf16>
    %79 = vector.shape_cast %78 : vector<1x16x256xbf16> to vector<16x256xbf16>
    %c7_48 = arith.constant 7 : index
    %c0_49 = arith.constant 0 : index
    %c0_50 = arith.constant 0 : index
    %80 = vector.load %arg14[%c7_48, %c0_49, %c0_50] : memref<8x16x256xbf16, #tpu.memory_space<vmem>>, vector<1x16x256xbf16>
    %81 = vector.shape_cast %80 : vector<1x16x256xbf16> to vector<16x256xbf16>
    %82 = tpu.concatenate %67, %69, %71, %73, %75, %77, %79, %81 in 0 : vector<16x256xbf16>, vector<16x256xbf16>, vector<16x256xbf16>, vector<16x256xbf16>, vector<16x256xbf16>, vector<16x256xbf16>, vector<16x256xbf16>, vector<16x256xbf16> -> vector<128x256xbf16>
    %c0_51 = arith.constant 0 : index
    %c0_52 = arith.constant 0 : index
    %83 = vector.load %arg6[%c0_51, %c0_52] : memref<128x128xbf16, #tpu.memory_space<vmem>>, vector<128x128xbf16>
    %cst_53 = arith.constant dense<0.000000e+00> : vector<128x256xf32>
    %84 = tpu.matmul %83, %82, %cst_53 {dimension_numbers = #tpu.dot_dimension_numbers<[1], [0], [0], [1], [0, 0, 1, 1], [], []>} : vector<128x128xbf16>, vector<128x256xbf16>, vector<128x256xf32> -> vector<128x256xf32>
    %c0_54 = arith.constant 0 : index
    %c0_55 = arith.constant 0 : index
    %85 = vector.load %arg7[%c0_54, %c0_55] : memref<128x1xf32, #tpu.memory_space<vmem>>, vector<128x1xf32>
    %86 = vector.broadcast %85 : vector<128x1xf32> to vector<128x256xf32>
    %87 = arith.addf %84, %86 : vector<128x256xf32>
    %cst_56 = arith.constant 0.000000e+00 : f32
    %88 = vector.broadcast %cst_56 : f32 to vector<128x256xf32>
    %89 = arith.maximumf %87, %88 : vector<128x256xf32>
    %90 = vector.extract_strided_slice %89 {offsets = [0, 0], sizes = [128, 128], strides = [1, 1]} : vector<128x256xf32> to vector<128x128xf32>
    %cst_57 = arith.constant dense<0.000000e+00> : vector<128xf32>
    %91 = vector.multi_reduction <add>, %90, %cst_57 [1] : vector<128x128xf32> to vector<128xf32>
    %92 = vector.shape_cast %91 : vector<128xf32> to vector<128x1xf32>
    %cst_58 = arith.constant 1.280000e+02 : f32
    %93 = vector.broadcast %cst_58 : f32 to vector<128x1xf32>
    %94 = arith.divf %92, %93 : vector<128x1xf32>
    %c0_59 = arith.constant 0 : index
    %c0_60 = arith.constant 0 : index
    %95 = vector.load %arg8[%c0_59, %c0_60] : memref<128x32xf32, #tpu.memory_space<vmem>>, vector<128x32xf32>
    %96 = vector.broadcast %94 : vector<128x1xf32> to vector<128x32xf32>
    %97 = arith.mulf %95, %96 : vector<128x32xf32>
    %cst_61 = arith.constant dense<0.000000e+00> : vector<32xf32>
    %98 = vector.multi_reduction <add>, %97, %cst_61 [0] : vector<128x32xf32> to vector<32xf32>
    %99 = vector.shape_cast %98 : vector<32xf32> to vector<1x32xf32>
    %c0_62 = arith.constant 0 : index
    %c0_63 = arith.constant 0 : index
    %100 = vector.load %arg9[%c0_62, %c0_63] : memref<1x32xf32, #tpu.memory_space<vmem>>, vector<1x32xf32>
    %101 = arith.addf %99, %100 : vector<1x32xf32>
    %cst_64 = arith.constant 0.000000e+00 : f32
    %102 = vector.broadcast %cst_64 : f32 to vector<1x32xf32>
    %103 = arith.maximumf %101, %102 : vector<1x32xf32>
    %c0_65 = arith.constant 0 : index
    %c0_66 = arith.constant 0 : index
    %104 = vector.load %arg10[%c0_65, %c0_66] : memref<128x32xf32, #tpu.memory_space<vmem>>, vector<128x32xf32>
    %105 = vector.broadcast %103 : vector<1x32xf32> to vector<128x32xf32>
    %106 = arith.mulf %104, %105 : vector<128x32xf32>
    %cst_67 = arith.constant dense<0.000000e+00> : vector<128xf32>
    %107 = vector.multi_reduction <add>, %106, %cst_67 [1] : vector<128x32xf32> to vector<128xf32>
    %108 = vector.shape_cast %107 : vector<128xf32> to vector<128x1xf32>
    %c0_68 = arith.constant 0 : index
    %c0_69 = arith.constant 0 : index
    %109 = vector.load %arg11[%c0_68, %c0_69] : memref<128x1xf32, #tpu.memory_space<vmem>>, vector<128x1xf32>
    %110 = arith.addf %108, %109 : vector<128x1xf32>
    %cst_70 = arith.constant 0.000000e+00 : f32
    %111 = vector.broadcast %cst_70 : f32 to vector<128x1xf32>
    %112 = arith.subf %111, %110 : vector<128x1xf32>
    %113 = math.exp %112 : vector<128x1xf32>
    %cst_71 = arith.constant 1.000000e+00 : f32
    %114 = vector.broadcast %cst_71 : f32 to vector<128x1xf32>
    %115 = arith.addf %114, %113 : vector<128x1xf32>
    %116 = tpu.reciprocal %115 {approx = true} : vector<128x1xf32> -> vector<128x1xf32>
    %117 = vector.broadcast %116 : vector<128x1xf32> to vector<128x128xf32>
    %118 = arith.mulf %90, %117 : vector<128x128xf32>
    %c0_72 = arith.constant 0 : index
    %c0_73 = arith.constant 0 : index
    %119 = vector.load %arg1[%c0_72, %c0_73] : memref<128x256xf32, #tpu.memory_space<vmem>>, vector<128x128xf32>
    %120 = arith.addf %118, %119 : vector<128x128xf32>
    %c0_74 = arith.constant 0 : index
    %c0_75 = arith.constant 0 : index
    %121 = vector.load %arg12[%c0_74, %c0_75] : memref<128x256xf32, #tpu.memory_space<vmem>>, vector<128x128xf32>
    tpu.vector_store %arg12[%c0_74, %c0_75], %120 {strides = array<i32>} : memref<128x256xf32, #tpu.memory_space<vmem>>, vector<128x128xf32>,
    %122 = vector.extract_strided_slice %89 {offsets = [0, 128], sizes = [128, 128], strides = [1, 1]} : vector<128x256xf32> to vector<128x128xf32>
    %cst_76 = arith.constant dense<0.000000e+00> : vector<128xf32>
    %123 = vector.multi_reduction <add>, %122, %cst_76 [1] : vector<128x128xf32> to vector<128xf32>
    %124 = vector.shape_cast %123 : vector<128xf32> to vector<128x1xf32>
    %cst_77 = arith.constant 1.280000e+02 : f32
    %125 = vector.broadcast %cst_77 : f32 to vector<128x1xf32>
    %126 = arith.divf %124, %125 : vector<128x1xf32>
    %c0_78 = arith.constant 0 : index
    %c0_79 = arith.constant 0 : index
    %127 = vector.load %arg8[%c0_78, %c0_79] : memref<128x32xf32, #tpu.memory_space<vmem>>, vector<128x32xf32>
    %128 = vector.broadcast %126 : vector<128x1xf32> to vector<128x32xf32>
    %129 = arith.mulf %127, %128 : vector<128x32xf32>
    %cst_80 = arith.constant dense<0.000000e+00> : vector<32xf32>
    %130 = vector.multi_reduction <add>, %129, %cst_80 [0] : vector<128x32xf32> to vector<32xf32>
    %131 = vector.shape_cast %130 : vector<32xf32> to vector<1x32xf32>
    %c0_81 = arith.constant 0 : index
    %c0_82 = arith.constant 0 : index
    %132 = vector.load %arg9[%c0_81, %c0_82] : memref<1x32xf32, #tpu.memory_space<vmem>>, vector<1x32xf32>
    %133 = arith.addf %131, %132 : vector<1x32xf32>
    %cst_83 = arith.constant 0.000000e+00 : f32
    %134 = vector.broadcast %cst_83 : f32 to vector<1x32xf32>
    %135 = arith.maximumf %133, %134 : vector<1x32xf32>
    %c0_84 = arith.constant 0 : index
    %c0_85 = arith.constant 0 : index
    %136 = vector.load %arg10[%c0_84, %c0_85] : memref<128x32xf32, #tpu.memory_space<vmem>>, vector<128x32xf32>
    %137 = vector.broadcast %135 : vector<1x32xf32> to vector<128x32xf32>
    %138 = arith.mulf %136, %137 : vector<128x32xf32>
    %cst_86 = arith.constant dense<0.000000e+00> : vector<128xf32>
    %139 = vector.multi_reduction <add>, %138, %cst_86 [1] : vector<128x32xf32> to vector<128xf32>
    %140 = vector.shape_cast %139 : vector<128xf32> to vector<128x1xf32>
    %c0_87 = arith.constant 0 : index
    %c0_88 = arith.constant 0 : index
    %141 = vector.load %arg11[%c0_87, %c0_88] : memref<128x1xf32, #tpu.memory_space<vmem>>, vector<128x1xf32>
    %142 = arith.addf %140, %141 : vector<128x1xf32>
    %cst_89 = arith.constant 0.000000e+00 : f32
    %143 = vector.broadcast %cst_89 : f32 to vector<128x1xf32>
    %144 = arith.subf %143, %142 : vector<128x1xf32>
    %145 = math.exp %144 : vector<128x1xf32>
    %cst_90 = arith.constant 1.000000e+00 : f32
    %146 = vector.broadcast %cst_90 : f32 to vector<128x1xf32>
    %147 = arith.addf %146, %145 : vector<128x1xf32>
    %148 = tpu.reciprocal %147 {approx = true} : vector<128x1xf32> -> vector<128x1xf32>
    %149 = vector.broadcast %148 : vector<128x1xf32> to vector<128x128xf32>
    %150 = arith.mulf %122, %149 : vector<128x128xf32>
    %c0_91 = arith.constant 0 : index
    %c128 = arith.constant 128 : index
    %151 = vector.load %arg1[%c0_91, %c128] : memref<128x256xf32, #tpu.memory_space<vmem>>, vector<128x128xf32>
    %152 = arith.addf %150, %151 : vector<128x128xf32>
    %c0_92 = arith.constant 0 : index
    %c128_93 = arith.constant 128 : index
    %153 = vector.load %arg12[%c0_92, %c128_93] : memref<128x256xf32, #tpu.memory_space<vmem>>, vector<128x128xf32>
    tpu.vector_store %arg12[%c0_92, %c128_93], %152 {strides = array<i32>} : memref<128x256xf32, #tpu.memory_space<vmem>>, vector<128x128xf32>,
    return
  }
  func.func @transform_0(%arg0: i32) -> (i32, i32) {
    %c0_i32 = arith.constant 0 : i32
    %c0_i32_0 = arith.constant 0 : i32
    return %c0_i32, %arg0 : i32, i32
  }
  func.func @transform_1(%arg0: i32) -> (i32, i32) {
    %c0_i32 = arith.constant 0 : i32
    %c0_i32_0 = arith.constant 0 : i32
    %c0_i32_1 = arith.constant 0 : i32
    return %c0_i32, %c0_i32_0 : i32, i32
  }
  func.func @transform_2(%arg0: i32) -> (i32, i32) {
    %c0_i32 = arith.constant 0 : i32
    %c0_i32_0 = arith.constant 0 : i32
    %c0_i32_1 = arith.constant 0 : i32
    return %c0_i32, %c0_i32_0 : i32, i32
  }
  func.func @transform_3(%arg0: i32) -> (i32, i32, i32) {
    %c0_i32 = arith.constant 0 : i32
    %c0_i32_0 = arith.constant 0 : i32
    %c0_i32_1 = arith.constant 0 : i32
    %c0_i32_2 = arith.constant 0 : i32
    return %c0_i32, %c0_i32_0, %c0_i32_1 : i32, i32, i32
  }
  func.func @transform_4(%arg0: i32) -> (i32, i32, i32) {
    %c0_i32 = arith.constant 0 : i32
    %c0_i32_0 = arith.constant 0 : i32
    %c0_i32_1 = arith.constant 0 : i32
    %c0_i32_2 = arith.constant 0 : i32
    return %c0_i32, %c0_i32_0, %c0_i32_1 : i32, i32, i32
  }
  func.func @transform_5(%arg0: i32) -> (i32, i32) {
    %c0_i32 = arith.constant 0 : i32
    %c0_i32_0 = arith.constant 0 : i32
    %c0_i32_1 = arith.constant 0 : i32
    return %c0_i32, %c0_i32_0 : i32, i32
  }
  func.func @transform_6(%arg0: i32) -> (i32, i32) {
    %c0_i32 = arith.constant 0 : i32
    %c0_i32_0 = arith.constant 0 : i32
    %c0_i32_1 = arith.constant 0 : i32
    return %c0_i32, %c0_i32_0 : i32, i32
  }
  func.func @transform_7(%arg0: i32) -> (i32, i32) {
    %c0_i32 = arith.constant 0 : i32
    %c0_i32_0 = arith.constant 0 : i32
    %c0_i32_1 = arith.constant 0 : i32
    return %c0_i32, %c0_i32_0 : i32, i32
  }
  func.func @transform_8(%arg0: i32) -> (i32, i32) {
    %c0_i32 = arith.constant 0 : i32
    %c0_i32_0 = arith.constant 0 : i32
    %c0_i32_1 = arith.constant 0 : i32
    return %c0_i32, %c0_i32_0 : i32, i32
  }
  func.func @transform_9(%arg0: i32) -> (i32, i32) {
    %c0_i32 = arith.constant 0 : i32
    %c0_i32_0 = arith.constant 0 : i32
    %c0_i32_1 = arith.constant 0 : i32
    return %c0_i32, %c0_i32_0 : i32, i32
  }
  func.func @transform_10(%arg0: i32) -> (i32, i32) {
    %c0_i32 = arith.constant 0 : i32
    %c0_i32_0 = arith.constant 0 : i32
    %c0_i32_1 = arith.constant 0 : i32
    return %c0_i32, %c0_i32_0 : i32, i32
  }
  func.func @transform_11(%arg0: i32) -> (i32, i32) {
    %c0_i32 = arith.constant 0 : i32
    %c0_i32_0 = arith.constant 0 : i32
    return %c0_i32, %arg0 : i32, i32
  }
}

</mosaic_0001>

<bundles_post_ra>
// kernel: tpu_custom_call.1
= control target key start
LH: loop header
LB: loop body
LE: loop exit
PB: predicated region body
PF: predicated region fallthrough
CT: control target
= control target key end

     0   :  { %s4120_s0 = inlined_call_operand.vmem [shape: f32[128,512], index: 0, kind: input, shape index: {}]   ;;  %s4121_s1 = inlined_call_operand.vmem [shape: bf16[128,128], index: 1, kind: input, shape index: {}]   ;;  %s4122_s2 = inlined_call_operand.vmem [shape: f32[128,1], index: 2, kind: input, shape index: {}]   ;;  %s4123_s3 = inlined_call_operand.vmem [shape: bf16[8,16,48], index: 3, kind: input, shape index: {}]   ;;  %s4124_s4 = inlined_call_operand.vmem [shape: f32[8,16,1], index: 4, kind: input, shape index: {}]   ;;  %s4125_s5 = inlined_call_operand.vmem [shape: bf16[128,128], index: 5, kind: input, shape index: {}]   ;;  %s4126_s6 = inlined_call_operand.vmem [shape: f32[128,1], index: 6, kind: input, shape index: {}]   ;;  %s4127_s7 = inlined_call_operand.vmem [shape: f32[128,32], index: 7, kind: input, shape index: {}]   ;;  %s4128_s8 = inlined_call_operand.vmem [shape: f32[1,32], index: 8, kind: input, shape index: {}]   ;;  %s4129_s9 = inlined_call_operand.vmem [shape: f32[128,32], index: 9, kind: input, shape index: {}]   ;;  %s4130_s10 = inlined_call_operand.vmem [shape: f32[128,1], index: 10, kind: input, shape index: {}]   ;;  %s4131_s11 = inlined_call_operand.hbm [shape: f32[128,512], index: 11, kind: output, shape index: {}]  }
   0x1   :  { %4175 = sst [smem:[#allocation16_spill]] %s4120_s0 }
   0x2   :  { %4176 = sst [smem:[#allocation17_spill]] %s4121_s1 }
   0x3   :  { %16 = vsyncpa [#allocation7], 0 }
   0x4   :  { %18 = vsyncpa [#allocation7 + $0x1], 0  ;;  %s2915_s17 = smov 0   ;;  %s2917_s18 = smov 0  }
   0x5   :  { %s2919_s19 = smov 0   ;;  %s2921_s20 = smov 0  }
   0x6 LB: > { %s4133_s21 = sadd.s32 4294967295, %s2825_s20   ;;  %s2409_s22 = sadd.s32 4294967294, %s2825_s20   ;;  %s2825_s20 = sphi %s2921_s20, %s4234_s20   ;;  %s2821_s19 = sphi %s2919_s19, %s4233_s19   ;;  %s2817_s18 = sphi %s2917_s18, %s4232_s18   ;;  %s2813_s17 = sphi %s2915_s17, %s4231_s17  }
   0x7   : > { %s2938_s23 = sadd.s32 1, %s2825_s20   ;;  %s31_s24 = sadd.s32 1, %s2821_s19 }
   0x8   : > { %s28_s25 = ssub.s32 %s2825_s20, %s2938_s23  ;;  %p38_p0 = scmp.ne.s32.totalorder %s2821_s19, %s2817_s18 }
   0x9   : > { %p29_p1 = scmp.eq.s32.totalorder %s28_s25, 0  ;;  %p39_p2 = scmp.eq.s32.totalorder %s2825_s20, 0 }
   0xa   : > { %p278_p3 = scmp.eq.s32.totalorder %s4133_s21, 1  ;;  %p283_p4 = scmp.ne.s32.totalorder %s2817_s18, %s2813_s17 }
   0xb   : > { %s2951_s26 = scalar_select %p29_p1, %s2821_s19, %s31_s24  }
   0xc   : > { %p40_p5 = por %p39_p2, %p38_p0  ;;  %p2953_p6 = por %p278_p3, %p38_p0 }
   0xd   : > { %p284_p7 = scmp.eq.s32.totalorder %s2409_s22, 1  ;;  %p2411_p9 = scmp.ge.s32.totalorder %s2825_s20, 2 }
   0xf   : > { %p2957_p8 = por %p284_p7, %p283_p4  ;;  %330 = sbr.rel (%p2411_p9) target bundleno = 48 (0x30), region = 56 }
  0x16   : > { %333 = sbr.rel (!%p40_p5) target bundleno = 48 (0x30), region = 60  ;;  %s335_s29 = sand.u32 (%p40_p5), 1, %s2821_s19  }
  0x17   : > { %s2449_s30 = sshll.u32 (%p40_p5), %s2825_s20, 4  ;;  %s2412_s12 = sshll.u32 (%p40_p5), %s335_s29, 8 }
  0x18   : > { %s4179_s0 = sld [smem:[#allocation16_spill]] (%p40_p5)  ;;  %s2974_s16 = scalar_lea.vmem (%p40_p5), [#allocation5], %s2412_s12 }
  0x1e   : > { %s2969_s15 = scalar_lea.vmem %s4179_s0, %s2449_s30 }
  0x1f   : > { %v353_v0 = vld [vmem:[%s2969_s15] sm:$0xff]  ;;  %v355_v1 = vld [vmem:[%s2969_s15 + $0x8] sm:$0xff] }
  0x20   : > { %v357_v2 = vld [vmem:[%s2969_s15 + $0x20] sm:$0xff]  ;;  %354 = vst [vmem:[%s2974_s16] sm:$0xff] %v353_v0  ;;  %356 = vst [vmem:[%s2974_s16 + $0x8] sm:$0xff] %v355_v1  ;;  %v359_v3 = vld [vmem:[%s2969_s15 + $0x28] sm:$0xff] }
  0x21   : > { %358 = vst [vmem:[%s2974_s16 + $0x10] sm:$0xff] %v357_v2  ;;  %v361_v4 = vld [vmem:[%s2969_s15 + $0x40] sm:$0xff]  ;;  %v363_v5 = vld [vmem:[%s2969_s15 + $0x48] sm:$0xff]  ;;  %360 = vst [vmem:[%s2974_s16 + $0x18] sm:$0xff] %v359_v3 }
  0x22   : > { %362 = vst [vmem:[%s2974_s16 + $0x20] sm:$0xff] %v361_v4  ;;  %364 = vst [vmem:[%s2974_s16 + $0x28] sm:$0xff] %v363_v5  ;;  %v365_v6 = vld [vmem:[%s2969_s15 + $0x60] sm:$0xff]  ;;  %v367_v7 = vld [vmem:[%s2969_s15 + $0x68] sm:$0xff] }
  0x23   : > { %v369_v8 = vld [vmem:[%s2969_s15 + $0x80] sm:$0xff]  ;;  %366 = vst [vmem:[%s2974_s16 + $0x30] sm:$0xff] %v365_v6  ;;  %368 = vst [vmem:[%s2974_s16 + $0x38] sm:$0xff] %v367_v7  ;;  %v371_v9 = vld [vmem:[%s2969_s15 + $0x88] sm:$0xff] }
  0x24   : > { %370 = vst [vmem:[%s2974_s16 + $0x40] sm:$0xff] %v369_v8  ;;  %v373_v10 = vld [vmem:[%s2969_s15 + $0xa0] sm:$0xff]  ;;  %v375_v11 = vld [vmem:[%s2969_s15 + $0xa8] sm:$0xff]  ;;  %372 = vst [vmem:[%s2974_s16 + $0x48] sm:$0xff] %v371_v9 }
  0x25   : > { %374 = vst [vmem:[%s2974_s16 + $0x50] sm:$0xff] %v373_v10  ;;  %376 = vst [vmem:[%s2974_s16 + $0x58] sm:$0xff] %v375_v11  ;;  %v377_v12 = vld [vmem:[%s2969_s15 + $0xc0] sm:$0xff]  ;;  %v379_v13 = vld [vmem:[%s2969_s15 + $0xc8] sm:$0xff] }
  0x26   : > { %v381_v14 = vld [vmem:[%s2969_s15 + $0xe0] sm:$0xff]  ;;  %378 = vst [vmem:[%s2974_s16 + $0x60] sm:$0xff] %v377_v12  ;;  %380 = vst [vmem:[%s2974_s16 + $0x68] sm:$0xff] %v379_v13  ;;  %v383_v15 = vld [vmem:[%s2969_s15 + $0xe8] sm:$0xff] }
  0x27   : > { %382 = vst [vmem:[%s2974_s16 + $0x70] sm:$0xff] %v381_v14  ;;  %v385_v16 = vld [vmem:[%s2969_s15 + $0x100] sm:$0xff]  ;;  %v387_v17 = vld [vmem:[%s2969_s15 + $0x108] sm:$0xff]  ;;  %384 = vst [vmem:[%s2974_s16 + $0x78] sm:$0xff] %v383_v15 }
  0x28   : > { %386 = vst [vmem:[%s2974_s16 + $0x80] sm:$0xff] %v385_v16  ;;  %388 = vst [vmem:[%s2974_s16 + $0x88] sm:$0xff] %v387_v17  ;;  %v389_v18 = vld [vmem:[%s2969_s15 + $0x120] sm:$0xff]  ;;  %v391_v19 = vld [vmem:[%s2969_s15 + $0x128] sm:$0xff] }
  0x29   : > { %v393_v20 = vld [vmem:[%s2969_s15 + $0x140] sm:$0xff]  ;;  %390 = vst [vmem:[%s2974_s16 + $0x90] sm:$0xff] %v389_v18  ;;  %392 = vst [vmem:[%s2974_s16 + $0x98] sm:$0xff] %v391_v19  ;;  %v395_v21 = vld [vmem:[%s2969_s15 + $0x148] sm:$0xff] }
  0x2a   : > { %394 = vst [vmem:[%s2974_s16 + $0xa0] sm:$0xff] %v393_v20  ;;  %v397_v22 = vld [vmem:[%s2969_s15 + $0x160] sm:$0xff]  ;;  %v399_v23 = vld [vmem:[%s2969_s15 + $0x168] sm:$0xff]  ;;  %396 = vst [vmem:[%s2974_s16 + $0xa8] sm:$0xff] %v395_v21 }
  0x2b   : > { %398 = vst [vmem:[%s2974_s16 + $0xb0] sm:$0xff] %v397_v22  ;;  %400 = vst [vmem:[%s2974_s16 + $0xb8] sm:$0xff] %v399_v23  ;;  %v401_v24 = vld [vmem:[%s2969_s15 + $0x180] sm:$0xff]  ;;  %v403_v25 = vld [vmem:[%s2969_s15 + $0x188] sm:$0xff] }
  0x2c   : > { %v405_v26 = vld [vmem:[%s2969_s15 + $0x1a0] sm:$0xff]  ;;  %402 = vst [vmem:[%s2974_s16 + $0xc0] sm:$0xff] %v401_v24  ;;  %404 = vst [vmem:[%s2974_s16 + $0xc8] sm:$0xff] %v403_v25  ;;  %v407_v27 = vld [vmem:[%s2969_s15 + $0x1a8] sm:$0xff] }
  0x2d   : > { %406 = vst [vmem:[%s2974_s16 + $0xd0] sm:$0xff] %v405_v26  ;;  %v409_v28 = vld [vmem:[%s2969_s15 + $0x1c0] sm:$0xff]  ;;  %v411_v29 = vld [vmem:[%s2969_s15 + $0x1c8] sm:$0xff]  ;;  %408 = vst [vmem:[%s2974_s16 + $0xd8] sm:$0xff] %v407_v27 }
  0x2e   : > { %410 = vst [vmem:[%s2974_s16 + $0xe0] sm:$0xff] %v409_v28  ;;  %412 = vst [vmem:[%s2974_s16 + $0xe8] sm:$0xff] %v411_v29  ;;  %v413_v30 = vld [vmem:[%s2969_s15 + $0x1e0] sm:$0xff]  ;;  %v415_v31 = vld [vmem:[%s2969_s15 + $0x1e8] sm:$0xff] }
  0x2f   : > { %414 = vst [vmem:[%s2974_s16 + $0xf0] sm:$0xff] %v413_v30  ;;  %416 = vst [vmem:[%s2974_s16 + $0xf8] sm:$0xff] %v415_v31 }
  0x30 PF: > { %p2415_p10 = scmp.ge.s32.totalorder %s2825_s20, 1  ;;  %p421_p11 = scmp.lt.s32.totalorder %s2825_s20, 3 }
  0x32   : > { %p422_p12 = pnand %p2415_p10, %p421_p11 }
  0x34   : > { %425 = sbr.rel (%p422_p12) target bundleno = 1578 (0x62a), region = 83 }
  0x3b   : > { %s4132_s22 = sand.u32 1, %s2817_s18   ;;  %v2847_v32 = vmov 0   ;;  %v536_v1 = vld [vmem:[%s4122_s2 + $0x10] sm:$0xff]  ;;  %v534_v2 = vld [vmem:[%s4122_s2] sm:$0xff]  ;;  %v537_v8 = vld [vmem:[%s4122_s2 + $0x18] sm:$0xff]  ;;  %s4180_s1 = sld [smem:[#allocation17_spill]] }
  0x3c   : > { %s3042_s24 = sshll.u32 %s4132_s22, 8  ;;  %710 = vmatprep.mubr.bf16.mxu0 %v2847_v32  ;;  %750 = vmatprep.mubr.bf16.mxu1 %v2847_v32  ;;  %v535_v9 = vld [vmem:[%s4122_s2 + $0x8] sm:$0xff]  ;;  %v538_v17 = vld [vmem:[%s4122_s2 + $0x20] sm:$0xff]  ;;  %v541_v22 = vld [vmem:[%s4122_s2 + $0x38] sm:$0xff]  ;;  %s3202_s16 = smov 1  }
  0x3d   : > { %2573 = vset.pattern.permute.xlu1 %v2847_v32  ;;  %2572 = vset.pattern.permute.xlu0 %v2847_v32  ;;  %s3049_s25 = scalar_lea.vmem [#allocation5], %s3042_s24  ;;  %v539_v16 = vld [vmem:[%s4122_s2 + $0x28] sm:$0xff]  ;;  %v540_v23 = vld [vmem:[%s4122_s2 + $0x30] sm:$0xff]  ;;  %v542_v28 = vld [vmem:[%s4122_s2 + $0x40] sm:$0xff]  ;;  %s3192_s15 = scalar_lea.vmem [#allocation6], %s3042_s24 }
  0x3e   : > { %v471_v33 = vld [vmem:[%s3049_s25 + $0x8] sm:$0xff]  ;;  %v473_v34 = vld [vmem:[%s3049_s25 + $0x18] sm:$0xff]  ;;  %v470_v35 = vld [vmem:[%s3049_s25] sm:$0xff]  ;;  %562 = vperm.xlu1 %2573, %v536_v1   ;;  %552 = vperm.xlu0 %2572, %v534_v2  }
  0x3f   : > { %v503_v36 = vpack.c.bf16 %v473_v34, %v471_v33  ;;  %v472_v37 = vld [vmem:[%s3049_s25 + $0x10] sm:$0xff]  ;;  %v475_v38 = vld [vmem:[%s3049_s25 + $0x28] sm:$0xff]  ;;  %v477_v39 = vld [vmem:[%s3049_s25 + $0x38] sm:$0xff] }
  0x40   : > { %v502_v40 = vpack.c.bf16 %v472_v37, %v470_v35  ;;  %v505_v41 = vpack.c.bf16 %v477_v39, %v475_v38  ;;  %v474_v42 = vld [vmem:[%s3049_s25 + $0x20] sm:$0xff]  ;;  %v476_v43 = vld [vmem:[%s3049_s25 + $0x30] sm:$0xff]  ;;  %v479_v44 = vld [vmem:[%s3049_s25 + $0x48] sm:$0xff] }
  0x41   : > { %678 = vmatprep.subr.bf16.mxu0 %v503_v36  ;;  %2454 = vmatprep.subr.bf16.mxu1 %v503_v36  ;;  %v481_v45 = vld [vmem:[%s3049_s25 + $0x58] sm:$0xff]  ;;  %v504_v46 = vpack.c.bf16 %v476_v43, %v474_v42  ;;  %v478_v48 = vld [vmem:[%s3049_s25 + $0x40] sm:$0xff]  ;;  %v480_v49 = vld [vmem:[%s3049_s25 + $0x50] sm:$0xff]  ;;  %v4167_v42 = vlaneseq }
  0x42   : > { %679 = vmatpush1.bf16.msra.mxu0 %v502_v40  ;;  %2462 = vmatpush1.bf16.msra.mxu1 %v502_v40  ;;  %v507_v47 = vpack.c.bf16 %v481_v45, %v479_v44  ;;  %v483_v50 = vld [vmem:[%s3049_s25 + $0x68] sm:$0xff]  ;;  %v485_v51 = vld [vmem:[%s3049_s25 + $0x78] sm:$0xff]  ;;  %v506_v52 = vpack.c.bf16 %v480_v49, %v478_v48  ;;  %v482_v54 = vld [vmem:[%s3049_s25 + $0x60] sm:$0xff] }
  0x43   : > { %680 = vmatprep.subr.bf16.mxu0 %v505_v41  ;;  %2455 = vmatprep.subr.bf16.mxu1 %v505_v41  ;;  %v509_v53 = vpack.c.bf16 %v485_v51, %v483_v50  ;;  %v484_v55 = vld [vmem:[%s3049_s25 + $0x70] sm:$0xff]  ;;  %v487_v56 = vld [vmem:[%s3049_s25 + $0x88] sm:$0xff]  ;;  %v489_v57 = vld [vmem:[%s3049_s25 + $0x98] sm:$0xff]  ;;  %v3162_v43 = vand.u32 127, %v4167_v42 }
  0x44   : > { %v486_v58 = vld [vmem:[%s3049_s25 + $0x80] sm:$0xff]  ;;  %v508_v59 = vpack.c.bf16 %v484_v55, %v482_v54  ;;  %v488_v60 = vld [vmem:[%s3049_s25 + $0x90] sm:$0xff]  ;;  %v511_v61 = vpack.c.bf16 %v489_v57, %v487_v56  ;;  %v491_v62 = vld [vmem:[%s3049_s25 + $0xa8] sm:$0xff]  ;;  %567 = vperm.xlu1 %2573, %v537_v8   ;;  %557 = vperm.xlu0 %2572, %v535_v9  }
  0x45   : > { %v493_v63 = vld [vmem:[%s3049_s25 + $0xb8] sm:$0xff]  ;;  %v510_v0 = vpack.c.bf16 %v488_v60, %v486_v58  ;;  %v490_v4 = vld [vmem:[%s3049_s25 + $0xa0] sm:$0xff]  ;;  %v492_v5 = vld [vmem:[%s3049_s25 + $0xb0] sm:$0xff]  ;;  %v3165_v44 = vadd.s32 128, %v3162_v43  ;;  %vm865_vm0 = vcmp.eq.s32.totalorder %v3162_v43, 0  ;;  %vm871_vm2 = vcmp.eq.s32.totalorder %v3162_v43, 1 }
  0x46   : > { %681 = vmatpush1.bf16.msra.mxu0 %v504_v46  ;;  %2463 = vmatpush1.bf16.msra.mxu1 %v504_v46  ;;  %v513_v3 = vpack.c.bf16 %v493_v63, %v491_v62  ;;  %v495_v6 = vld [vmem:[%s3049_s25 + $0xc8] sm:$0xff]  ;;  %v497_v7 = vld [vmem:[%s3049_s25 + $0xd8] sm:$0xff]  ;;  %v512_v10 = vpack.c.bf16 %v492_v5, %v490_v4  ;;  %v494_v12 = vld [vmem:[%s3049_s25 + $0xc0] sm:$0xff]  ;;  %vm877_vm4 = vcmp.eq.s32.totalorder %v3162_v43, 127  ;;  %vm883_vm6 = vcmp.eq.s32.totalorder %v3162_v43, 126 }
  0x47   : > { %682 = vmatprep.subr.bf16.mxu0 %v507_v47  ;;  %2456 = vmatprep.subr.bf16.mxu1 %v507_v47  ;;  %v515_v11 = vpack.c.bf16 %v497_v7, %v495_v6  ;;  %v496_v13 = vld [vmem:[%s3049_s25 + $0xd0] sm:$0xff]  ;;  %v499_v14 = vld [vmem:[%s3049_s25 + $0xe8] sm:$0xff]  ;;  %v501_v15 = vld [vmem:[%s3049_s25 + $0xf8] sm:$0xff]  ;;  %vm868_vm1 = vcmp.eq.s32.totalorder %v3165_v44, 128  ;;  %vm874_vm3 = vcmp.eq.s32.totalorder %v3165_v44, 129  ;;  %vm880_vm5 = vcmp.eq.s32.totalorder %v3165_v44, 255 }
  0x48   : > { %v514_v18 = vpack.c.bf16 %v496_v13, %v494_v12  ;;  %v517_v19 = vpack.c.bf16 %v501_v15, %v499_v14  ;;  %v498_v20 = vld [vmem:[%s3049_s25 + $0xe0] sm:$0xff]  ;;  %v500_v21 = vld [vmem:[%s3049_s25 + $0xf0] sm:$0xff]  ;;  %577 = vperm.xlu1 %2573, %v539_v16   ;;  %572 = vperm.xlu0 %2572, %v538_v17   ;;  %v543_v27 = vld [vmem:[%s4122_s2 + $0x48] sm:$0xff]  ;;  %vm886_vm7 = vcmp.eq.s32.totalorder %v3165_v44, 254 }
  0x49   : > { %v516_v24 = vpack.c.bf16 %v500_v21, %v498_v20  ;;  %v2574_v25 = vld [vmem:[%s4180_s1] sm:$0xff]   ;;  %v545_v29 = vld [vmem:[%s4122_s2 + $0x58] sm:$0xff]  ;;  %v544_v30 = vld [vmem:[%s4122_s2 + $0x50] sm:$0xff] }
  0x4a   : > { %683 = vmatpush1.bf16.msra.mxu0 %v506_v52  ;;  %2464 = vmatpush1.bf16.msra.mxu1 %v506_v52  ;;  %v2575_v26 = vld [vmem:[%s4180_s1 + $0x20] sm:$0xff]   ;;  %v2576_v31 = vld [vmem:[%s4180_s1 + $0x8] sm:$0xff]   ;;  %v549_v36 = vld [vmem:[%s4122_s2 + $0x78] sm:$0xff] }
  0x4b   : > { %684 = vmatprep.subr.bf16.mxu0 %v509_v53  ;;  %2457 = vmatprep.subr.bf16.mxu1 %v509_v53  ;;  %v2577_v33 = vld [vmem:[%s4180_s1 + $0x28] sm:$0xff]   ;;  %v546_v35 = vld [vmem:[%s4122_s2 + $0x60] sm:$0xff]  ;;  %v548_v37 = vld [vmem:[%s4122_s2 + $0x70] sm:$0xff] }
  0x4c   : > { %587 = vperm.xlu1 %2573, %v541_v22   ;;  %582 = vperm.xlu0 %2572, %v540_v23   ;;  %v547_v34 = vld [vmem:[%s4122_s2 + $0x68] sm:$0xff]  ;;  %v2578_v38 = vld [vmem:[%s4180_s1 + $0x10] sm:$0xff]   ;;  %v2580_v40 = vld [vmem:[%s4180_s1 + $0x18] sm:$0xff]  }
  0x4d   : > { %v2579_v39 = vld [vmem:[%s4180_s1 + $0x30] sm:$0xff]   ;;  %v2581_v41 = vld [vmem:[%s4180_s1 + $0x38] sm:$0xff]  }
  0x4e   : > { %685 = vmatpush1.bf16.msra.mxu0 %v508_v59  ;;  %2465 = vmatpush1.bf16.msra.mxu1 %v508_v59 }
  0x4f   : > { %686 = vmatprep.subr.bf16.mxu0 %v511_v61  ;;  %2458 = vmatprep.subr.bf16.mxu1 %v511_v61 }
  0x50   : > { %597 = vperm.xlu1 %2573, %v543_v27   ;;  %592 = vperm.xlu0 %2572, %v542_v28  }
  0x52   : > { %687 = vmatpush1.bf16.msra.mxu0 %v510_v0  ;;  %2466 = vmatpush1.bf16.msra.mxu1 %v510_v0 }
  0x53   : > { %688 = vmatprep.subr.bf16.mxu0 %v513_v3  ;;  %2459 = vmatprep.subr.bf16.mxu1 %v513_v3 }
  0x54   : > { %607 = vperm.xlu1 %2573, %v545_v29   ;;  %602 = vperm.xlu0 %2572, %v544_v30  }
  0x56   : > { %689 = vmatpush1.bf16.msra.mxu0 %v512_v10  ;;  %2467 = vmatpush1.bf16.msra.mxu1 %v512_v10 }
  0x57   : > { %690 = vmatprep.subr.bf16.mxu0 %v515_v11  ;;  %2460 = vmatprep.subr.bf16.mxu1 %v515_v11 }
  0x58   : > { %617 = vperm.xlu1 %2573, %v547_v34   ;;  %612 = vperm.xlu0 %2572, %v546_v35  }
  0x5a   : > { %691 = vmatpush1.bf16.msra.mxu0 %v514_v18  ;;  %2468 = vmatpush1.bf16.msra.mxu1 %v514_v18 }
  0x5b   : > { %692 = vmatprep.subr.bf16.mxu0 %v517_v19  ;;  %2461 = vmatprep.subr.bf16.mxu1 %v517_v19 }
  0x5c   : > { %627 = vperm.xlu1 %2573, %v549_v36   ;;  %622 = vperm.xlu0 %2572, %v548_v37  }
  0x5e   : > { %693 = vmatpush1.bf16.msra.mxu0 %v516_v24  ;;  %2469 = vmatpush1.bf16.msra.mxu1 %v516_v24 }
  0x61   : > { %711 = vmatmul.mubr.bf16.vlgmr.msra.gmra.mrb[0].mxu0 %v2574_v25  ;;  %751 = vmatmul.mubr.bf16.vlgmr.msra.gmra.mrb[0].mxu1 %v2575_v26 }
  0x62   : > { %720 = vmatprep.mubr.bf16.mxu0 %v2847_v32  ;;  %760 = vmatprep.mubr.bf16.mxu1 %v2847_v32 }
  0x69   : > { %721 = vmatmul.mubr.bf16.gmra.mrb[4].mxu0 %v2576_v31  ;;  %761 = vmatmul.mubr.bf16.gmra.mrb[4].mxu1 %v2577_v33 }
  0x6a   : > { %730 = vmatprep.mubr.bf16.mxu0 %v2847_v32  ;;  %770 = vmatprep.mubr.bf16.mxu1 %v2847_v32 }
  0x71   : > { %731 = vmatmul.mubr.bf16.gmra.mrb[8].mxu0 %v2578_v38  ;;  %771 = vmatmul.mubr.bf16.gmra.mrb[8].mxu1 %v2579_v39 }
  0x72   : > { %740 = vmatprep.mubr.bf16.mxu0 %v2847_v32  ;;  %780 = vmatprep.mubr.bf16.mxu1 %v2847_v32 }
  0x79   : > { %741 = vmatmul.mubr.bf16.gmra.mrb[12].mxu0 %v2580_v40  ;;  %781 = vmatmul.mubr.bf16.gmra.mrb[12].mxu1 %v2581_v41 }
  0xbd   : > { %v563_v45 = vpop.permute.xlu1 %562  ;;  %v553_v46 = vpop.permute.xlu0 %552 }
  0xc3   : > { %v568_v47 = vpop.permute.xlu1 %567  ;;  %v558_v48 = vpop.permute.xlu0 %557 }
  0xc7   : > { %v3175_v49 = vpop.permute.xlu1 %577  ;;  %v3177_v50 = vpop.permute.xlu0 %572 }
  0xcb   : > { %v3179_v51 = vpop.permute.xlu1 %587  ;;  %v3181_v52 = vpop.permute.xlu0 %582 }
  0xcf   : > { %v598_v53 = vpop.permute.xlu1 %597  ;;  %v593_v54 = vpop.permute.xlu0 %592 }
  0xd3   : > { %v608_v15 = vpop.permute.xlu1 %607  ;;  %v603_v16 = vpop.permute.xlu0 %602 }
 0x134   : > { %v712_v55 = vpop.f32.mrb[0].mxu0  ;;  %v752_v56 = vpop.f32.mrb[0].mxu1 }
 0x135   : > { %v713_v57 = vadd.f32 %v712_v55, %v553_v46  ;;  %v753_v58 = vadd.f32 %v752_v56, %v593_v54  ;;  %v714_v59 = vpop.f32.mrb[1].mxu0  ;;  %v754_v60 = vpop.f32.mrb[1].mxu1 }
 0x136   : > { %v715_v61 = vadd.f32 %v714_v59, %v553_v46  ;;  %v755_v62 = vadd.f32 %v754_v60, %v593_v54  ;;  %v716_v63 = vpop.f32.mrb[2].mxu0  ;;  %v756_v0 = vpop.f32.mrb[2].mxu1 }
 0x137   : > { %v807_v1 = vmax.f32 %v753_v58, 0.0  ;;  %v717_v2 = vadd.f32 %v716_v63, %v558_v48  ;;  %v757_v3 = vadd.f32 %v756_v0, %v598_v53  ;;  %v718_v4 = vpop.f32.mrb[3].mxu0  ;;  %v758_v5 = vpop.f32.mrb[3].mxu1  ;;  %v791_v9 = vmax.f32 %v713_v57, 0.0 }
 0x138   : > { %v808_v6 = vmax.f32 %v755_v62, 0.0  ;;  %v719_v7 = vadd.f32 %v718_v4, %v558_v48  ;;  %v759_v8 = vadd.f32 %v758_v5, %v598_v53  ;;  %v792_v12 = vmax.f32 %v715_v61, 0.0  ;;  %v618_v48 = vpop.permute.xlu1 %617  ;;  %v613_v53 = vpop.permute.xlu0 %612 }
 0x139   : > { %838 = vst [vmem:[#allocation2 + $0x60] sm:$0xff] %v807_v1  ;;  %v793_v10 = vmax.f32 %v717_v2, 0.0  ;;  %v809_v11 = vmax.f32 %v757_v3, 0.0 }
 0x13a   : > { %839 = vst [vmem:[#allocation2 + $0x68] sm:$0xff] %v808_v6  ;;  %v794_v13 = vmax.f32 %v719_v7, 0.0  ;;  %v810_v14 = vmax.f32 %v759_v8, 0.0 }
 0x13b   : > { %v857_v17 = vpack.c.bf16 %v793_v10, %v791_v9  ;;  %840 = vst [vmem:[#allocation2 + $0x70] sm:$0xff] %v809_v11 }
 0x13c   : > { %v858_v18 = vpack.c.bf16 %v794_v13, %v792_v12  ;;  %841 = vst [vmem:[#allocation2 + $0x78] sm:$0xff] %v810_v14  ;;  %v722_v19 = vpop.f32.mrb[4].mxu0  ;;  %v762_v20 = vpop.f32.mrb[4].mxu1 }
 0x13d   : > { %860 = vst [vmem:[#allocation3 + $0x70] sm:$0xff] %v857_v17  ;;  %v723_v21 = vadd.f32 %v722_v19, %v563_v45  ;;  %v763_v22 = vadd.f32 %v762_v20, %v603_v16  ;;  %v724_v23 = vpop.f32.mrb[5].mxu0  ;;  %v764_v24 = vpop.f32.mrb[5].mxu1 }
 0x13e   : > { %861 = vst [vmem:[#allocation3 + $0x78] sm:$0xff] %v858_v18  ;;  %v725_v25 = vadd.f32 %v724_v23, %v563_v45  ;;  %v765_v26 = vadd.f32 %v764_v24, %v603_v16  ;;  %v726_v27 = vpop.f32.mrb[6].mxu0  ;;  %v766_v28 = vpop.f32.mrb[6].mxu1 }
 0x13f   : > { %v795_v29 = vmax.f32 %v723_v21, 0.0  ;;  %v811_v30 = vmax.f32 %v763_v22, 0.0  ;;  %v727_v31 = vadd.f32 %v726_v27, %v568_v47  ;;  %v767_v33 = vadd.f32 %v766_v28, %v608_v15  ;;  %v728_v34 = vpop.f32.mrb[7].mxu0  ;;  %v768_v35 = vpop.f32.mrb[7].mxu1 }
 0x140   : > { %v796_v36 = vmax.f32 %v725_v25, 0.0  ;;  %v812_v37 = vmax.f32 %v765_v26, 0.0  ;;  %v729_v38 = vadd.f32 %v728_v34, %v568_v47  ;;  %v769_v39 = vadd.f32 %v768_v35, %v608_v15  ;;  %v628_v12 = vpop.permute.xlu1 %627  ;;  %v623_v13 = vpop.permute.xlu0 %622 }
 0x141   : > { %823 = vst [vmem:[#allocation2] sm:$0xff] %v795_v29  ;;  %843 = vst [vmem:[#allocation2 + $0x80] sm:$0xff] %v811_v30  ;;  %v797_v40 = vmax.f32 %v727_v31, 0.0  ;;  %v813_v41 = vmax.f32 %v767_v33, 0.0 }
 0x142   : > { %824 = vst [vmem:[#allocation2 + $0x8] sm:$0xff] %v796_v36  ;;  %844 = vst [vmem:[#allocation2 + $0x88] sm:$0xff] %v812_v37  ;;  %v798_v45 = vmax.f32 %v729_v38, 0.0  ;;  %v814_v46 = vmax.f32 %v769_v39, 0.0  ;;  %v3194_v37 = vmov 0.0   ;;  %v3196_v38 = vmov 0.0  }
 0x143   : > { %825 = vst [vmem:[#allocation2 + $0x10] sm:$0xff] %v797_v40  ;;  %845 = vst [vmem:[#allocation2 + $0x90] sm:$0xff] %v813_v41  ;;  %v3200_v39 = vmov 0.0  }
 0x144   : > { %826 = vst [vmem:[#allocation2 + $0x18] sm:$0xff] %v798_v45  ;;  %846 = vst [vmem:[#allocation2 + $0x98] sm:$0xff] %v814_v46  ;;  %v732_v54 = vpop.f32.mrb[8].mxu0  ;;  %v772_v55 = vpop.f32.mrb[8].mxu1 }
 0x145   : > { %v733_v56 = vadd.f32 %v732_v54, %v3177_v50  ;;  %v773_v47 = vadd.f32 %v772_v55, %v613_v53  ;;  %v734_v57 = vpop.f32.mrb[9].mxu0  ;;  %v774_v58 = vpop.f32.mrb[9].mxu1 }
 0x146   : > { %v735_v59 = vadd.f32 %v734_v57, %v3177_v50  ;;  %v775_v60 = vadd.f32 %v774_v58, %v613_v53  ;;  %v736_v61 = vpop.f32.mrb[10].mxu0  ;;  %v776_v62 = vpop.f32.mrb[10].mxu1 }
 0x147   : > { %v799_v63 = vmax.f32 %v733_v56, 0.0  ;;  %v815_v0 = vmax.f32 %v773_v47, 0.0  ;;  %v737_v1 = vadd.f32 %v736_v61, %v3175_v49  ;;  %v777_v2 = vadd.f32 %v776_v62, %v618_v48  ;;  %v738_v3 = vpop.f32.mrb[11].mxu0  ;;  %v778_v4 = vpop.f32.mrb[11].mxu1 }
 0x148   : > { %v800_v5 = vmax.f32 %v735_v59, 0.0  ;;  %v816_v6 = vmax.f32 %v775_v60, 0.0  ;;  %v739_v7 = vadd.f32 %v738_v3, %v3175_v49  ;;  %v779_v8 = vadd.f32 %v778_v4, %v618_v48 }
 0x149   : > { %828 = vst [vmem:[#allocation2 + $0x20] sm:$0xff] %v799_v63  ;;  %848 = vst [vmem:[#allocation2 + $0xa0] sm:$0xff] %v815_v0  ;;  %v801_v9 = vmax.f32 %v737_v1, 0.0  ;;  %v817_v10 = vmax.f32 %v777_v2, 0.0 }
 0x14a   : > { %829 = vst [vmem:[#allocation2 + $0x28] sm:$0xff] %v800_v5  ;;  %849 = vst [vmem:[#allocation2 + $0xa8] sm:$0xff] %v816_v6  ;;  %v802_v50 = vmax.f32 %v739_v7, 0.0  ;;  %v818_v11 = vmax.f32 %v779_v8, 0.0 }
 0x14b   : > { %830 = vst [vmem:[#allocation2 + $0x30] sm:$0xff] %v801_v9  ;;  %850 = vst [vmem:[#allocation2 + $0xb0] sm:$0xff] %v817_v10 }
 0x14c   : > { %831 = vst [vmem:[#allocation2 + $0x38] sm:$0xff] %v802_v50  ;;  %851 = vst [vmem:[#allocation2 + $0xb8] sm:$0xff] %v818_v11  ;;  %v742_v14 = vpop.f32.mrb[12].mxu0  ;;  %v782_v15 = vpop.f32.mrb[12].mxu1 }
 0x14d   : > { %v743_v16 = vadd.f32 %v742_v14, %v3181_v52  ;;  %v783_v49 = vadd.f32 %v782_v15, %v623_v13  ;;  %v744_v17 = vpop.f32.mrb[13].mxu0  ;;  %v784_v18 = vpop.f32.mrb[13].mxu1 }
 0x14e   : > { %v745_v19 = vadd.f32 %v744_v17, %v3181_v52  ;;  %v785_v20 = vadd.f32 %v784_v18, %v623_v13  ;;  %v746_v21 = vpop.f32.mrb[14].mxu0  ;;  %v786_v22 = vpop.f32.mrb[14].mxu1 }
 0x14f   : > { %v803_v23 = vmax.f32 %v743_v16, 0.0  ;;  %v819_v24 = vmax.f32 %v783_v49, 0.0  ;;  %v747_v25 = vadd.f32 %v746_v21, %v3179_v51  ;;  %v787_v26 = vadd.f32 %v786_v22, %v628_v12  ;;  %v748_v27 = vpop.f32.mrb[15].mxu0  ;;  %v788_v28 = vpop.f32.mrb[15].mxu1 }
 0x150   : > { %v804_v29 = vmax.f32 %v745_v19, 0.0  ;;  %v820_v30 = vmax.f32 %v785_v20, 0.0  ;;  %v749_v31 = vadd.f32 %v748_v27, %v3179_v51  ;;  %v789_v33 = vadd.f32 %v788_v28, %v628_v12 }
 0x151   : > { %833 = vst [vmem:[#allocation2 + $0x40] sm:$0xff] %v803_v23  ;;  %853 = vst [vmem:[#allocation2 + $0xc0] sm:$0xff] %v819_v24  ;;  %v805_v34 = vmax.f32 %v747_v25, 0.0  ;;  %v821_v52 = vmax.f32 %v787_v26, 0.0  ;;  %v3198_v51 = vmov 0.0  }
 0x152   : > { %834 = vst [vmem:[#allocation2 + $0x48] sm:$0xff] %v804_v29  ;;  %854 = vst [vmem:[#allocation2 + $0xc8] sm:$0xff] %v820_v30  ;;  %v806_v35 = vmax.f32 %v749_v31, 0.0  ;;  %v822_v36 = vmax.f32 %v789_v33, 0.0 }
 0x153   : > { %835 = vst [vmem:[#allocation2 + $0x50] sm:$0xff] %v805_v34  ;;  %855 = vst [vmem:[#allocation2 + $0xd0] sm:$0xff] %v821_v52 }
 0x154   : > { %836 = vst [vmem:[#allocation2 + $0x58] sm:$0xff] %v806_v35  ;;  %856 = vst [vmem:[#allocation2 + $0xd8] sm:$0xff] %v822_v36 }
 0x155 LB: >> { %s4134_s24 = sadd.s32 4294967295, %s2845_s16  ;;  %s2848_s12 = smov 126   ;;  %v2850_v57 = vmov 0   ;;  %vm919_vm8 = vcmp.lt.s32.totalorder %v3162_v43, 2  ;;  %vm932_vm9 = vcmp.lt.s32.totalorder %v3162_v43, 126  ;;  %vm995_vm10 = vcmask 392192   ;;  %s2845_s16 = sphi %s3202_s16, %s894_s16   ;;  %v2841_v39 = vphi %v3200_v39, %v1042_v39   ;;  %v2837_v51 = vphi %v3198_v51, %v1043_v51   ;;  %v2833_v38 = vphi %v3196_v38, %v1044_v38   ;;  %v2829_v37 = vphi %v3194_v37, %v1045_v37  }
 0x156   : >> { %s2450_s29 = sshll.u32 %s4134_s24, 5  ;;  %s2849_s13 = smov 2   ;;  %1031 = vmatprep.mubr.bf16.mxu0 %v2850_v57  ;;  %2602 = vset.pattern.permute.xlu0 %v2850_v57 }
 0x157   : >> { %s902_s30 = scalar_lea.vmem [#allocation2], %s2450_s29  ;;  %s2451_s0 = sshll.u32 %s2845_s16, 3  ;;  %2603 = vset.pattern.permute.xlu1 %v2850_v57 }
 0x158   : >> { %s3230_s14 = scalar_lea.vmem %s4123_s3, %s2451_s0  ;;  %s2431_s29 = sshll.u32 %s2845_s16, 4 }
 0x159   : >> { %s977_s1 = scalar_lea.vmem %s4124_s4, %s2431_s29  ;;  %v2604_v36 = vld [vmem:[%s3230_s14] sm:$0xff]  }
 0x15a   : >> { %v978_v58 = vld [vmem:[%s977_s1] sm:$0xff]  ;;  %v979_v59 = vld [vmem:[%s977_s1 + $0x8] sm:$0xff]  ;;  %s4181_s1 = sadd.s32 4294967295, %s2845_s16  ;;  %s894_s16 = sadd.s32 1, %s2845_s16  }
 0x15b   : >> { %v903_v40 = vld [vmem:[%s902_s30] sm:$0xff]  ;;  %v905_v41 = vld [vmem:[%s902_s30 + $0x10] sm:$0xff]  ;;  %v904_v45 = vld [vmem:[%s902_s30 + $0x8] sm:$0xff]  ;;  %s2452_s24 = sshll.u32 %s4181_s1, 4  ;;  %p891_p13 = scmp.ge.s32.totalorder %s894_s16, 8  }
 0x15c   : >> { %v3214_v46 = vadd.f32 %v2841_v39, %v903_v40  ;;  %v3216_v48 = vadd.f32 %v2833_v38, %v905_v41  ;;  %v906_v53 = vld [vmem:[%s902_s30 + $0x18] sm:$0xff]  ;;  %v3218_v54 = vadd.f32 %v2837_v51, %v904_v45  ;;  %1307 = vmatprep.mubr.bf16.mxu1 (%p891_p13), %v2847_v32  ;;  %vm1461_vm11 = vcmask (%p891_p13), 261120   ;;  %s4225_s14 = sadd.s32 (%p891_p13), 4294967295, %s2825_s20   ;;  %s2316_s30 = sshll.u32 (%p891_p13), %s3192_s15, 4  ;;  %s4072_s30 = int_to_ptr.vmem [resolvable:$true] %s2316_s30 }
 0x15d   : >> { %v3220_v55 = vadd.f32 %v2829_v37, %v906_v53  ;;  %s2453_s29 = sshll.u32 (%p891_p13), %s4225_s14, 8  ;;  %s2851_s0 = smov (%p891_p13), [#allocation6]  }
 0x15e   : >> { %v2592_v56 = vpack.i.bf16 %v3216_v48, %v3214_v46  ;;  %v957_v27 = vpack.c.bf16 %v3216_v48, %v3214_v46  ;;  %s2747_s21 = sshll.u32 (%p891_p13), %s2851_s0, 4  ;;  %s2748_s21 = int_to_ptr.vmem [resolvable:$false] %s2747_s21 }
 0x15f   : >> { %v2597_v47 = vpack.i.bf16 %v3220_v55, %v3218_v54  ;;  %v958_v21 = vpack.c.bf16 %v3220_v55, %v3218_v54  ;;  %s2749_s22 = scalar_lea.vmem (%p891_p13), %s2748_s21, 8192  ;;  %p2750_p3 = scmp.lt.s32.totalorder (%p891_p13), %s4072_s30, %s2748_s21 }
 0x160   : >> { %2593 = vrot.lane.b32.xlu1 %v2592_v56, %s2848_s12  ;;  %2583 = vrot.lane.b32.xlu0 %v2592_v56, %s2849_s13 }
 0x164   : >> { %2598 = vrot.lane.b32.xlu1 %v2597_v47, %s2848_s12  ;;  %2588 = vrot.lane.b32.xlu0 %v2597_v47, %s2849_s13  ;;  %s1050_s12 = scalar_lea.vmem [#allocation3], %s2452_s24  ;;  %s2743_s13 = scalar_lea.vmem (%p891_p13), %s4072_s30, 4096 }
 0x165   : > { %p2744_p0 = scmp.ne.s32.totalorder (%p891_p13), %s4072_s30, %s2743_s13  ;;  %p2751_p4 = scmp.lt.s32.totalorder (%p891_p13), %s2749_s22, %s2743_s13 }
 0x167   : > { %p2745_p1 = pnand (%p891_p13), %p2744_p0, %p2953_p6  ;;  %p2752_p5 = por (%p891_p13), %p2751_p4, %p2750_p3 }
 0x168   : >> { %982 = vperm.xlu0 %2602, %v978_v58   ;;  %987 = vperm.xlu1 %2603, %v979_v59  }
 0x169   : > { %p2746_p2 = pneg (%p891_p13), %p2745_p1 }
 0x16b   : > { %p2753_p7 = pnand (%p891_p13), %p2752_p5, %p2746_p2 }
 0x16c   : > { %2605 = vset.pattern.permute.xlu0 (%p891_p13), %v2847_v32  ;;  %2606 = vset.pattern.permute.xlu1 (%p891_p13), %v2847_v32 }
 0x1d2   : >> { %v2594_v60 = vpop.permute.xlu1 %2593  ;;  %v2584_v61 = vpop.permute.xlu0 %2583 }
 0x1d3   : >> { %v2596_v62 = vunpack.i.h.bf16 %v2594_v60  ;;  %v2595_v63 = vunpack.i.l.bf16 %v2594_v60  ;;  %v2586_v0 = vunpack.i.h.bf16 %v2584_v61  ;;  %v2585_v1 = vunpack.i.l.bf16 %v2584_v61 }
 0x1d6   : >> { %v2599_v2 = vpop.permute.xlu1 %2598  ;;  %v2589_v3 = vpop.permute.xlu0 %2588 }
 0x1d7   : >> { %v2601_v4 = vunpack.i.h.bf16 %v2599_v2  ;;  %v2600_v5 = vunpack.i.l.bf16 %v2599_v2  ;;  %v2591_v6 = vunpack.i.h.bf16 %v2589_v3  ;;  %v2590_v7 = vunpack.i.l.bf16 %v2589_v3  ;;  %v1092_v2 = vld [vmem:[%s4126_s6 + $0x8] sm:$0xff] (%p891_p13)  ;;  %v1094_v3 = vld [vmem:[%s4126_s6 + $0x18] sm:$0xff] (%p891_p13) }
 0x1d9   : >> { %v920_v8 = vsel %vm919_vm8, %v2585_v1, %v2590_v7  ;;  %v921_v9 = vsel %vm919_vm8, %v2586_v0, %v2591_v6  ;;  %v935_v10 = vsel %vm932_vm9, %v2600_v5, %v2595_v63  ;;  %v936_v50 = vsel %vm932_vm9, %v2601_v4, %v2596_v62 }
 0x1da   : >> { %v938_v11 = vsel %vm874_vm3, %v3218_v54, %v920_v8  ;;  %v940_v12 = vsel %vm874_vm3, %v3220_v55, %v921_v9  ;;  %v922_v16 = vsel %vm919_vm8, %v2590_v7, %v2585_v1  ;;  %v923_v49 = vsel %vm919_vm8, %v2591_v6, %v2586_v0  ;;  %v1095_v6 = vld [vmem:[%s4126_s6 + $0x20] sm:$0xff] (%p891_p13)  ;;  %v1096_v7 = vld [vmem:[%s4126_s6 + $0x28] sm:$0xff] (%p891_p13) }
 0x1db   : >> { %v942_v13 = vsel %vm868_vm1, %v935_v10, %v938_v11  ;;  %v944_v14 = vsel %vm868_vm1, %v936_v50, %v940_v12  ;;  %v933_v17 = vsel %vm932_vm9, %v2595_v63, %v2600_v5  ;;  %v934_v18 = vsel %vm932_vm9, %v2596_v62, %v2601_v4  ;;  %v1091_v62 = vld [vmem:[%s4126_s6] sm:$0xff] (%p891_p13)  ;;  %v1093_v63 = vld [vmem:[%s4126_s6 + $0x10] sm:$0xff] (%p891_p13) }
 0x1dc   : >> { %v954_v15 = vpack.c.bf16 %v944_v14, %v942_v13  ;;  %v937_v19 = vsel %vm871_vm2, %v3214_v46, %v922_v16  ;;  %v939_v20 = vsel %vm871_vm2, %v3216_v48, %v923_v49  ;;  %v946_v22 = vsel %vm886_vm7, %v3218_v54, %v935_v10  ;;  %1109 = vperm.xlu0 (%p891_p13), %2605, %v1091_v62   ;;  %v1097_v10 = vld [vmem:[%s4126_s6 + $0x30] sm:$0xff] (%p891_p13)  ;;  %v2607_v12 = vld [vmem:[%s4125_s5] sm:$0xff] (%p891_p13)  }
 0x1dd   : >> { %v948_v23 = vsel %vm886_vm7, %v3220_v55, %v936_v50  ;;  %v941_v24 = vsel %vm865_vm0, %v933_v17, %v937_v19  ;;  %v943_v25 = vsel %vm865_vm0, %v934_v18, %v939_v20  ;;  %v950_v28 = vsel %vm880_vm5, %v920_v8, %v946_v22  ;;  %1119 = vperm.xlu1 (%p891_p13), %2606, %v1093_v63   ;;  %v1098_v50 = vld [vmem:[%s4126_s6 + $0x38] sm:$0xff] (%p891_p13)  ;;  %v2608_v13 = vld [vmem:[%s4125_s5 + $0x20] sm:$0xff] (%p891_p13)   ;;  %v1104_v20 = vld [vmem:[%s4126_s6 + $0x68] sm:$0xff] (%p891_p13) }
 0x1de   : >> { %999 = vmatprep.subr.bf16.mxu0 %v954_v15  ;;  %v953_v26 = vpack.c.bf16 %v943_v25, %v941_v24  ;;  %v952_v29 = vsel %vm880_vm5, %v921_v9, %v948_v23  ;;  %v945_v30 = vsel %vm883_vm6, %v3214_v46, %v933_v17  ;;  %v947_v31 = vsel %vm883_vm6, %v3216_v48, %v934_v18  ;;  %v1099_v14 = vld [vmem:[%s4126_s6 + $0x40] sm:$0xff] (%p891_p13)  ;;  %v1100_v15 = vld [vmem:[%s4126_s6 + $0x48] sm:$0xff] (%p891_p13)  ;;  %v1106_v22 = vld [vmem:[%s4126_s6 + $0x78] sm:$0xff] (%p891_p13) }
 0x1df   : >> { %v962_v33 = vpack.c.bf16 %v952_v29, %v950_v28  ;;  %v949_v34 = vsel %vm877_vm4, %v922_v16, %v945_v30  ;;  %v951_v52 = vsel %vm877_vm4, %v923_v49, %v947_v31  ;;  %v1101_v16 = vld [vmem:[%s4126_s6 + $0x50] sm:$0xff] (%p891_p13)  ;;  %v1102_v49 = vld [vmem:[%s4126_s6 + $0x58] sm:$0xff] (%p891_p13)  ;;  %v2609_v17 = vld [vmem:[%s4125_s5 + $0x8] sm:$0xff] (%p891_p13)  }
 0x1e0   : >> { %1000 = vmatpush1.bf16.msra.mxu0 %v953_v26  ;;  %v961_v35 = vpack.c.bf16 %v951_v52, %v949_v34  ;;  %1114 = vperm.xlu0 (%p891_p13), %2605, %v1092_v2   ;;  %v2610_v18 = vld [vmem:[%s4125_s5 + $0x28] sm:$0xff] (%p891_p13)   ;;  %v1103_v19 = vld [vmem:[%s4126_s6 + $0x60] sm:$0xff] (%p891_p13)  ;;  %v2611_v23 = vld [vmem:[%s4125_s5 + $0x10] sm:$0xff] (%p891_p13)  }
 0x1e1   : >> { %1001 = vmatprep.subr.bf16.mxu0 %v958_v21  ;;  %1124 = vperm.xlu1 (%p891_p13), %2606, %v1094_v3   ;;  %v1105_v21 = vld [vmem:[%s4126_s6 + $0x70] sm:$0xff] (%p891_p13)  ;;  %v2613_v25 = vld [vmem:[%s4125_s5 + $0x18] sm:$0xff] (%p891_p13)  }
 0x1e2   : > { %v2612_v24 = vld [vmem:[%s4125_s5 + $0x30] sm:$0xff] (%p891_p13)   ;;  %v2614_v26 = vld [vmem:[%s4125_s5 + $0x38] sm:$0xff] (%p891_p13)  }
 0x1e4   : >> { %1002 = vmatpush1.bf16.msra.mxu0 %v957_v27  ;;  %1129 = vperm.xlu0 (%p891_p13), %2605, %v1095_v6  }
 0x1e5   : >> { %1003 = vmatprep.subr.bf16.mxu0 %v962_v33  ;;  %1134 = vperm.xlu1 (%p891_p13), %2606, %v1096_v7  }
 0x1e7   : >> { %v983_v37 = vpop.permute.xlu0 %982  ;;  %v988_v51 = vpop.permute.xlu1 %987 }
 0x1e8   : >> { %1004 = vmatpush1.bf16.msra.mxu0 %v961_v35  ;;  %1139 = vperm.xlu0 (%p891_p13), %2605, %v1097_v10  }
 0x1e9   : > { %1144 = vperm.xlu1 (%p891_p13), %2606, %v1098_v50  }
 0x1eb   : >> { %2433 = vmatmul.mubr.msk.bf16.vlgmr.msra.gmra.mrb[0].mxu0 %vm995_vm10, %v2604_v36 }
 0x1ec   : > { %1267 = vmatprep.mubr.bf16.mxu0 (%p891_p13), %v2847_v32  ;;  %1149 = vperm.xlu0 (%p891_p13), %2605, %v1099_v14  }
 0x1ed   : > { %1154 = vperm.xlu1 (%p891_p13), %2606, %v1100_v15  }
 0x1f0   : > { %1159 = vperm.xlu0 (%p891_p13), %2605, %v1101_v16  }
 0x1f1   : > { %1164 = vperm.xlu1 (%p891_p13), %2606, %v1102_v49  }
 0x1f4   : > { %1169 = vperm.xlu0 (%p891_p13), %2605, %v1103_v19  }
 0x1f5   : > { %1174 = vperm.xlu1 (%p891_p13), %2606, %v1104_v20  }
 0x1f8   : > { %1179 = vperm.xlu0 (%p891_p13), %2605, %v1105_v21  }
 0x1f9   : > { %1184 = vperm.xlu1 (%p891_p13), %2606, %v1106_v22  }
 0x25b   : > { %v1110_v27 = vpop.permute.xlu0 (%p891_p13), %1109 }
 0x25c   : > { %v1120_v29 = vpop.permute.xlu1 (%p891_p13), %1119 }
 0x25f   : > { %v1115_v28 = vpop.permute.xlu0 (%p891_p13), %1114 }
 0x260   : > { %v3396_v31 = vpop.permute.xlu1 (%p891_p13), %1124 }
 0x263   : > { %v3394_v30 = vpop.permute.xlu0 (%p891_p13), %1129 }
 0x267   : > { %v3398_v33 = vpop.permute.xlu0 (%p891_p13), %1139 }
 0x26b   : > { %v1150_v34 = vpop.permute.xlu0 (%p891_p13), %1149 }
 0x26f   : > { %v1160_v6 = vpop.permute.xlu0 (%p891_p13), %1159 }
 0x2be   : >> { %v1033_v38 = vpop.f32.mrb[0].mxu0 }
 0x2bf   : >> { %v1034_v39 = vadd.f32 %v1033_v38, %v983_v37  ;;  %v1035_v40 = vpop.f32.mrb[1].mxu0 }
 0x2c0   : >> { %v1036_v41 = vadd.f32 %v1035_v40, %v983_v37  ;;  %v1037_v45 = vpop.f32.mrb[2].mxu0 }
 0x2c1   : >> { %v1038_v46 = vadd.f32 %v1037_v45, %v988_v51  ;;  %v1039_v48 = vpop.f32.mrb[3].mxu0  ;;  %v1042_v39 = vmax.f32 %v1034_v39, 0.0  }
 0x2c2   : >> { %v1040_v53 = vadd.f32 %v1039_v48, %v988_v51  ;;  %v1043_v51 = vmax.f32 %v1036_v41, 0.0   ;;  %893 = sbr.rel (!%p891_p13) target bundleno = 341 (0x155), region = 151 }
 0x2c3   : >> { %v1044_v38 = vmax.f32 %v1038_v46, 0.0  }
 0x2c4   : >> { %v1045_v37 = vmax.f32 %v1040_v53, 0.0  }
 0x2c5   : >> { %v1046_v54 = vpack.c.bf16 %v1044_v38, %v1042_v39 }
 0x2c6   : >> { %v1047_v55 = vpack.c.bf16 %v1045_v37, %v1043_v51 }
 0x2c7   : >> { %1051 = vst [vmem:[%s1050_s12] sm:$0xff] %v1046_v54 }
 0x2c8   : >> { %1052 = vst [vmem:[%s1050_s12 + $0x8] sm:$0xff] %v1047_v55  ;;  %s4070_s12 = scalar_lea.hbm (%p891_p13), %s4131_s11, %s2453_s29 }
 0x2cf   : > { %v1054_v56 = vld [vmem:[#allocation3 + $0x8] sm:$0xff]  ;;  %v1053_v47 = vld [vmem:[#allocation3] sm:$0xff]  ;;  %v1057_v57 = vld [vmem:[#allocation3 + $0x18] sm:$0xff] }
 0x2d0   : > { %1235 = vmatprep.subr.bf16.mxu0 %v1054_v56  ;;  %2470 = vmatprep.subr.bf16.mxu1 %v1054_v56  ;;  %v1056_v58 = vld [vmem:[#allocation3 + $0x10] sm:$0xff]  ;;  %v1060_v59 = vld [vmem:[#allocation3 + $0x28] sm:$0xff]  ;;  %v1059_v43 = vld [vmem:[#allocation3 + $0x20] sm:$0xff] }
 0x2d1   : > { %1236 = vmatpush1.bf16.msra.mxu0 %v1053_v47  ;;  %2478 = vmatpush1.bf16.msra.mxu1 %v1053_v47  ;;  %v1063_v44 = vld [vmem:[#allocation3 + $0x38] sm:$0xff]  ;;  %v1062_v60 = vld [vmem:[#allocation3 + $0x30] sm:$0xff]  ;;  %v1066_v61 = vld [vmem:[#allocation3 + $0x48] sm:$0xff] }
 0x2d2   : > { %1237 = vmatprep.subr.bf16.mxu0 %v1057_v57  ;;  %2471 = vmatprep.subr.bf16.mxu1 %v1057_v57  ;;  %v1065_v0 = vld [vmem:[#allocation3 + $0x40] sm:$0xff]  ;;  %v1069_v1 = vld [vmem:[#allocation3 + $0x58] sm:$0xff]  ;;  %v1068_v4 = vld [vmem:[#allocation3 + $0x50] sm:$0xff] }
 0x2d3   : > { %v1072_v5 = vld [vmem:[#allocation3 + $0x68] sm:$0xff]  ;;  %v1071_v8 = vld [vmem:[#allocation3 + $0x60] sm:$0xff]  ;;  %v1074_v9 = vld [vmem:[#allocation3 + $0x78] sm:$0xff] }
 0x2d4   : > { %v1073_v11 = vld [vmem:[#allocation3 + $0x70] sm:$0xff] }
 0x2d5   : > { %1238 = vmatpush1.bf16.msra.mxu0 %v1056_v58  ;;  %2479 = vmatpush1.bf16.msra.mxu1 %v1056_v58 }
 0x2d6   : > { %1239 = vmatprep.subr.bf16.mxu0 %v1060_v59  ;;  %2472 = vmatprep.subr.bf16.mxu1 %v1060_v59 }
 0x2d9   : > { %1240 = vmatpush1.bf16.msra.mxu0 %v1059_v43  ;;  %2480 = vmatpush1.bf16.msra.mxu1 %v1059_v43 }
 0x2da   : > { %1241 = vmatprep.subr.bf16.mxu0 %v1063_v44  ;;  %2473 = vmatprep.subr.bf16.mxu1 %v1063_v44 }
 0x2dd   : > { %1242 = vmatpush1.bf16.msra.mxu0 %v1062_v60  ;;  %2481 = vmatpush1.bf16.msra.mxu1 %v1062_v60 }
 0x2de   : > { %1243 = vmatprep.subr.bf16.mxu0 %v1066_v61  ;;  %2474 = vmatprep.subr.bf16.mxu1 %v1066_v61 }
 0x2e1   : > { %1244 = vmatpush1.bf16.msra.mxu0 %v1065_v0  ;;  %2482 = vmatpush1.bf16.msra.mxu1 %v1065_v0 }
 0x2e2   : > { %1245 = vmatprep.subr.bf16.mxu0 %v1069_v1  ;;  %2475 = vmatprep.subr.bf16.mxu1 %v1069_v1 }
 0x2e5   : > { %1246 = vmatpush1.bf16.msra.mxu0 %v1068_v4  ;;  %2483 = vmatpush1.bf16.msra.mxu1 %v1068_v4 }
 0x2e6   : > { %1247 = vmatprep.subr.bf16.mxu0 %v1072_v5  ;;  %2476 = vmatprep.subr.bf16.mxu1 %v1072_v5 }
 0x2e9   : > { %1248 = vmatpush1.bf16.msra.mxu0 %v1071_v8  ;;  %2484 = vmatpush1.bf16.msra.mxu1 %v1071_v8 }
 0x2ea   : > { %1249 = vmatprep.subr.bf16.mxu0 %v1074_v9  ;;  %2477 = vmatprep.subr.bf16.mxu1 %v1074_v9 }
 0x2ed   : > { %1250 = vmatpush1.bf16.msra.mxu0 %v1073_v11  ;;  %2485 = vmatpush1.bf16.msra.mxu1 %v1073_v11 }
 0x2f0   : > { %1268 = vmatmul.mubr.bf16.vlgmr.msra.gmra.mrb[0].mxu0 %v2607_v12  ;;  %1308 = vmatmul.mubr.bf16.vlgmr.msra.gmra.mrb[0].mxu1 %v2608_v13 }
 0x2f1   : > { %1277 = vmatprep.mubr.bf16.mxu0 %v2847_v32  ;;  %1317 = vmatprep.mubr.bf16.mxu1 %v2847_v32 }
 0x2f8   : > { %1278 = vmatmul.mubr.bf16.gmra.mrb[4].mxu0 %v2609_v17  ;;  %1318 = vmatmul.mubr.bf16.gmra.mrb[4].mxu1 %v2610_v18 }
 0x2f9   : > { %1287 = vmatprep.mubr.bf16.mxu0 %v2847_v32  ;;  %1327 = vmatprep.mubr.bf16.mxu1 %v2847_v32 }
 0x300   : > { %1288 = vmatmul.mubr.bf16.gmra.mrb[8].mxu0 %v2611_v23  ;;  %1328 = vmatmul.mubr.bf16.gmra.mrb[8].mxu1 %v2612_v24 }
 0x301   : > { %1297 = vmatprep.mubr.bf16.mxu0 %v2847_v32  ;;  %1337 = vmatprep.mubr.bf16.mxu1 %v2847_v32  ;;  %v3400_v32 = vpop.permute.xlu1 %1134 }
 0x305   : > { %v3402_v52 = vpop.permute.xlu1 %1144 }
 0x308   : > { %1298 = vmatmul.mubr.bf16.gmra.mrb[12].mxu0 %v2613_v25  ;;  %1338 = vmatmul.mubr.bf16.gmra.mrb[12].mxu1 %v2614_v26 }
 0x309   : > { %v1155_v56 = vpop.permute.xlu1 %1154 }
 0x30d   : > { %v1165_v21 = vpop.permute.xlu1 %1164 }
 0x3c3   : > { %v1269_v35 = vpop.f32.mrb[0].mxu0  ;;  %v1309_v36 = vpop.f32.mrb[0].mxu1 }
 0x3c4   : > { %v3404_v37 = vadd.f32 %v1269_v35, %v1110_v27  ;;  %v3406_v38 = vadd.f32 %v1309_v36, %v1150_v34  ;;  %v1271_v51 = vpop.f32.mrb[1].mxu0  ;;  %v1311_v39 = vpop.f32.mrb[1].mxu1 }
 0x3c5   : > { %v1273_v40 = vpop.f32.mrb[2].mxu0  ;;  %v1313_v41 = vpop.f32.mrb[2].mxu1  ;;  %v3410_v48 = vadd.f32 %v1271_v51, %v1110_v27  ;;  %v3419_v57 = vadd.f32 %v1311_v39, %v1150_v34 }
 0x3c6   : > { %v4166_v45 = vmax.f32 %v3404_v37, 0.0  ;;  %v4158_v46 = vmax.f32 %v3406_v38, 0.0  ;;  %v3412_v53 = vadd.f32 %v1273_v40, %v1115_v28  ;;  %v1275_v54 = vpop.f32.mrb[3].mxu0  ;;  %v1315_v55 = vpop.f32.mrb[3].mxu1  ;;  %v3422_v59 = vadd.f32 %v1313_v41, %v1155_v56 }
 0x3c7   : > { %v4150_v47 = vmax.f32 %v3410_v48, 0.0  ;;  %v4138_v0 = vmax.f32 %v3419_v57, 0.0  ;;  %v3430_v2 = vadd.f32 %v1275_v54, %v1115_v28  ;;  %v3432_v3 = vadd.f32 %v1315_v55, %v1155_v56 }
 0x3c8   : > { %1396 = vadd.xlane.f32.xlu1 %v4158_v46  ;;  %1380 = vadd.xlane.f32.xlu0 %v4166_v45  ;;  %v4165_v58 = vmax.f32 %v3412_v53, 0.0  ;;  %v4157_v1 = vmax.f32 %v3422_v59, 0.0 }
 0x3c9   : > { %4182 = vst [vmem:[#allocation9_spill] sm:$0xff] %v3432_v3  ;;  %v4148_v7 = vmax.f32 %v3430_v2, 0.0  ;;  %v4137_v8 = vmax.f32 %v3432_v3, 0.0 }
 0x3cb   : > { %v1279_v43 = vpop.f32.mrb[4].mxu0  ;;  %v1319_v44 = vpop.f32.mrb[4].mxu1 }
 0x3cc   : > { %v1281_v60 = vpop.f32.mrb[5].mxu0  ;;  %v1321_v61 = vpop.f32.mrb[5].mxu1  ;;  %1382 = vadd.xlane.f32.xlu1 %v4165_v58  ;;  %1842 = vadd.xlane.f32.xlu0 %v4150_v47  ;;  %v3440_v9 = vadd.f32 %v1279_v43, %v1120_v29  ;;  %v3442_v10 = vadd.f32 %v1319_v44, %v1160_v6  ;;  %v1434_v58 = vld [vmem:[%s4127_s7 + $0x28] sm:$0xff] }
 0x3cd   : > { %v1283_v62 = vpop.f32.mrb[6].mxu0  ;;  %v1323_v63 = vpop.f32.mrb[6].mxu1  ;;  %v3452_v17 = vadd.f32 %v1281_v60, %v1120_v29  ;;  %v3464_v23 = vadd.f32 %v1321_v61, %v1160_v6 }
 0x3ce   : > { %v1285_v4 = vpop.f32.mrb[7].mxu0  ;;  %v1325_v5 = vpop.f32.mrb[7].mxu1  ;;  %v4164_v16 = vmax.f32 %v3440_v9, 0.0  ;;  %v4156_v49 = vmax.f32 %v3442_v10, 0.0  ;;  %v3455_v18 = vadd.f32 %v1283_v62, %v3396_v31  ;;  %v3467_v25 = vadd.f32 %v1323_v63, %v1165_v21 }
 0x3cf   : > { %v4146_v22 = vmax.f32 %v3452_v17, 0.0  ;;  %4183 = vst [vmem:[#allocation10_spill] sm:$0xff] %v3464_v23  ;;  %v4136_v36 = vmax.f32 %v3464_v23, 0.0  ;;  %v3476_v39 = vadd.f32 %v1285_v4, %v3396_v31  ;;  %v3486_v56 = vadd.f32 %v1325_v5, %v1165_v21  ;;  %v1170_v6 = vpop.permute.xlu0 %1169 }
 0x3d0   : > { %1398 = vadd.xlane.f32.xlu1 %v4157_v1  ;;  %1858 = vadd.xlane.f32.xlu0 %v4138_v0  ;;  %v4163_v24 = vmax.f32 %v3455_v18, 0.0  ;;  %v4155_v51 = vmax.f32 %v3467_v25, 0.0  ;;  %v1432_v1 = vld [vmem:[%s4127_s7 + $0x18] sm:$0xff] }
 0x3d1   : > { %v4145_v55 = vmax.f32 %v3476_v39, 0.0  ;;  %4184 = vst [vmem:[#allocation11_spill] sm:$0xff] %v3486_v56  ;;  %v4135_v44 = vmax.f32 %v3486_v56, 0.0  ;;  %v1435_v56 = vld [vmem:[%s4127_s7 + $0x30] sm:$0xff] }
 0x3d3   : > { %v1289_v50 = vpop.f32.mrb[8].mxu0  ;;  %v1329_v11 = vpop.f32.mrb[8].mxu1 }
 0x3d4   : > { %v1291_v12 = vpop.f32.mrb[9].mxu0  ;;  %v3444_v13 = vpop.f32.mrb[9].mxu1  ;;  %1844 = vadd.xlane.f32.xlu1 %v4148_v7  ;;  %1860 = vadd.xlane.f32.xlu0 %v4137_v8  ;;  %v3479_v40 = vadd.f32 %v1289_v50, %v3394_v30  ;;  %v3520_v50 = vadd.f32 %v1329_v11, %v1170_v6 }
 0x3d5   : > { %v1293_v14 = vpop.f32.mrb[10].mxu0  ;;  %v1333_v15 = vpop.f32.mrb[10].mxu1  ;;  %v3498_v60 = vadd.f32 %v1291_v12, %v3394_v30 }
 0x3d6   : > { %v1295_v19 = vpop.f32.mrb[11].mxu0  ;;  %v3457_v20 = vpop.f32.mrb[11].mxu1  ;;  %v4162_v43 = vmax.f32 %v3479_v40, 0.0  ;;  %v3490_v31 = vadd.f32 %v1293_v14, %v3400_v32  ;;  %v4154_v21 = vmax.f32 %v3520_v50, 0.0 }
 0x3d7   : > { %v4143_v63 = vmax.f32 %v3498_v60, 0.0  ;;  %v3510_v4 = vadd.f32 %v1295_v19, %v3400_v32  ;;  %v1175_v19 = vpop.permute.xlu1 %1174 }
 0x3d8   : > { %1400 = vadd.xlane.f32.xlu1 %v4156_v49  ;;  %1384 = vadd.xlane.f32.xlu0 %v4164_v16  ;;  %v4160_v61 = vmax.f32 %v3490_v31, 0.0  ;;  %v3555_v8 = vadd.f32 %v3457_v20, %v1175_v19 }
 0x3d9   : > { %v4142_v12 = vmax.f32 %v3510_v4, 0.0 }
 0x3da   : > { %4186 = vst [vmem:[#allocation13_spill] sm:$0xff] %v3555_v8 }
 0x3db   : > { %v1299_v26 = vpop.f32.mrb[12].mxu0  ;;  %v1339_v27 = vpop.f32.mrb[12].mxu1 }
 0x3dc   : > { %v1301_v28 = vpop.f32.mrb[13].mxu0  ;;  %v1341_v29 = vpop.f32.mrb[13].mxu1  ;;  %1386 = vadd.xlane.f32.xlu1 %v4163_v24  ;;  %1846 = vadd.xlane.f32.xlu0 %v4146_v22  ;;  %v3502_v62 = vadd.f32 %v1299_v26, %v3398_v33  ;;  %v3532_v26 = vadd.f32 %v1333_v15, %v1175_v19 }
 0x3dd   : > { %v1303_v34 = vpop.f32.mrb[14].mxu0  ;;  %v1343_v35 = vpop.f32.mrb[14].mxu1  ;;  %v3524_v14 = vadd.f32 %v1301_v28, %v3398_v33  ;;  %v3543_v28 = vadd.f32 %v3444_v13, %v1170_v6 }
 0x3de   : > { %v1305_v41 = vpop.f32.mrb[15].mxu0  ;;  %v1345_v54 = vpop.f32.mrb[15].mxu1  ;;  %v4161_v5 = vmax.f32 %v3502_v62, 0.0  ;;  %v3514_v30 = vadd.f32 %v1303_v34, %v3402_v52 }
 0x3df   : > { %v4141_v11 = vmax.f32 %v3524_v14, 0.0  ;;  %v3536_v34 = vadd.f32 %v1305_v41, %v3402_v52  ;;  %v1180_v33 = vpop.permute.xlu0 %1179  ;;  %4185 = vst [vmem:[#allocation12_spill] sm:$0xff] %v3543_v28  ;;  %v1185_v52 = vpop.permute.xlu1 %1184  ;;  %v4140_v41 = vmax.f32 %v3543_v28, 0.0 }
 0x3e0   : > { %1402 = vadd.xlane.f32.xlu1 %v4155_v51  ;;  %1862 = vadd.xlane.f32.xlu0 %v4136_v36  ;;  %v4159_v32 = vmax.f32 %v3514_v30, 0.0  ;;  %v3546_v36 = vadd.f32 %v1339_v27, %v1180_v33  ;;  %v3558_v6 = vadd.f32 %v1343_v35, %v1185_v52  ;;  %v4144_v27 = vmax.f32 %v3555_v8, 0.0  ;;  %v1431_v51 = vld [vmem:[%s4127_s7 + $0x10] sm:$0xff] }
 0x3e1   : > { %v4139_v15 = vmax.f32 %v3536_v34, 0.0  ;;  %v3565_v0 = vadd.f32 %v1341_v29, %v1180_v33  ;;  %v3573_v35 = vadd.f32 %v1345_v54, %v1185_v52 }
 0x3e2   : > { %v4152_v13 = vmax.f32 %v3546_v36, 0.0 }
 0x3e3   : > { %4187 = vst [vmem:[#allocation14_spill] sm:$0xff] %v3565_v0  ;;  %v4147_v20 = vmax.f32 %v3565_v0, 0.0  ;;  %4188 = vst [vmem:[#allocation15_spill] sm:$0xff] %v3573_v35  ;;  %v4149_v19 = vmax.f32 %v3573_v35, 0.0 }
 0x3e4   : > { %1388 = vadd.xlane.f32.xlu1 %v4162_v43  ;;  %1848 = vadd.xlane.f32.xlu0 %v4145_v55 }
 0x3e8   : > { %1390 = vadd.xlane.f32.xlu1 %v4160_v61  ;;  %1864 = vadd.xlane.f32.xlu0 %v4135_v44  ;;  %v4153_v44 = vmax.f32 %v3532_v26, 0.0 }
 0x3ec   : > { %1392 = vadd.xlane.f32.xlu1 %v4161_v5  ;;  %1850 = vadd.xlane.f32.xlu0 %v4143_v63 }
 0x3f0   : > { %1394 = vadd.xlane.f32.xlu1 %v4159_v32  ;;  %1852 = vadd.xlane.f32.xlu0 %v4142_v12 }
 0x3f4   : > { %1404 = vadd.xlane.f32.xlu1 %v4154_v21  ;;  %1854 = vadd.xlane.f32.xlu0 %v4141_v11  ;;  %v1429_v21 = vld [vmem:[%s4127_s7] sm:$0xff] }
 0x3f8   : > { %1406 = vadd.xlane.f32.xlu1 %v4153_v44  ;;  %1856 = vadd.xlane.f32.xlu0 %v4139_v15  ;;  %v4151_v15 = vmax.f32 %v3558_v6, 0.0 }
 0x3fc   : > { %1408 = vadd.xlane.f32.xlu1 %v4152_v13  ;;  %1866 = vadd.xlane.f32.xlu0 %v4140_v41 }
 0x400   : > { %1410 = vadd.xlane.f32.xlu1 %v4151_v15  ;;  %1868 = vadd.xlane.f32.xlu0 %v4144_v27 }
 0x404   : > { %1870 = vadd.xlane.f32.xlu0 %v4147_v20 }
 0x408   : > { %1872 = vadd.xlane.f32.xlu0 %v4149_v19  ;;  %v1430_v19 = vld [vmem:[%s4127_s7 + $0x8] sm:$0xff] }
 0x455   : > { %v1397_v29 = vpop.xlane.xlu1 %1396  ;;  %v1381_v33 = vpop.xlane.xlu0 %1380 }
 0x456   : > { %v1413_v13 = vmul.f32 0.0078125, %v1381_v33 }
 0x458   : > { %v1445_v61 = vmul.f32 %v1429_v21, %v1413_v13 }
 0x459   : > { %v1383_v41 = vpop.xlane.xlu1 %1382  ;;  %v1843_v11 = vpop.xlane.xlu0 %1842 }
 0x45a   : > { %v1414_v7 = vmul.f32 0.0078125, %v1383_v41 }
 0x45c   : > { %v1446_v49 = vmul.f32 %v1430_v19, %v1414_v7  ;;  %v1874_v7 = vmul.f32 0.0078125, %v1843_v11 }
 0x45d   : > { %v1399_v12 = vpop.xlane.xlu1 %1398  ;;  %v3580_v63 = vpop.xlane.xlu0 %1858 }
 0x45e   : > { %v1463_v43 = vsel %vm1461_vm11, %v1446_v49, 0.0 }
 0x461   : > { %v1845_v27 = vpop.xlane.xlu1 %1844  ;;  %v3582_v55 = vpop.xlane.xlu0 %1860 }
 0x462   : > { %v1875_v24 = vmul.f32 0.0078125, %v1845_v27 }
 0x464   : > { %v1907_v8 = vmul.f32 %v1875_v24, %v1430_v19 }
 0x465   : > { %v3584_v54 = vpop.xlane.xlu1 %1400  ;;  %v1385_v52 = vpop.xlane.xlu0 %1384 }
 0x466   : > { %v1415_v44 = vmul.f32 0.0078125, %v1385_v52  ;;  %v1433_v52 = vld [vmem:[%s4127_s7 + $0x20] sm:$0xff]  ;;  %v1923_v24 = vsel %vm1461_vm11, %v1907_v8, 0.0 }
 0x468   : > { %v1447_v5 = vmul.f32 %v1431_v51, %v1415_v44 }
 0x469   : > { %v1387_v22 = vpop.xlane.xlu1 %1386  ;;  %v1847_v20 = vpop.xlane.xlu0 %1846 }
 0x46a   : > { %v1416_v41 = vmul.f32 0.0078125, %v1387_v22  ;;  %v1876_v22 = vmul.f32 0.0078125, %v1847_v20  ;;  %v1465_v44 = vsel %vm1461_vm11, %v1447_v5, 0.0  ;;  %v1906_v20 = vmul.f32 %v1874_v7, %v1429_v21 }
 0x46c   : > { %v1448_v16 = vmul.f32 %v1432_v1, %v1416_v41  ;;  %v1908_v28 = vmul.f32 %v1876_v22, %v1431_v51  ;;  %v1922_v21 = vsel %vm1461_vm11, %v1906_v20, 0.0 }
 0x46d   : > { %v3589_v47 = vpop.xlane.xlu1 %1402  ;;  %v3591_v15 = vpop.xlane.xlu0 %1862 }
 0x46e   : > { %v1467_v49 = vsel %vm1461_vm11, %v1448_v16, 0.0  ;;  %v1437_v16 = vld [vmem:[%s4127_s7 + $0x40] sm:$0xff]  ;;  %v1925_v19 = vsel %vm1461_vm11, %v1908_v28, 0.0  ;;  %v1423_v28 = vmul.f32 0.0078125, %v3584_v54 }
 0x471   : > { %v1389_v46 = vpop.xlane.xlu1 %1388  ;;  %v1849_v32 = vpop.xlane.xlu0 %1848 }
 0x472   : > { %v1417_v33 = vmul.f32 0.0078125, %v1389_v46  ;;  %v1462_v46 = vsel %vm1461_vm11, %v1445_v61, 0.0  ;;  %v1877_v27 = vmul.f32 0.0078125, %v1849_v32 }
 0x473   : > { %v1464_v0 = vadd.f32 %v1463_v43, %v1462_v46 }
 0x474   : > { %v1449_v13 = vmul.f32 %v1433_v52, %v1417_v33 }
 0x475   : > { %v1391_v45 = vpop.xlane.xlu1 %1390  ;;  %v3609_v42 = vpop.xlane.xlu0 %1864  ;;  %v1466_v41 = vadd.f32 %v1465_v44, %v1464_v0  ;;  %v1909_v0 = vmul.f32 %v1877_v27, %v1432_v1 }
 0x476   : > { %v1418_v35 = vmul.f32 0.0078125, %v1391_v45  ;;  %v1469_v61 = vsel %vm1461_vm11, %v1449_v13, 0.0  ;;  %v1421_v45 = vmul.f32 0.0078125, %v1397_v29  ;;  %v1438_v13 = vld [vmem:[%s4127_s7 + $0x48] sm:$0xff] }
 0x477   : > { %v1468_v43 = vadd.f32 %v1467_v49, %v1466_v41  ;;  %v1927_v27 = vsel %vm1461_vm11, %v1909_v0, 0.0  ;;  %v1439_v41 = vld [vmem:[%s4127_s7 + $0x50] sm:$0xff] }
 0x478   : > { %v1450_v11 = vmul.f32 %v1434_v58, %v1418_v35  ;;  %v1422_v35 = vmul.f32 0.0078125, %v1399_v12  ;;  %v1453_v44 = vmul.f32 %v1437_v16, %v1421_v45  ;;  %v1924_v12 = vadd.f32 %v1923_v24, %v1922_v21  ;;  %v1440_v24 = vld [vmem:[%s4127_s7 + $0x58] sm:$0xff] }
 0x479   : > { %v1393_v23 = vpop.xlane.xlu1 %1392  ;;  %v1851_v3 = vpop.xlane.xlu0 %1850  ;;  %v1470_v7 = vadd.f32 %v1469_v61, %v1468_v43  ;;  %v1424_v61 = vmul.f32 0.0078125, %v3589_v47  ;;  %v1455_v47 = vmul.f32 %v1439_v41, %v1423_v28 }
 0x47a   : > { %v1419_v5 = vmul.f32 0.0078125, %v1393_v23  ;;  %v1878_v33 = vmul.f32 0.0078125, %v1851_v3  ;;  %v1471_v51 = vsel %vm1461_vm11, %v1450_v11, 0.0  ;;  %v1436_v3 = vld [vmem:[%s4127_s7 + $0x38] sm:$0xff]  ;;  %v1454_v43 = vmul.f32 %v1438_v13, %v1422_v35 }
 0x47b   : > { %v1472_v49 = vadd.f32 %v1471_v51, %v1470_v7  ;;  %v1477_v51 = vsel %vm1461_vm11, %v1453_v44, 0.0 }
 0x47c   : > { %v1451_v32 = vmul.f32 %v1435_v56, %v1419_v5  ;;  %v1910_v46 = vmul.f32 %v1878_v33, %v1433_v52  ;;  %v1926_v52 = vadd.f32 %v1925_v19, %v1924_v12 }
 0x47d   : > { %v1395_v23 = vpop.xlane.xlu1 %1394  ;;  %v1853_v29 = vpop.xlane.xlu0 %1852 }
 0x47e   : > { %v1473_v22 = vsel %vm1461_vm11, %v1451_v32, 0.0  ;;  %v1420_v8 = vmul.f32 0.0078125, %v1395_v23  ;;  %v1879_v1 = vmul.f32 0.0078125, %v1853_v29  ;;  %v1929_v54 = vsel %vm1461_vm11, %v1910_v46, 0.0  ;;  %v1441_v46 = vld [vmem:[%s4127_s7 + $0x60] sm:$0xff] }
 0x47f   : > { %v1474_v5 = vadd.f32 %v1473_v22, %v1472_v49  ;;  %v1882_v32 = vmul.f32 0.0078125, %v3580_v63  ;;  %v1928_v21 = vadd.f32 %v1927_v27, %v1926_v52  ;;  %v1883_v29 = vmul.f32 0.0078125, %v3582_v55  ;;  %v1442_v55 = vld [vmem:[%s4127_s7 + $0x68] sm:$0xff] }
 0x480   : > { %v1452_v11 = vmul.f32 %v1436_v3, %v1420_v8  ;;  %v1911_v20 = vmul.f32 %v1879_v1, %v1434_v58  ;;  %v1456_v22 = vmul.f32 %v1440_v24, %v1424_v61  ;;  %v1479_v63 = vsel %vm1461_vm11, %v1454_v43, 0.0 }
 0x481   : > { %v1405_v33 = vpop.xlane.xlu1 %1404  ;;  %v1855_v45 = vpop.xlane.xlu0 %1854  ;;  %v1930_v8 = vadd.f32 %v1929_v54, %v1928_v21  ;;  %v1481_v52 = vsel %vm1461_vm11, %v1455_v47, 0.0  ;;  %v1884_v61 = vmul.f32 0.0078125, %v3591_v15 }
 0x482   : > { %v1475_v0 = vsel %vm1461_vm11, %v1452_v11, 0.0  ;;  %v1880_v58 = vmul.f32 0.0078125, %v1855_v45  ;;  %v1931_v7 = vsel %vm1461_vm11, %v1911_v20, 0.0  ;;  %v1425_v23 = vmul.f32 0.0078125, %v1405_v33 }
 0x483   : > { %v1476_v19 = vadd.f32 %v1475_v0, %v1474_v5  ;;  %v1914_v11 = vmul.f32 %v1882_v32, %v1437_v16  ;;  %v1915_v45 = vmul.f32 %v1883_v29, %v1438_v13  ;;  %v1483_v43 = vsel %vm1461_vm11, %v1456_v22, 0.0  ;;  %v1443_v16 = vld [vmem:[%s4127_s7 + $0x70] sm:$0xff] }
 0x484   : > { %v1912_v35 = vmul.f32 %v1880_v58, %v1435_v56  ;;  %v1932_v56 = vadd.f32 %v1931_v7, %v1930_v8  ;;  %v1457_v5 = vmul.f32 %v1441_v46, %v1425_v23  ;;  %v1885_v32 = vmul.f32 0.0078125, %v3609_v42  ;;  %v1444_v42 = vld [vmem:[%s4127_s7 + $0x78] sm:$0xff] }
 0x485   : > { %v1478_v1 = vadd.f32 %v1477_v51, %v1476_v19  ;;  %v1407_v12 = vpop.xlane.xlu1 %1406  ;;  %v1857_v44 = vpop.xlane.xlu0 %1856  ;;  %v1937_v15 = vsel %vm1461_vm11, %v1914_v11, 0.0  ;;  %v1916_v7 = vmul.f32 %v1884_v61, %v1439_v41  ;;  %v1939_v22 = vsel %vm1461_vm11, %v1915_v45, 0.0 }
 0x486   : > { %v1933_v49 = vsel %vm1461_vm11, %v1912_v35, 0.0  ;;  %v1426_v28 = vmul.f32 0.0078125, %v1407_v12  ;;  %v1881_v27 = vmul.f32 0.0078125, %v1857_v44  ;;  %v1485_v23 = vsel %vm1461_vm11, %v1457_v5, 0.0 }
 0x487   : > { %v1480_v20 = vadd.f32 %v1479_v63, %v1478_v1  ;;  %v1934_v0 = vadd.f32 %v1933_v49, %v1932_v56  ;;  %v1917_v63 = vmul.f32 %v1885_v32, %v1440_v24 }
 0x488   : > { %v1913_v33 = vmul.f32 %v1881_v27, %v1436_v3  ;;  %v1458_v21 = vmul.f32 %v1442_v55, %v1426_v28 }
 0x489   : > { %v1482_v54 = vadd.f32 %v1481_v52, %v1480_v20  ;;  %v1409_v58 = vpop.xlane.xlu1 %1408  ;;  %v1867_v51 = vpop.xlane.xlu0 %1866  ;;  %v1941_v20 = vsel %vm1461_vm11, %v1916_v7, 0.0 }
 0x48a   : > { %v1935_v19 = vsel %vm1461_vm11, %v1913_v33, 0.0  ;;  %v1427_v47 = vmul.f32 0.0078125, %v1409_v58  ;;  %v1886_v29 = vmul.f32 0.0078125, %v1867_v51  ;;  %v1487_v49 = vsel %vm1461_vm11, %v1458_v21, 0.0 }
 0x48b   : > { %v1484_v3 = vadd.f32 %v1483_v43, %v1482_v54  ;;  %v1936_v13 = vadd.f32 %v1935_v19, %v1934_v0  ;;  %v1943_v43 = vsel %vm1461_vm11, %v1917_v63, 0.0  ;;  %v1499_v63 = vld [vmem:[%s4128_s8] sm:$0x1] }
 0x48c   : > { %v1459_v35 = vmul.f32 %v1443_v16, %v1427_v47  ;;  %v1918_v52 = vmul.f32 %v1886_v29, %v1441_v46 }
 0x48d   : > { %v1486_v8 = vadd.f32 %v1485_v23, %v1484_v3  ;;  %v1938_v1 = vadd.f32 %v1937_v15, %v1936_v13  ;;  %v1411_v12 = vpop.xlane.xlu1 %1410  ;;  %v1869_v44 = vpop.xlane.xlu0 %1868 }
 0x48e   : > { %v1428_v28 = vmul.f32 0.0078125, %v1411_v12  ;;  %v1887_v27 = vmul.f32 0.0078125, %v1869_v44  ;;  %v1489_v56 = vsel %vm1461_vm11, %v1459_v35, 0.0  ;;  %v1945_v32 = vsel %vm1461_vm11, %v1918_v52, 0.0 }
 0x48f   : > { %v1488_v41 = vadd.f32 %v1487_v49, %v1486_v8  ;;  %v1940_v11 = vadd.f32 %v1939_v22, %v1938_v1  ;;  %v4189_v12 = vlaneseq }
 0x490   : > { %v1460_v61 = vmul.f32 %v1444_v42, %v1428_v28  ;;  %v1919_v24 = vmul.f32 %v1887_v27, %v1442_v55 }
 0x491   : > { %v1490_v5 = vadd.f32 %v1489_v56, %v1488_v41  ;;  %v1942_v33 = vadd.f32 %v1941_v20, %v1940_v11  ;;  %v1871_v45 = vpop.xlane.xlu0 %1870  ;;  %v3679_v44 = vshrl.u32 %v4189_v12, 7  ;;  %v3688_v20 = vld [vmem:[%s4129_s9 + $0x8] sm:$0xff]  ;;  %v3693_v56 = vld [vmem:[%s4129_s9] sm:$0xff] }
 0x492   : > { %v1491_v54 = vsel %vm1461_vm11, %v1460_v61, 0.0  ;;  %v1888_v0 = vmul.f32 0.0078125, %v1871_v45  ;;  %v1947_v46 = vsel %vm1461_vm11, %v1919_v24, 0.0  ;;  %v3702_v61 = vld [vmem:[%s4129_s9 + $0x18] sm:$0xff]  ;;  %v1959_v12 = vld [vmem:[%s4128_s8] sm:$0x1] }
 0x493   : > { %v1944_v58 = vadd.f32 %v1943_v43, %v1942_v33  ;;  %v1492_v51 = vadd.f32 %v1491_v54, %v1490_v5  ;;  %v1520_v27 = vsub.s32 0, %v3679_v44  ;;  %v3707_v5 = vld [vmem:[%s4129_s9 + $0x10] sm:$0xff] }
 0x494   : > { %v1920_v21 = vmul.f32 %v1888_v0, %v1443_v16 }
 0x495   : > { %v1946_v19 = vadd.f32 %v1945_v32, %v1944_v58  ;;  %v1493_v47 = vrot.slane %v1492_v51, 4  ;;  %v1873_v15 = vpop.xlane.xlu0 %1872  ;;  %v3727_v32 = vld [vmem:[%s4129_s9 + $0x20] sm:$0xff] }
 0x496   : > { %v1889_v3 = vmul.f32 0.0078125, %v1873_v15  ;;  %v1949_v23 = vsel %vm1461_vm11, %v1920_v21, 0.0 }
 0x497   : > { %v1494_v13 = vadd.f32 %v1493_v47, %v1492_v51  ;;  %v1948_v7 = vadd.f32 %v1947_v46, %v1946_v19  ;;  %v3722_v51 = vld [vmem:[%s4129_s9 + $0x28] sm:$0xff] }
 0x498   : > { %v1921_v35 = vmul.f32 %v1889_v3, %v1444_v42  ;;  %v3738_v3 = vld [vmem:[%s4129_s9 + $0x38] sm:$0xff] }
 0x499   : > { %v1495_v29 = vrot.slane %v1494_v13, 2  ;;  %v1950_v22 = vadd.f32 %v1949_v23, %v1948_v7 }
 0x49a   : > { %v1951_v55 = vsel %vm1461_vm11, %v1921_v35, 0.0 }
 0x49b   : > { %v1496_v8 = vadd.f32 %v1495_v29, %v1494_v13  ;;  %v1952_v1 = vadd.f32 %v1951_v55, %v1950_v22  ;;  %v3743_v13 = vld [vmem:[%s4129_s9 + $0x30] sm:$0xff]  ;;  %v3754_v55 = vld [vmem:[%s4129_s9 + $0x48] sm:$0xff] }
 0x49d   : > { %v1497_v16 = vrot.slane %v1496_v8, 1  ;;  %v1953_v28 = vrot.slane %v1952_v1, 4 }
 0x49f   : > { %v1498_v49 = vadd.f32 %v1497_v16, %v1496_v8  ;;  %v1954_v11 = vadd.f32 %v1953_v28, %v1952_v1  ;;  %v1510_v8 = vld [vmem:[%s4129_s9 + $0x40] sm:$0xff] }
 0x4a1   : > { %v1500_v41 = vadd.f32 %v1499_v63, %v1498_v49  ;;  %v1955_v43 = vrot.slane %v1954_v11, 2 }
 0x4a3   : > { %v1501_v42 = vmax.f32 %v1500_v41, 0.0  ;;  %v1956_v21 = vadd.f32 %v1955_v43, %v1954_v11  ;;  %v1513_v41 = vld [vmem:[%s4129_s9 + $0x58] sm:$0xff] }
 0x4a5   : > { %v3697_v52 = vrot.slane %v1501_v42, %v1520_v27  ;;  %v1957_v7 = vrot.slane %v1956_v21, 1  ;;  %v1512_v42 = vld [vmem:[%s4129_s9 + $0x50] sm:$0xff] }
 0x4a7   : > { %v1523_v33 = vmul.f32 %v3697_v52, %v3688_v20  ;;  %v1522_v45 = vmul.f32 %v3697_v52, %v3693_v56  ;;  %v1525_v0 = vmul.f32 %v3697_v52, %v3702_v61  ;;  %v1524_v58 = vmul.f32 %v3697_v52, %v3707_v5 }
 0x4a8   : > { %v1527_v15 = vmul.f32 %v3697_v52, %v3722_v51  ;;  %v1526_v46 = vmul.f32 %v3697_v52, %v3727_v32  ;;  %v1529_v29 = vmul.f32 %v3697_v52, %v3738_v3  ;;  %v1528_v22 = vmul.f32 %v3697_v52, %v3743_v13 }
 0x4a9   : > { %v1541_v54 = vsel %vm1461_vm11, %v1523_v33, 0.0  ;;  %v1538_v24 = vsel %vm1461_vm11, %v1522_v45, 0.0  ;;  %v1547_v19 = vsel %vm1461_vm11, %v1525_v0, 0.0  ;;  %v1544_v47 = vsel %vm1461_vm11, %v1524_v58, 0.0  ;;  %v1514_v0 = vld [vmem:[%s4129_s9 + $0x60] sm:$0xff] }
 0x4aa   : > { %1542 = vadd.xlane.f32.xlu0 %v1541_v54  ;;  %1539 = vadd.xlane.f32.xlu1 %v1538_v24  ;;  %v1553_v23 = vsel %vm1461_vm11, %v1527_v15, 0.0  ;;  %v1550_v35 = vsel %vm1461_vm11, %v1526_v46, 0.0  ;;  %v1958_v1 = vadd.f32 %v1957_v7, %v1956_v21  ;;  %v1559_v16 = vsel %vm1461_vm11, %v1529_v29, 0.0  ;;  %v1515_v24 = vld [vmem:[%s4129_s9 + $0x68] sm:$0xff]  ;;  %v1517_v46 = vld [vmem:[%s4129_s9 + $0x78] sm:$0xff]  ;;  %v1516_v7 = vld [vmem:[%s4129_s9 + $0x70] sm:$0xff] }
 0x4ab   : > { %v1556_v63 = vsel %vm1461_vm11, %v1528_v22, 0.0  ;;  %v1531_v49 = vmul.f32 %v3697_v52, %v3754_v55  ;;  %v1530_v28 = vmul.f32 %v3697_v52, %v1510_v8  ;;  %v1533_v43 = vmul.f32 %v3697_v52, %v1513_v41 }
 0x4ac   : > { %v1960_v11 = vadd.f32 %v1959_v12, %v1958_v1  ;;  %v1532_v54 = vmul.f32 %v3697_v52, %v1512_v42  ;;  %v1534_v15 = vmul.f32 %v3697_v52, %v1514_v0  ;;  %v1537_v22 = vmul.f32 %v3697_v52, %v1517_v46 }
 0x4ad   : > { %v1565_v33 = vsel %vm1461_vm11, %v1531_v49, 0.0  ;;  %v1562_v45 = vsel %vm1461_vm11, %v1530_v28, 0.0  ;;  %v1571_v21 = vsel %vm1461_vm11, %v1533_v43, 0.0  ;;  %v1536_v1 = vmul.f32 %v3697_v52, %v1516_v7 }
 0x4ae   : > { %1548 = vadd.xlane.f32.xlu0 %v1547_v19  ;;  %1545 = vadd.xlane.f32.xlu1 %v1544_v47  ;;  %v1961_v58 = vmax.f32 %v1960_v11, 0.0  ;;  %v1568_v19 = vsel %vm1461_vm11, %v1532_v54, 0.0  ;;  %v1535_v47 = vmul.f32 %v3697_v52, %v1515_v24  ;;  %v1574_v29 = vsel %vm1461_vm11, %v1534_v15, 0.0 }
 0x4af   : > { %v1583_v12 = vsel %vm1461_vm11, %v1537_v22, 0.0 }
 0x4b2   : > { %1554 = vadd.xlane.f32.xlu0 %v1553_v23  ;;  %1551 = vadd.xlane.f32.xlu1 %v1550_v35  ;;  %v1981_v23 = vrot.slane %v1961_v58, %v1520_v27  ;;  %v1577_v35 = vsel %vm1461_vm11, %v1535_v47, 0.0 }
 0x4b4   : > { %v1982_v49 = vmul.f32 %v1981_v23, %v3693_v56  ;;  %v1984_v28 = vmul.f32 %v1981_v23, %v3707_v5  ;;  %v1985_v52 = vmul.f32 %v1981_v23, %v3702_v61  ;;  %v1987_v56 = vmul.f32 %v1981_v23, %v3722_v51 }
 0x4b5   : > { %v1988_v5 = vmul.f32 %v1981_v23, %v3743_v13  ;;  %v1989_v61 = vmul.f32 %v1981_v23, %v3738_v3  ;;  %v1992_v47 = vmul.f32 %v1981_v23, %v1512_v42  ;;  %v1993_v15 = vmul.f32 %v1981_v23, %v1513_v41 }
 0x4b6   : > { %1560 = vadd.xlane.f32.xlu0 %v1559_v16  ;;  %1557 = vadd.xlane.f32.xlu1 %v1556_v63  ;;  %v1580_v16 = vsel %vm1461_vm11, %v1536_v1, 0.0  ;;  %v1983_v63 = vmul.f32 %v1981_v23, %v3688_v20  ;;  %v1998_v27 = vsel %vm1461_vm11, %v1982_v49, 0.0  ;;  %v2004_v11 = vsel %vm1461_vm11, %v1984_v28, 0.0 }
 0x4b7   : > { %v1986_v20 = vmul.f32 %v1981_v23, %v3727_v32  ;;  %v2013_v43 = vsel %vm1461_vm11, %v1987_v56, 0.0  ;;  %v2016_v54 = vsel %vm1461_vm11, %v1988_v5, 0.0  ;;  %v2019_v58 = vsel %vm1461_vm11, %v1989_v61, 0.0  ;;  %v3853_v56 = vld [vmem:[%s4130_s10 + $0x20] sm:$0xff] }
 0x4b8   : > { %v2001_v44 = vsel %vm1461_vm11, %v1983_v63, 0.0  ;;  %v1991_v32 = vmul.f32 %v1981_v23, %v3754_v55  ;;  %v2028_v3 = vsel %vm1461_vm11, %v1992_v47, 0.0  ;;  %v2031_v13 = vsel %vm1461_vm11, %v1993_v15, 0.0  ;;  %v3846_v63 = vld [vmem:[%s4130_s10 + $0x18] sm:$0xff] }
 0x4b9   : > { %v1996_v22 = vmul.f32 %v1981_v23, %v1516_v7  ;;  %v1997_v1 = vmul.f32 %v1981_v23, %v1517_v46  ;;  %v3870_v47 = vld [vmem:[%s4130_s10 + $0x38] sm:$0xff] }
 0x4ba   : > { %1566 = vadd.xlane.f32.xlu0 %v1565_v33  ;;  %1563 = vadd.xlane.f32.xlu1 %v1562_v45  ;;  %v2007_v33 = vsel %vm1461_vm11, %v1985_v52, 0.0  ;;  %v2010_v45 = vsel %vm1461_vm11, %v1986_v20, 0.0 }
 0x4bb   : > { %v2040_v41 = vsel %vm1461_vm11, %v1996_v22, 0.0  ;;  %v2043_v42 = vsel %vm1461_vm11, %v1997_v1, 0.0  ;;  %v3877_v1 = vld [vmem:[%s4130_s10 + $0x40] sm:$0xff] }
 0x4be   : > { %1572 = vadd.xlane.f32.xlu0 %v1571_v21  ;;  %1569 = vadd.xlane.f32.xlu1 %v1568_v19  ;;  %v1990_v21 = vmul.f32 %v1981_v23, %v1510_v8  ;;  %v2025_v19 = vsel %vm1461_vm11, %v1991_v32, 0.0 }
 0x4c0   : > { %v2022_v51 = vsel %vm1461_vm11, %v1990_v21, 0.0 }
 0x4c2   : > { %1578 = vadd.xlane.f32.xlu0 %v1577_v35  ;;  %1575 = vadd.xlane.f32.xlu1 %v1574_v29  ;;  %v1994_v35 = vmul.f32 %v1981_v23, %v1514_v0  ;;  %v1995_v29 = vmul.f32 %v1981_v23, %v1515_v24  ;;  %v3829_v24 = vld [vmem:[%s4130_s10] sm:$0xff]  ;;  %v3834_v0 = vld [vmem:[%s4130_s10 + $0x8] sm:$0xff] }
 0x4c4   : > { %v2034_v55 = vsel %vm1461_vm11, %v1994_v35, 0.0  ;;  %v2037_v8 = vsel %vm1461_vm11, %v1995_v29, 0.0 }
 0x4c6   : > { %1584 = vadd.xlane.f32.xlu0 %v1583_v12  ;;  %1581 = vadd.xlane.f32.xlu1 %v1580_v16  ;;  %v3841_v16 = vld [vmem:[%s4130_s10 + $0x10] sm:$0xff] }
 0x4ca   : > { %2002 = vadd.xlane.f32.xlu0 %v2001_v44  ;;  %1999 = vadd.xlane.f32.xlu1 %v1998_v27 }
 0x4ce   : > { %2005 = vadd.xlane.f32.xlu0 %v2004_v11  ;;  %2008 = vadd.xlane.f32.xlu1 %v2007_v33 }
 0x4d2   : > { %2011 = vadd.xlane.f32.xlu0 %v2010_v45  ;;  %2014 = vadd.xlane.f32.xlu1 %v2013_v43  ;;  %v3858_v45 = vld [vmem:[%s4130_s10 + $0x28] sm:$0xff] }
 0x4d6   : > { %2017 = vadd.xlane.f32.xlu0 %v2016_v54  ;;  %2020 = vadd.xlane.f32.xlu1 %v2019_v58 }
 0x4da   : > { %2023 = vadd.xlane.f32.xlu0 %v2022_v51  ;;  %2026 = vadd.xlane.f32.xlu1 %v2025_v19  ;;  %v3865_v19 = vld [vmem:[%s4130_s10 + $0x30] sm:$0xff] }
 0x4de   : > { %2029 = vadd.xlane.f32.xlu0 %v2028_v3  ;;  %2032 = vadd.xlane.f32.xlu1 %v2031_v13 }
 0x4e2   : > { %2035 = vadd.xlane.f32.xlu0 %v2034_v55  ;;  %2038 = vadd.xlane.f32.xlu1 %v2037_v8 }
 0x4e6   : > { %2041 = vadd.xlane.f32.xlu0 %v2040_v41  ;;  %2044 = vadd.xlane.f32.xlu1 %v2043_v42  ;;  %v3882_v41 = vld [vmem:[%s4130_s10 + $0x48] sm:$0xff] }
 0x537   : > { %v1540_v7 = vpop.xlane.xlu1 %1539  ;;  %v1543_v46 = vpop.xlane.xlu0 %1542 }
 0x538   : > { %v1602_v23 = vadd.f32 %v3829_v24, %v1540_v7  ;;  %v1603_v12 = vadd.f32 %v3834_v0, %v1543_v46 }
 0x53a   : > { %v1618_v49 = vsub.f32 0.0, %v1602_v23  ;;  %v1619_v44 = vsub.f32 0.0, %v1603_v12 }
 0x53b   : > { %v1546_v27 = vpop.xlane.xlu1 %1545  ;;  %v1549_v28 = vpop.xlane.xlu0 %1548 }
 0x53c   : > { %v1634_v52 = vmul.f32 1.442695, %v1618_v49  ;;  %v1636_v11 = vmul.f32 1.442695, %v1619_v44  ;;  %v1604_v33 = vadd.f32 %v3841_v16, %v1546_v27  ;;  %v1605_v20 = vadd.f32 %v3846_v63, %v1549_v28 }
 0x53e   : > { %2615 = vpow2.f32 %v1634_v52  ;;  %v1620_v43 = vsub.f32 0.0, %v1604_v33  ;;  %v1621_v5 = vsub.f32 0.0, %v1605_v20  ;;  %v3889_v33 = vld [vmem:[%s4130_s10 + $0x50] sm:$0xff] }
 0x53f   : > { %2617 = vpow2.f32 %v1636_v11  ;;  %v1552_v61 = vpop.xlane.xlu1 %1551  ;;  %v1555_v54 = vpop.xlane.xlu0 %1554 }
 0x540   : > { %v1638_v58 = vmul.f32 1.442695, %v1620_v43  ;;  %v1640_v21 = vmul.f32 1.442695, %v1621_v5  ;;  %v1606_v32 = vadd.f32 %v3853_v56, %v1552_v61  ;;  %v1607_v51 = vadd.f32 %v3858_v45, %v1555_v54  ;;  %v3894_v61 = vld [vmem:[%s4130_s10 + $0x58] sm:$0xff] }
 0x542   : > { %2619 = vpow2.f32 %v1638_v58  ;;  %v1622_v15 = vsub.f32 0.0, %v1606_v32  ;;  %v1623_v3 = vsub.f32 0.0, %v1607_v51 }
 0x543   : > { %2621 = vpow2.f32 %v1640_v21  ;;  %v1558_v13 = vpop.xlane.xlu1 %1557  ;;  %v1561_v35 = vpop.xlane.xlu0 %1560 }
 0x544   : > { %v1642_v29 = vmul.f32 1.442695, %v1622_v15  ;;  %v1644_v55 = vmul.f32 1.442695, %v1623_v3  ;;  %v1608_v8 = vadd.f32 %v3865_v19, %v1558_v13  ;;  %v1609_v22 = vadd.f32 %v3870_v47, %v1561_v35 }
 0x546   : > { %2623 = vpow2.f32 %v1642_v29  ;;  %v1624_v42 = vsub.f32 0.0, %v1608_v8  ;;  %v1625_v7 = vsub.f32 0.0, %v1609_v22  ;;  %v3901_v29 = vld [vmem:[%s4130_s10 + $0x60] sm:$0xff] }
 0x547   : > { %2625 = vpow2.f32 %v1644_v55  ;;  %v1564_v46 = vpop.xlane.xlu1 %1563  ;;  %v1567_v23 = vpop.xlane.xlu0 %1566  ;;  %v3906_v55 = vld [vmem:[%s4130_s10 + $0x68] sm:$0xff] }
 0x548   : > { %v2616_v12 = vpop.eup %2615  ;;  %v1646_v49 = vmul.f32 1.442695, %v1624_v42  ;;  %v1610_v44 = vadd.f32 %v3877_v1, %v1564_v46  ;;  %v1611_v27 = vadd.f32 %v3882_v41, %v1567_v23  ;;  %v1648_v11 = vmul.f32 1.442695, %v1625_v7 }
 0x549   : > { %v2618_v28 = vpop.eup %2617  ;;  %v1666_v52 = vadd.f32 1.0, %v2616_v12 }
 0x54a   : > { %v1667_v20 = vadd.f32 1.0, %v2618_v28  ;;  %2627 = vpow2.f32 %v1646_v49  ;;  %v1626_v43 = vsub.f32 0.0, %v1610_v44  ;;  %v1627_v5 = vsub.f32 0.0, %v1611_v27 }
 0x54b   : > { %2629 = vrcp.f32 %v1666_v52  ;;  %v1570_v54 = vpop.xlane.xlu1 %1569  ;;  %v1573_v58 = vpop.xlane.xlu0 %1572 }
 0x54c   : > { %v2620_v21 = vpop.eup %2619  ;;  %2631 = vrcp.f32 %v1667_v20  ;;  %v1650_v32 = vmul.f32 1.442695, %v1626_v43  ;;  %v1612_v51 = vadd.f32 %v3889_v33, %v1570_v54  ;;  %v1652_v13 = vmul.f32 1.442695, %v1627_v5  ;;  %v3918_v54 = vld [vmem:[%s4130_s10 + $0x78] sm:$0xff] }
 0x54d   : > { %v2622_v15 = vpop.eup %2621  ;;  %v1668_v3 = vadd.f32 1.0, %v2620_v21  ;;  %2633 = vpow2.f32 %v1648_v11  ;;  %v1613_v35 = vadd.f32 %v3894_v61, %v1573_v58  ;;  %v3913_v11 = vld [vmem:[%s4130_s10 + $0x70] sm:$0xff] }
 0x54e   : > { %v1669_v8 = vadd.f32 1.0, %v2622_v15  ;;  %2635 = vpow2.f32 %v1650_v32  ;;  %v1628_v22 = vsub.f32 0.0, %v1612_v51 }
 0x54f   : > { %2637 = vrcp.f32 %v1668_v3  ;;  %v1629_v42 = vsub.f32 0.0, %v1613_v35  ;;  %v1576_v7 = vpop.xlane.xlu1 %1575  ;;  %v1579_v46 = vpop.xlane.xlu0 %1578 }
 0x550   : > { %v2624_v23 = vpop.eup %2623  ;;  %2639 = vrcp.f32 %v1669_v8  ;;  %v1654_v12 = vmul.f32 1.442695, %v1628_v22  ;;  %v1614_v49 = vadd.f32 %v3901_v29, %v1576_v7  ;;  %v1615_v44 = vadd.f32 %v3906_v55, %v1579_v46 }
 0x551   : > { %v2626_v27 = vpop.eup %2625  ;;  %v1670_v28 = vadd.f32 1.0, %v2624_v23  ;;  %2641 = vpow2.f32 %v1652_v13  ;;  %v1656_v52 = vmul.f32 1.442695, %v1629_v42 }
 0x552   : > { %v1671_v20 = vadd.f32 1.0, %v2626_v27  ;;  %2643 = vpow2.f32 %v1654_v12  ;;  %v1630_v43 = vsub.f32 0.0, %v1614_v49  ;;  %v1631_v5 = vsub.f32 0.0, %v1615_v44 }
 0x553   : > { %2645 = vrcp.f32 %v1670_v28  ;;  %v1582_v58 = vpop.xlane.xlu1 %1581  ;;  %v1585_v21 = vpop.xlane.xlu0 %1584 }
 0x554   : > { %v2628_v32 = vpop.eup %2627  ;;  %2647 = vrcp.f32 %v1671_v20  ;;  %v1658_v51 = vmul.f32 1.442695, %v1630_v43  ;;  %v1660_v15 = vmul.f32 1.442695, %v1631_v5  ;;  %v1616_v3 = vadd.f32 %v3913_v11, %v1582_v58 }
 0x555   : > { %v2630_v13 = vpop.eup %2629  ;;  %v1672_v35 = vadd.f32 1.0, %v2628_v32  ;;  %2649 = vpow2.f32 %v1656_v52  ;;  %v1617_v8 = vadd.f32 %v3918_v54, %v1585_v21 }
 0x556   : > { %v2632_v22 = vpop.eup %2631  ;;  %2651 = vpow2.f32 %v1658_v51  ;;  %v1632_v42 = vsub.f32 0.0, %v1616_v3  ;;  %1700 = vperm.xlu1 %2606, %v2630_v13  }
 0x557   : > { %v2634_v7 = vpop.eup %2633  ;;  %2653 = vrcp.f32 %v1672_v35  ;;  %v1633_v46 = vsub.f32 0.0, %v1617_v8  ;;  %1705 = vperm.xlu0 %2605, %v2632_v22   ;;  %v2000_v23 = vpop.xlane.xlu1 %1999 }
 0x558   : > { %v2003_v12 = vpop.xlane.xlu0 %2002  ;;  %v2636_v49 = vpop.eup %2635  ;;  %v1673_v44 = vadd.f32 1.0, %v2634_v7  ;;  %2655 = vpow2.f32 %v1660_v15  ;;  %v1662_v27 = vmul.f32 1.442695, %v1632_v42  ;;  %v2062_v28 = vadd.f32 %v2000_v23, %v3829_v24 }
 0x559   : > { %v2638_v20 = vpop.eup %2637  ;;  %v1674_v52 = vadd.f32 1.0, %v2636_v49  ;;  %v1664_v43 = vmul.f32 1.442695, %v1633_v46  ;;  %v2063_v5 = vadd.f32 %v2003_v12, %v3834_v0 }
 0x55a   : > { %v2640_v58 = vpop.eup %2639  ;;  %2657 = vrcp.f32 %v1673_v44  ;;  %v2078_v21 = vsub.f32 0.0, %v2062_v28  ;;  %1710 = vperm.xlu1 %2606, %v2638_v20  }
 0x55b   : > { %v2642_v32 = vpop.eup %2641  ;;  %2659 = vrcp.f32 %v1674_v52  ;;  %v2079_v51 = vsub.f32 0.0, %v2063_v5  ;;  %v2009_v3 = vpop.xlane.xlu1 %2008 }
 0x55c   : > { %v2006_v13 = vpop.xlane.xlu0 %2005  ;;  %v2644_v35 = vpop.eup %2643  ;;  %v1675_v8 = vadd.f32 1.0, %v2642_v32  ;;  %2661 = vpow2.f32 %v1662_v27  ;;  %v2094_v15 = vmul.f32 1.442695, %v2078_v21  ;;  %v2065_v24 = vadd.f32 %v2009_v3, %v3846_v63 }
 0x55d   : > { %v2646_v22 = vpop.eup %2645  ;;  %v1676_v42 = vadd.f32 1.0, %v2644_v35  ;;  %2663 = vpow2.f32 %v1664_v43  ;;  %v2096_v7 = vmul.f32 1.442695, %v2079_v51  ;;  %v2064_v0 = vadd.f32 %v2006_v13, %v3841_v16 }
 0x55e   : > { %v2648_v46 = vpop.eup %2647  ;;  %2665 = vrcp.f32 %v1675_v8  ;;  %v2081_v23 = vsub.f32 0.0, %v2065_v24  ;;  %1720 = vperm.xlu0 %2605, %v2646_v22   ;;  %1715 = vperm.xlu1 %2606, %v2640_v58  }
 0x55f   : > { %v2650_v12 = vpop.eup %2649  ;;  %2667 = vrcp.f32 %v1676_v42  ;;  %v2080_v49 = vsub.f32 0.0, %v2064_v0  ;;  %v2015_v44 = vpop.xlane.xlu1 %2014 }
 0x560   : > { %v2012_v28 = vpop.xlane.xlu0 %2011  ;;  %v2652_v27 = vpop.eup %2651  ;;  %v1677_v20 = vadd.f32 1.0, %v2650_v12  ;;  %2669 = vpow2.f32 %v2094_v15  ;;  %v2100_v63 = vmul.f32 1.442695, %v2081_v23  ;;  %v2067_v52 = vadd.f32 %v2015_v44, %v3858_v45 }
 0x561   : > { %v2654_v43 = vpop.eup %2653  ;;  %v1678_v5 = vadd.f32 1.0, %v2652_v27  ;;  %2671 = vpow2.f32 %v2096_v7  ;;  %v2066_v16 = vadd.f32 %v2012_v28, %v3853_v56  ;;  %v2098_v32 = vmul.f32 1.442695, %v2080_v49 }
 0x562   : > { %v2656_v21 = vpop.eup %2655  ;;  %2673 = vrcp.f32 %v1677_v20  ;;  %v2083_v58 = vsub.f32 0.0, %v2067_v52  ;;  %1730 = vperm.xlu1 %2606, %v2654_v43   ;;  %1725 = vperm.xlu0 %2605, %v2648_v46  }
 0x563   : > { %2675 = vrcp.f32 %v1678_v5  ;;  %v1679_v51 = vadd.f32 1.0, %v2656_v21  ;;  %v2082_v3 = vsub.f32 0.0, %v2066_v16  ;;  %v2021_v13 = vpop.xlane.xlu1 %2020 }
 0x564   : > { %v2018_v35 = vpop.xlane.xlu0 %2017  ;;  %v2658_v8 = vpop.eup %2657  ;;  %2677 = vpow2.f32 %v2100_v63  ;;  %v2104_v15 = vmul.f32 1.442695, %v2083_v58  ;;  %v2069_v45 = vadd.f32 %v2021_v13, %v3870_v47 }
 0x565   : > { %v2068_v24 = vadd.f32 %v2018_v35, %v3865_v19  ;;  %v2660_v22 = vpop.eup %2659  ;;  %2679 = vrcp.f32 %v1679_v51  ;;  %v2102_v56 = vmul.f32 1.442695, %v2082_v3 }
 0x566   : > { %v2662_v42 = vpop.eup %2661  ;;  %2681 = vpow2.f32 %v2098_v32  ;;  %v2085_v7 = vsub.f32 0.0, %v2069_v45  ;;  %1740 = vperm.xlu0 %2605, %v2660_v22   ;;  %1735 = vperm.xlu1 %2606, %v2658_v8  }
 0x567   : > { %v2084_v0 = vsub.f32 0.0, %v2068_v24  ;;  %v2664_v46 = vpop.eup %2663  ;;  %v1680_v23 = vadd.f32 1.0, %v2662_v42  ;;  %2683 = vpow2.f32 %v2104_v15  ;;  %v2027_v12 = vpop.xlane.xlu1 %2026 }
 0x568   : > { %v2024_v49 = vpop.xlane.xlu0 %2023  ;;  %v2666_v44 = vpop.eup %2665  ;;  %v1681_v28 = vadd.f32 1.0, %v2664_v46  ;;  %2685 = vpow2.f32 %v2102_v56  ;;  %v2108_v47 = vmul.f32 1.442695, %v2085_v7  ;;  %v2071_v20 = vadd.f32 %v2027_v12, %v3882_v41 }
 0x569   : > { %v2106_v27 = vmul.f32 1.442695, %v2084_v0  ;;  %v2668_v19 = vpop.eup %2667  ;;  %2687 = vrcp.f32 %v1680_v23  ;;  %v2070_v63 = vadd.f32 %v2024_v49, %v3877_v1 }
 0x56a   : > { %v2670_v52 = vpop.eup %2669  ;;  %2689 = vrcp.f32 %v1681_v28  ;;  %1750 = vperm.xlu0 %2605, %v2668_v19   ;;  %1745 = vperm.xlu1 %2606, %v2666_v44   ;;  %v2087_v16 = vsub.f32 0.0, %v2071_v20 }
 0x56b   : > { %v2672_v43 = vpop.eup %2671  ;;  %v2126_v5 = vadd.f32 1.0, %v2670_v52  ;;  %2691 = vpow2.f32 %v2108_v47  ;;  %v2086_v21 = vsub.f32 0.0, %v2070_v63  ;;  %v2033_v32 = vpop.xlane.xlu1 %2032 }
 0x56c   : > { %v2030_v58 = vpop.xlane.xlu0 %2029  ;;  %v2674_v51 = vpop.eup %2673  ;;  %v2127_v3 = vadd.f32 1.0, %v2672_v43  ;;  %2693 = vpow2.f32 %v2106_v27  ;;  %v2073_v13 = vadd.f32 %v2033_v32, %v3894_v61  ;;  %v2112_v1 = vmul.f32 1.442695, %v2087_v16 }
 0x56d   : > { %v2072_v41 = vadd.f32 %v2030_v58, %v3889_v33  ;;  %v2676_v35 = vpop.eup %2675  ;;  %2695 = vrcp.f32 %v2126_v5  ;;  %v2110_v8 = vmul.f32 1.442695, %v2086_v21 }
 0x56e   : > { %v2678_v15 = vpop.eup %2677  ;;  %2697 = vrcp.f32 %v2127_v3  ;;  %v2089_v45 = vsub.f32 0.0, %v2073_v13  ;;  %1760 = vperm.xlu0 %2605, %v2676_v35   ;;  %1755 = vperm.xlu1 %2606, %v2674_v51  }
 0x56f   : > { %v2088_v24 = vsub.f32 0.0, %v2072_v41  ;;  %v2680_v22 = vpop.eup %2679  ;;  %v2129_v56 = vadd.f32 1.0, %v2678_v15  ;;  %2699 = vpow2.f32 %v2112_v1  ;;  %v2039_v42 = vpop.xlane.xlu1 %2038 }
 0x570   : > { %v2036_v7 = vpop.xlane.xlu0 %2035  ;;  %v2682_v0 = vpop.eup %2681  ;;  %2701 = vpow2.f32 %v2110_v8  ;;  %v2116_v61 = vmul.f32 1.442695, %v2089_v45  ;;  %v2075_v33 = vadd.f32 %v2039_v42, %v3906_v55 }
 0x571   : > { %v2684_v46 = vpop.eup %2683  ;;  %2703 = vrcp.f32 %v2129_v56  ;;  %v2128_v23 = vadd.f32 1.0, %v2682_v0  ;;  %v2074_v12 = vadd.f32 %v2036_v7, %v3901_v29  ;;  %v2114_v28 = vmul.f32 1.442695, %v2088_v24 }
 0x572   : > { %v2686_v49 = vpop.eup %2685  ;;  %v2131_v44 = vadd.f32 1.0, %v2684_v46  ;;  %2705 = vpow2.f32 %v2116_v61  ;;  %v2091_v47 = vsub.f32 0.0, %v2075_v33  ;;  %1765 = vperm.xlu1 %2606, %v2680_v22  }
 0x573   : > { %v2688_v27 = vpop.eup %2687  ;;  %2707 = vrcp.f32 %v2128_v23  ;;  %v2130_v19 = vadd.f32 1.0, %v2686_v49  ;;  %v2090_v20 = vsub.f32 0.0, %v2074_v12  ;;  %v2045_v63 = vpop.xlane.xlu1 %2044 }
 0x574   : > { %v2042_v52 = vpop.xlane.xlu0 %2041  ;;  %v2690_v43 = vpop.eup %2689  ;;  %2709 = vrcp.f32 %v2131_v44  ;;  %v2120_v55 = vmul.f32 1.442695, %v2091_v47  ;;  %1770 = vperm.xlu0 %2605, %v2688_v27   ;;  %v2077_v5 = vadd.f32 %v2045_v63, %v3918_v54 }
 0x575   : > { %v2076_v29 = vadd.f32 %v2042_v52, %v3913_v11  ;;  %v2692_v16 = vpop.eup %2691  ;;  %2711 = vrcp.f32 %v2130_v19  ;;  %v2118_v21 = vmul.f32 1.442695, %v2090_v20 }
 0x576   : > { %v2694_v32 = vpop.eup %2693  ;;  %v2133_v58 = vadd.f32 1.0, %v2692_v16  ;;  %2713 = vpow2.f32 %v2114_v28  ;;  %v2093_v51 = vsub.f32 0.0, %v2077_v5  ;;  %1775 = vperm.xlu1 %2606, %v2690_v43  }
 0x577   : > { %v2092_v3 = vsub.f32 0.0, %v2076_v29  ;;  %v2696_v13 = vpop.eup %2695  ;;  %v2132_v41 = vadd.f32 1.0, %v2694_v32  ;;  %2715 = vpow2.f32 %v2120_v55  ;;  %v1794_v32 = vld [vmem:[%s3049_s25] sm:$0xff] }
 0x578   : > { %v2698_v35 = vpop.eup %2697  ;;  %2717 = vrcp.f32 %v2133_v58  ;;  %v2124_v1 = vmul.f32 1.442695, %v2093_v51  ;;  %2160 = vperm.xlu0 %2605, %v2696_v13   ;;  %v4190_v51 = vmax.f32 %v3404_v37, 0.0  ;;  %v1795_v13 = vld [vmem:[%s3049_s25 + $0x10] sm:$0xff] }
 0x579   : > { %v2700_v8 = vpop.eup %2699  ;;  %2719 = vrcp.f32 %v2132_v41  ;;  %v2122_v11 = vmul.f32 1.442695, %v2092_v3 }
 0x57a   : > { %v2702_v54 = vpop.eup %2701  ;;  %2721 = vpow2.f32 %v2118_v21  ;;  %2165 = vperm.xlu1 %2606, %v2698_v35   ;;  %v2135_v45 = vadd.f32 1.0, %v2700_v8  ;;  %v4191_v35 = vmax.f32 %v3412_v53, 0.0  ;;  %v4193_v53 = vmax.f32 %v3455_v18, 0.0 }
 0x57b   : > { %v2704_v15 = vpop.eup %2703  ;;  %v2134_v24 = vadd.f32 1.0, %v2702_v54  ;;  %2723 = vpow2.f32 %v2124_v1  ;;  %v4196_v18 = vmax.f32 %v3490_v31, 0.0 }
 0x57c   : > { %v2706_v22 = vpop.eup %2705 }
 0x57d   : > { %v2708_v56 = vpop.eup %2707  ;;  %2725 = vrcp.f32 %v2134_v24  ;;  %v2137_v7 = vadd.f32 1.0, %v2706_v22  ;;  %v1797_v22 = vld [vmem:[%s3049_s25 + $0x30] sm:$0xff] }
 0x57e   : > { %v2710_v42 = vpop.eup %2709  ;;  %2727 = vpow2.f32 %v2122_v11  ;;  %2170 = vperm.xlu0 %2605, %v2708_v56   ;;  %2175 = vperm.xlu1 %2606, %v2704_v15   ;;  %v1796_v11 = vld [vmem:[%s3049_s25 + $0x20] sm:$0xff] }
 0x57f   : > { %v2712_v0 = vpop.eup %2711  ;;  %2729 = vrcp.f32 %v2135_v45  ;;  %v4192_v45 = vmax.f32 %v3440_v9, 0.0 }
 0x580   : > { %v2714_v61 = vpop.eup %2713  ;;  %2731 = vrcp.f32 %v2137_v7 }
 0x581   : > { %v2716_v33 = vpop.eup %2715  ;;  %v2136_v46 = vadd.f32 1.0, %v2714_v61  ;;  %v4194_v61 = vmax.f32 %v3479_v40, 0.0 }
 0x582   : > { %v2718_v23 = vpop.eup %2717  ;;  %v2139_v12 = vadd.f32 1.0, %v2716_v33  ;;  %2180 = vperm.xlu0 %2605, %v2712_v0   ;;  %2185 = vperm.xlu1 %2606, %v2710_v42   ;;  %v1798_v42 = vld [vmem:[%s3049_s25 + $0x40] sm:$0xff] }
 0x583   : > { %v2720_v49 = vpop.eup %2719  ;;  %2733 = vrcp.f32 %v2136_v46 }
 0x584   : > { %v2722_v44 = vpop.eup %2721  ;;  %2735 = vrcp.f32 %v2139_v12 }
 0x585   : > { %v2724_v28 = vpop.eup %2723  ;;  %v2138_v47 = vadd.f32 1.0, %v2722_v44 }
 0x586   : > { %v2141_v27 = vadd.f32 1.0, %v2724_v28  ;;  %2190 = vperm.xlu0 %2605, %v2720_v49   ;;  %2195 = vperm.xlu1 %2606, %v2718_v23   ;;  %v1800_v23 = vld [vmem:[%s3049_s25 + $0x60] sm:$0xff]  ;;  %v1799_v49 = vld [vmem:[%s3049_s25 + $0x50] sm:$0xff]  ;;  %v4195_v28 = vmax.f32 %v3502_v62, 0.0  ;;  %v4198_v62 = vmax.f32 %v3406_v38, 0.0 }
 0x587   : > { %v2726_v19 = vpop.eup %2725  ;;  %2737 = vrcp.f32 %v2138_v47 }
 0x588   : > { %v2728_v20 = vpop.eup %2727  ;;  %2739 = vrcp.f32 %v2141_v27 }
 0x589   : > { %v2730_v63 = vpop.eup %2729  ;;  %v2140_v52 = vadd.f32 1.0, %v2728_v20  ;;  %v1801_v20 = vld [vmem:[%s3049_s25 + $0x70] sm:$0xff] }
 0x58a   : > { %2200 = vperm.xlu0 %2605, %v2726_v19   ;;  %2205 = vperm.xlu1 %2606, %v2730_v63   ;;  %v2732_v43 = vpop.eup %2731 }
 0x58b   : > { %2741 = vrcp.f32 %v2140_v52  ;;  %v1802_v52 = vld [vmem:[%s3049_s25 + $0x80] sm:$0xff] }
 0x58d   : > { %v2734_v55 = vpop.eup %2733 }
 0x58e   : > { %2210 = vperm.xlu0 %2605, %v2734_v55   ;;  %2215 = vperm.xlu1 %2606, %v2732_v43   ;;  %v2736_v5 = vpop.eup %2735  ;;  %v4197_v55 = vmax.f32 %v3514_v30, 0.0  ;;  %v4200_v30 = vmax.f32 %v3442_v10, 0.0 }
 0x591   : > { %v2738_v29 = vpop.eup %2737 }
 0x592   : > { %2220 = vperm.xlu0 %2605, %v2738_v29   ;;  %2225 = vperm.xlu1 %2606, %v2736_v5   ;;  %v2740_v16 = vpop.eup %2739 }
 0x595   : > { %v2742_v21 = vpop.eup %2741 }
 0x596   : > { %2230 = vperm.xlu0 %2605, %v2742_v21   ;;  %2235 = vperm.xlu1 %2606, %v2740_v16   ;;  %v1803_v21 = vld [vmem:[%s3049_s25 + $0x90] sm:$0xff] }
 0x5d5   : > { %v1701_v58 = vpop.permute.xlu1 %1700 }
 0x5d6   : > { %v1778_v3 = vmul.f32 %v1701_v58, %v4190_v51  ;;  %v1706_v41 = vpop.permute.xlu0 %1705  ;;  %v1804_v58 = vld [vmem:[%s3049_s25 + $0xa0] sm:$0xff] }
 0x5d7   : > { %v1779_v1 = vmul.f32 %v1706_v41, %v4191_v35 }
 0x5d8   : > { %v1810_v8 = vadd.f32 %v1794_v32, %v1778_v3  ;;  %v4199_v3 = vmax.f32 %v3422_v59, 0.0 }
 0x5d9   : > { %v1811_v54 = vadd.f32 %v1795_v13, %v1779_v1  ;;  %v1711_v15 = vpop.permute.xlu1 %1710  ;;  %v1805_v1 = vld [vmem:[%s3049_s25 + $0xb0] sm:$0xff] }
 0x5da   : > { %1826 = vst [vmem:[%s3192_s15] sm:$0xff] %v1810_v8  ;;  %v1780_v24 = vmul.f32 %v1711_v15, %v4192_v45  ;;  %v4201_v15 = vmax.f32 %v3467_v25, 0.0  ;;  %v4202_v45 = vmax.f32 %v3520_v50, 0.0 }
 0x5db   : > { %1827 = vst [vmem:[%s3192_s15 + $0x10] sm:$0xff] %v1811_v54  ;;  %v1806_v54 = vld [vmem:[%s3049_s25 + $0xc0] sm:$0xff] }
 0x5dc   : > { %v1812_v37 = vadd.f32 %v1796_v11, %v1780_v24 }
 0x5dd   : > { %v1716_v56 = vpop.permute.xlu1 %1715  ;;  %v1721_v7 = vpop.permute.xlu0 %1720 }
 0x5de   : > { %1828 = vst [vmem:[%s3192_s15 + $0x20] sm:$0xff] %v1812_v37  ;;  %v1781_v0 = vmul.f32 %v1716_v56, %v4193_v53  ;;  %v1782_v33 = vmul.f32 %v1721_v7, %v4194_v61  ;;  %v1808_v53 = vld [vmem:[%s3049_s25 + $0xe0] sm:$0xff]  ;;  %v4204_v61 = vmax.f32 %v3546_v36, 0.0  ;;  %v2255_v36 = vld [vmem:[%s3049_s25 + $0x18] sm:$0xff] }
 0x5e0   : > { %v1813_v46 = vadd.f32 %v1797_v22, %v1781_v0  ;;  %v1814_v9 = vadd.f32 %v1798_v42, %v1782_v33  ;;  %v1807_v22 = vld [vmem:[%s3049_s25 + $0xd0] sm:$0xff]  ;;  %v4203_v42 = vmax.f32 %v3532_v26, 0.0  ;;  %v2254_v26 = vld [vmem:[%s3049_s25 + $0x8] sm:$0xff] }
 0x5e1   : > { %v1731_v12 = vpop.permute.xlu1 %1730  ;;  %v1726_v44 = vpop.permute.xlu0 %1725  ;;  %v1809_v33 = vld [vmem:[%s3049_s25 + $0xf0] sm:$0xff] }
 0x5e2   : > { %1829 = vst [vmem:[%s3192_s15 + $0x30] sm:$0xff] %v1813_v46  ;;  %1830 = vst [vmem:[%s3192_s15 + $0x40] sm:$0xff] %v1814_v9  ;;  %v1784_v47 = vmul.f32 %v1731_v12, %v4195_v28  ;;  %v1783_v40 = vmul.f32 %v1726_v44, %v4196_v18  ;;  %v4206_v28 = vmax.f32 %v3410_v48, 0.0  ;;  %v4208_v48 = vmax.f32 %v3452_v17, 0.0 }
 0x5e3   : > { %v4211_v17 = vmax.f32 %v3510_v4, 0.0 }
 0x5e4   : > { %v1816_v27 = vadd.f32 %v1800_v23, %v1784_v47  ;;  %v1815_v19 = vadd.f32 %v1799_v49, %v1783_v40  ;;  %v4205_v23 = vmax.f32 %v3558_v6, 0.0 }
 0x5e5   : > { %v1736_v63 = vpop.permute.xlu1 %1735  ;;  %v1741_v43 = vpop.permute.xlu0 %1740 }
 0x5e6   : > { %1832 = vst [vmem:[%s3192_s15 + $0x60] sm:$0xff] %v1816_v27  ;;  %1831 = vst [vmem:[%s3192_s15 + $0x50] sm:$0xff] %v1815_v19  ;;  %v1785_v5 = vmul.f32 %v1736_v63, %v4197_v55  ;;  %v1786_v31 = vmul.f32 %v1741_v43, %v4198_v62  ;;  %v4207_v27 = vmax.f32 %v3430_v2, 0.0 }
 0x5e8   : > { %v1817_v29 = vadd.f32 %v1801_v20, %v1785_v5  ;;  %v1818_v16 = vadd.f32 %v1802_v52, %v1786_v31  ;;  %v2256_v20 = vld [vmem:[%s3049_s25 + $0x28] sm:$0xff]  ;;  %v2257_v52 = vld [vmem:[%s3049_s25 + $0x38] sm:$0xff]  ;;  %v4209_v5 = vmax.f32 %v3476_v39, 0.0 }
 0x5e9   : > { %v1746_v32 = vpop.permute.xlu1 %1745  ;;  %v1751_v51 = vpop.permute.xlu0 %1750 }
 0x5ea   : > { %1833 = vst [vmem:[%s3192_s15 + $0x70] sm:$0xff] %v1817_v29  ;;  %1834 = vst [vmem:[%s3192_s15 + $0x80] sm:$0xff] %v1818_v16  ;;  %v1787_v13 = vmul.f32 %v1746_v32, %v4199_v3  ;;  %v1788_v38 = vmul.f32 %v1751_v51, %v4200_v30  ;;  %v2258_v29 = vld [vmem:[%s3049_s25 + $0x48] sm:$0xff] }
 0x5eb   : > { %v2260_v30 = vld [vmem:[%s3049_s25 + $0x68] sm:$0xff] }
 0x5ec   : > { %v1819_v41 = vadd.f32 %v1803_v21, %v1787_v13  ;;  %v1820_v35 = vadd.f32 %v1804_v58, %v1788_v38  ;;  %v2259_v21 = vld [vmem:[%s3049_s25 + $0x58] sm:$0xff]  ;;  %v4210_v58 = vmax.f32 %v3498_v60, 0.0  ;;  %v4213_v60 = vmax.f32 %v3536_v34, 0.0 }
 0x5ed   : > { %v1756_v8 = vpop.permute.xlu1 %1755  ;;  %v1761_v11 = vpop.permute.xlu0 %1760 }
 0x5ee   : > { %1835 = vst [vmem:[%s3192_s15 + $0x90] sm:$0xff] %v1819_v41  ;;  %1836 = vst [vmem:[%s3192_s15 + $0xa0] sm:$0xff] %v1820_v35  ;;  %v1789_v59 = vmul.f32 %v1756_v8, %v4201_v15  ;;  %v1790_v10 = vmul.f32 %v1761_v11, %v4202_v45  ;;  %v2261_v41 = vld [vmem:[%s3049_s25 + $0x78] sm:$0xff]  ;;  %v2262_v15 = vld [vmem:[%s3049_s25 + $0x88] sm:$0xff] }
 0x5ef   : > { %v2263_v45 = vld [vmem:[%s3049_s25 + $0x98] sm:$0xff] }
 0x5f0   : > { %v1821_v24 = vadd.f32 %v1805_v1, %v1789_v59  ;;  %v1822_v37 = vadd.f32 %v1806_v54, %v1790_v10  ;;  %v4212_v1 = vmax.f32 %v3524_v14, 0.0  ;;  %v4215_v14 = vld [vmem:[#allocation9_spill] sm:$0xff] }
 0x5f1   : > { %v1766_v56 = vpop.permute.xlu1 %1765 }
 0x5f2   : > { %1837 = vst [vmem:[%s3192_s15 + $0xb0] sm:$0xff] %v1821_v24  ;;  %1838 = vst [vmem:[%s3192_s15 + $0xc0] sm:$0xff] %v1822_v37  ;;  %v1791_v7 = vmul.f32 %v1766_v56, %v4203_v42  ;;  %v4214_v24 = vmax.f32 %v3419_v57, 0.0 }
 0x5f3   : > { %v1771_v25 = vpop.permute.xlu0 %1770 }
 0x5f4   : > { %v1823_v0 = vadd.f32 %v1807_v22, %v1791_v7  ;;  %v1792_v50 = vmul.f32 %v1771_v25, %v4204_v61  ;;  %v4216_v22 = vmax.f32 %v4215_v14, 0.0  ;;  %v2264_v7 = vld [vmem:[%s3049_s25 + $0xa8] sm:$0xff]  ;;  %v2265_v25 = vld [vmem:[%s3049_s25 + $0xb8] sm:$0xff] }
 0x5f5   : > { %v1776_v46 = vpop.permute.xlu1 %1775  ;;  %v4217_v61 = vld [vmem:[#allocation10_spill] sm:$0xff] }
 0x5f6   : > { %1839 = vst [vmem:[%s3192_s15 + $0xd0] sm:$0xff] %v1823_v0  ;;  %v1824_v9 = vadd.f32 %v1808_v53, %v1792_v50  ;;  %v1793_v12 = vmul.f32 %v1776_v46, %v4205_v23  ;;  %v4218_v50 = vmax.f32 %v4217_v61, 0.0 }
 0x5f7   : > { %v2161_v49 = vpop.permute.xlu0 %2160 }
 0x5f8   : > { %1840 = vst [vmem:[%s3192_s15 + $0xe0] sm:$0xff] %v1824_v9  ;;  %v1825_v44 = vadd.f32 %v1809_v33, %v1793_v12  ;;  %v2238_v47 = vmul.f32 %v2161_v49, %v4206_v28  ;;  %v4219_v33 = vld [vmem:[#allocation11_spill] sm:$0xff] }
 0x5f9   : > { %v2166_v18 = vpop.permute.xlu1 %2165  ;;  %v4220_v46 = vmax.f32 %v4219_v33, 0.0 }
 0x5fa   : > { %1841 = vst [vmem:[%s3192_s15 + $0xf0] sm:$0xff] %v1825_v44  ;;  %v2270_v40 = vadd.f32 %v2254_v26, %v2238_v47  ;;  %v2239_v19 = vmul.f32 %v2166_v18, %v4207_v27  ;;  %v2266_v26 = vld [vmem:[%s3049_s25 + $0xc8] sm:$0xff]  ;;  %v2267_v44 = vld [vmem:[%s3049_s25 + $0xd8] sm:$0xff] }
 0x5fb   : > { %v4221_v47 = vld [vmem:[#allocation12_spill] sm:$0xff] }
 0x5fc   : > { %2286 = vst [vmem:[%s3192_s15 + $0x8] sm:$0xff] %v2270_v40  ;;  %v2271_v6 = vadd.f32 %v2255_v36, %v2239_v19  ;;  %v4222_v36 = vmax.f32 %v4221_v47, 0.0  ;;  %v4223_v40 = vld [vmem:[#allocation13_spill] sm:$0xff] }
 0x5fd   : > { %v2171_v63 = vpop.permute.xlu0 %2170  ;;  %v2176_v43 = vpop.permute.xlu1 %2175  ;;  %v4224_v27 = vmax.f32 %v4223_v40, 0.0 }
 0x5fe   : > { %2287 = vst [vmem:[%s3192_s15 + $0x18] sm:$0xff] %v2271_v6  ;;  %v2240_v55 = vmul.f32 %v2171_v63, %v4208_v48  ;;  %v2241_v62 = vmul.f32 %v2176_v43, %v4209_v5  ;;  %v2268_v63 = vld [vmem:[%s3049_s25 + $0xe8] sm:$0xff]  ;;  %v2269_v43 = vld [vmem:[%s3049_s25 + $0xf8] sm:$0xff]  ;;  %s4230_s25 = sand.u32 1, %s2817_s18  }
 0x5ff   : > { %s4078_s16 = scalar_lea.sflag [#allocation7], %s4230_s25 }
 0x600   : > { %v2272_v31 = vadd.f32 %v2256_v20, %v2240_v55  ;;  %v2273_v2 = vadd.f32 %v2257_v52, %v2241_v62  ;;  %v4226_v55 = vld [vmem:[#allocation14_spill] sm:$0xff] }
 0x601   : > { %v2181_v16 = vpop.permute.xlu0 %2180  ;;  %v2186_v32 = vpop.permute.xlu1 %2185  ;;  %v4227_v5 = vmax.f32 %v4226_v55, 0.0 }
 0x602   : > { %2288 = vst [vmem:[%s3192_s15 + $0x28] sm:$0xff] %v2272_v31  ;;  %2289 = vst [vmem:[%s3192_s15 + $0x38] sm:$0xff] %v2273_v2  ;;  %v2242_v51 = vmul.f32 %v2181_v16, %v4210_v58  ;;  %v2243_v39 = vmul.f32 %v2186_v32, %v4211_v17  ;;  %v4228_v31 = vld [vmem:[#allocation15_spill] sm:$0xff] }
 0x603   : > { %v4229_v2 = vmax.f32 %v4228_v31, 0.0 }
 0x604   : > { %v2274_v3 = vadd.f32 %v2258_v29, %v2242_v51  ;;  %v2275_v13 = vadd.f32 %v2259_v21, %v2243_v39 }
 0x605   : > { %v2191_v38 = vpop.permute.xlu0 %2190  ;;  %v2196_v35 = vpop.permute.xlu1 %2195 }
 0x606   : > { %2290 = vst [vmem:[%s3192_s15 + $0x48] sm:$0xff] %v2274_v3  ;;  %2291 = vst [vmem:[%s3192_s15 + $0x58] sm:$0xff] %v2275_v13  ;;  %v2244_v8 = vmul.f32 %v2191_v38, %v4212_v1  ;;  %v2245_v4 = vmul.f32 %v2196_v35, %v4213_v60 }
 0x608   : > { %v2276_v54 = vadd.f32 %v2260_v30, %v2244_v8  ;;  %v2277_v11 = vadd.f32 %v2261_v41, %v2245_v4 }
 0x609   : > { %v2201_v59 = vpop.permute.xlu0 %2200  ;;  %v2206_v10 = vpop.permute.xlu1 %2205 }
 0x60a   : > { %2292 = vst [vmem:[%s3192_s15 + $0x68] sm:$0xff] %v2276_v54  ;;  %2293 = vst [vmem:[%s3192_s15 + $0x78] sm:$0xff] %v2277_v11  ;;  %v2246_v37 = vmul.f32 %v2201_v59, %v4214_v24  ;;  %v2247_v34 = vmul.f32 %v2206_v10, %v4216_v22 }
 0x60c   : > { %v2278_v56 = vadd.f32 %v2262_v15, %v2246_v37  ;;  %v2279_v42 = vadd.f32 %v2263_v45, %v2247_v34 }
 0x60d   : > { %v2211_v53 = vpop.permute.xlu0 %2210  ;;  %v2216_v0 = vpop.permute.xlu1 %2215 }
 0x60e   : > { %2294 = vst [vmem:[%s3192_s15 + $0x88] sm:$0xff] %v2278_v56  ;;  %2295 = vst [vmem:[%s3192_s15 + $0x98] sm:$0xff] %v2279_v42  ;;  %v2248_v57 = vmul.f32 %v2211_v53, %v4218_v50  ;;  %v2249_v9 = vmul.f32 %v2216_v0, %v4220_v46 }
 0x610   : > { %v2280_v23 = vadd.f32 %v2264_v7, %v2248_v57  ;;  %v2281_v12 = vadd.f32 %v2265_v25, %v2249_v9 }
 0x611   : > { %v2221_v49 = vpop.permute.xlu0 %2220  ;;  %v2226_v28 = vpop.permute.xlu1 %2225 }
 0x612   : > { %2296 = vst [vmem:[%s3192_s15 + $0xa8] sm:$0xff] %v2280_v23  ;;  %2297 = vst [vmem:[%s3192_s15 + $0xb8] sm:$0xff] %v2281_v12  ;;  %v2250_v18 = vmul.f32 %v2221_v49, %v4222_v36  ;;  %v2251_v19 = vmul.f32 %v2226_v28, %v4224_v27 }
 0x614   : > { %v2282_v6 = vadd.f32 %v2266_v26, %v2250_v18  ;;  %v2283_v20 = vadd.f32 %v2267_v44, %v2251_v19 }
 0x615   : > { %v2231_v52 = vpop.permute.xlu0 %2230  ;;  %v2236_v48 = vpop.permute.xlu1 %2235 }
 0x616   : > { %2298 = vst [vmem:[%s3192_s15 + $0xc8] sm:$0xff] %v2282_v6  ;;  %2299 = vst [vmem:[%s3192_s15 + $0xd8] sm:$0xff] %v2283_v20  ;;  %v2252_v62 = vmul.f32 %v2231_v52, %v4227_v5  ;;  %v2253_v29 = vmul.f32 %v2236_v48, %v4229_v2 }
 0x618   : > { %v2284_v16 = vadd.f32 %v2268_v63, %v2252_v62  ;;  %v2285_v21 = vadd.f32 %v2269_v43, %v2253_v29 }
 0x61a   : > { %2300 = vst [vmem:[%s3192_s15 + $0xe8] sm:$0xff] %v2284_v16  ;;  %2301 = vst [vmem:[%s3192_s15 + $0xf8] sm:$0xff] %v2285_v21 }
 0x61b   : > { %2756 = shalt.err (!%p2753_p7)
}
 0x61c   : > { %s2757_s15 = scalar_lea.hbm %s4070_s12, 4096  ;;  %s2761_s1 = scalar_lea.hbm %s4131_s11, 8192 }
 0x61d   : > { %p2758_p10 = scmp.ne.s32.totalorder %s4070_s12, %s2757_s15  ;;  %p2762_p13 = scmp.lt.u32.totalorder %s4070_s12, %s4131_s11 }
 0x61e   : > { %p2763_p0 = scmp.lt.u32.totalorder %s2761_s1, %s2757_s15  ;;  %p2765_p2 = scmp.lt.u32.totalorder %s2757_s15, %s4070_s12 }
 0x61f   : > { %p2759_p11 = pnand %p2758_p10, %p2953_p6 }
 0x620   : > { %p2764_p1 = por %p2763_p0, %p2762_p13 }
 0x621   : > { %p2760_p12 = pneg %p2759_p11 }
 0x622   : > { %p2766_p3 = por %p2765_p2, %p2764_p1 }
 0x624   : > { %p2767_p4 = pnand %p2766_p3, %p2760_p12 }
 0x626   : > { %2770 = shalt.err (!%p2767_p4)
}
 0x627   : > { %s2852_s13 = smov 256   ;;  %s2853_s0 = smov 512  }
 0x628   : > { %s2854_s21 = smov 16  }
 0x629   : > { %2486 = dma.vmem_to_hbm [thread:$0]  (%p2953_p6), %s4072_s30, 4096, %s4070_s12, %s4078_s16, %s2852_s13, %s2853_s0, %s2854_s21  }
 0x62a PF: > { %s2331_s22 = sand.u32 1, %s2813_s17   ;;  %p2489_p5 = pnand %p2411_p9, %p2957_p8 }
 0x62b   : > { %s2332_s15 = scalar_lea.sflag [#allocation7], %s2331_s22 }
 0x62c   : > { %2808 = dma.done.wait (!%p2489_p5), %s2332_s15, 4096  }
 0x62d   : > { %2810 = vsyncadd (!%p2489_p5), %s2332_s15, 4294963200  ;;  %p21_p7 = scmp.ge.s32.totalorder %s2938_s23, 4   ;;  %s4231_s17 = smov %s2817_s18 }
 0x62e   : > { %s4232_s18 = smov %s2821_s19  ;;  %s4233_s19 = smov %s2951_s26 }
 0x62f   : > { %s4234_s20 = smov %s2938_s23  ;;  %23 = sbr.rel (!%p21_p7) target bundleno = 6 (0x6), region = 162 }
 0x636   :  { %2337 = vsyncpa [#allocation7], 1 }
 0x637   :  { %2339 = vsyncpa [#allocation7 + $0x1], 1 }

</bundles_post_ra>
